<compile_context>
chip_gen: v7x
topology: tpu7x:2x2x1
jax: 0.10.0
libtpu: 0.0.40
codegen_flags: <defaults>
</compile_context>

<pallas_src>
import functools
import math

import jax
import jax.numpy as jnp
from jax.experimental import pallas as pl
from jax.experimental.pallas import tpu as pltpu


# Row-slab budget per grid step. 512 rows is sized for 128 MiB-VMEM parts
# (v5e/v6e); drop to 256 for large d_model on v7x (64 MiB VMEM per TC).
_ROW_BUDGET = 512


# ----------------------------------------------------------------------------
# Fused ResAttBlock kernel
#   out = x1 + MLP(LN2(x1)),  x1 = x + OutProj(MHA_window(LN1(x)))
# One grid step handles TG whole attention windows (TR = TG * w_len rows).
# ----------------------------------------------------------------------------

def _res_att_block_kernel(
    x_ref,                      # (TR, D)   f32 residual-stream rows
    ln1_g_ref, ln1_b_ref,       # (1, D)    f32
    wqkv_ref, bqkv_ref,         # (D, 3D) bf16, (1, 3D) f32
    wout_ref, bout_ref,         # (D, D)  bf16, (1, D)  f32
    ln2_g_ref, ln2_b_ref,       # (1, D)    f32
    wfc_ref, bfc_ref,           # (D, H)  bf16, (1, H)  f32   (H = 4*D)
    wproj_ref, bproj_ref,       # (H, D)  bf16, (1, D)  f32
    o_ref,                      # (TR, D)   f32
    *, heads, w_len, eps, scale, roll_shift, mlp_chunk):
  TR, D = x_ref.shape
  TG = TR // w_len
  dh = D // heads
  HID = wfc_ref.shape[1]

  def layernorm(t, g, b):
    mu = jnp.mean(t, axis=-1, keepdims=True)
    var = jnp.mean((t - mu) ** 2, axis=-1, keepdims=True)
    return (t - mu) * jax.lax.rsqrt(var + eps) * g + b

  def roll_rows(t, s):
    # jnp.roll(t, s, axis=0) with a static shift, written as slice + concat so
    # the Mosaic lowering (sublane concatenate) is unambiguous.
    n = t.shape[0]
    s = s % n
    if s == 0:
      return t
    return jnp.concatenate([t[n - s:, :], t[:n - s, :]], axis=0)

  x = x_ref[...].astype(jnp.float32)
  # Shifted windows: the per-batch roll happens in VMEM (the row tile covers a
  # whole batch element), saving two full HBM passes of wrapper jnp.roll.
  if roll_shift:
    x = roll_rows(x, roll_shift)

  # ---- LayerNorm1 fused into the QKV projection ----
  y = layernorm(x, ln1_g_ref[...], ln1_b_ref[...])
  qkv = jnp.dot(y.astype(jnp.bfloat16), wqkv_ref[...],
                preferred_element_type=jnp.float32) + bqkv_ref[...]

  # ---- windowed multi-head attention, batched across the TG windows ----
  # Each head is consumed immediately by accumulating oh @ wout[h] into the
  # residual: no (TR, D) concat/relayout and only one head's intermediates are
  # live at a time. With dh a multiple of 128 the q/k/v lane slices are
  # aligned (no cross-lane shifts).
  # NOTE: the attention einsums have K=dh, N=w_len; on v6e/v7x the 2x256^2 MXU
  # is underfilled unless dh/w_len >= 256 -- don't expect MXU scaling here.
  # TODO(synk): for window_size=None with long L, add a flash-style KV inner
  # loop; the dense (TG, w_len, w_len) scores are VMEM-quadratic in w_len.
  x1 = x + bout_ref[...]
  for h in range(heads):
    qh = qkv[:, h * dh:(h + 1) * dh].reshape(TG, w_len, dh)
    kh = qkv[:, D + h * dh:D + (h + 1) * dh].reshape(TG, w_len, dh)
    vh = qkv[:, 2 * D + h * dh:2 * D + (h + 1) * dh].reshape(TG, w_len, dh)
    s = jnp.einsum("bqd,bkd->bqk",
                   qh.astype(jnp.bfloat16), kh.astype(jnp.bfloat16),
                   preferred_element_type=jnp.float32) * scale
    s = s - jnp.max(s, axis=-1, keepdims=True)
    p = jnp.exp(s)
    p = p * pl.reciprocal(jnp.sum(p, axis=-1, keepdims=True), approx=True)
    oh = jnp.einsum("bqk,bkd->bqd",
                    p.astype(jnp.bfloat16), vh.astype(jnp.bfloat16),
                    preferred_element_type=jnp.float32)
    x1 = x1 + jnp.dot(oh.reshape(TR, dh).astype(jnp.bfloat16),
                      wout_ref[h * dh:(h + 1) * dh, :],
                      preferred_element_type=jnp.float32)

  # ---- LayerNorm2 fused into the chunked MLP ----
  # fc -> fast GELU -> proj in `mlp_chunk`-lane slices of the 4*D hidden axis,
  # accumulating into the (TR, D) residual, so the full (TR, 4D) f32 hidden is
  # never materialized.
  y2 = layernorm(x1, ln2_g_ref[...], ln2_b_ref[...]).astype(jnp.bfloat16)
  out = x1 + bproj_ref[...]
  for c0 in range(0, HID, mlp_chunk):
    hdn = (jnp.dot(y2, wfc_ref[:, c0:c0 + mlp_chunk],
                   preferred_element_type=jnp.float32)
           + bfc_ref[:, c0:c0 + mlp_chunk])
    hdn = hdn * jax.nn.sigmoid(1.702 * hdn)          # fast GELU (GELU_), f32
    # TODO(synk): on v6e/v7x the GELU could run in bf16 (halves EUP/VPU work);
    # keep f32 on v5e (no bf16 VPU/EUP).
    out = out + jnp.dot(hdn.astype(jnp.bfloat16),
                        wproj_ref[c0:c0 + mlp_chunk, :],
                        preferred_element_type=jnp.float32)

  if roll_shift:
    out = roll_rows(out, -roll_shift)
  o_ref[...] = out.astype(o_ref.dtype)


# ----------------------------------------------------------------------------
# Pallas wrapper
# ----------------------------------------------------------------------------

def _pick_window_tile(num_windows, w_len, row_budget=_ROW_BUDGET):
  """Pick TG = windows per grid step.

  Hard constraint: TG divides num_windows and TG*w_len is a multiple of 8
  (or TG == num_windows so the block equals the full array -> tiling rule
  exemption). Preference: grid >= 2 (pipelining + v7x megacore), row tile
  within budget, even grid length, then the largest row tile.
  """
  best = None
  for tg in range(1, num_windows + 1):
    if num_windows % tg:
      continue
    tr = tg * w_len
    if tr % 8 != 0 and tg != num_windows:
      continue
    grid = num_windows // tg
    key = (grid >= 2, tr <= row_budget, grid % 2 == 0, tr)
    if best is None or key > best[0]:
      best = (key, tg)
  return best[1]


def _vmem_limit_bytes(D, hid, tr, w_len):
  weights = 2 * (D * 3 * D + D * D + D * hid + hid * D)    # bf16, single-buffered
  biases = 4 * (3 * D + D + hid + D + 4 * D)               # f32 biases + LN params
  io = 2 * 2 * tr * D * 4                                  # x / out, double-buffered f32
  interm = 4 * tr * (3 * D + 8 * D) + 8 * (tr // w_len) * w_len * w_len
  total = weights + biases + io + interm
  return int(min(128 * 2**20, max(32 * 2**20, 1.4 * total)))


def _fused_res_att_block(x2d, p, *, heads, w_len, eps, roll_shift, tg):
  """x2d: (num_windows * w_len, D) rows, batch-major / window-contiguous."""
  R, D = x2d.shape
  num_windows = R // w_len
  tr = tg * w_len
  grid = num_windows // tg
  scale = 1.0 / math.sqrt(D // heads)
  hid = p["wfc"].shape[1]
  mlp_chunk = 512 if (hid > 512 and hid % 512 == 0) else hid

  def const_spec(a):
    # Grid-invariant operand: whole array resident in VMEM, single-buffered.
    return pl.BlockSpec(a.shape, lambda i: (0, 0), pipeline_mode=pl.Buffered(1))

  row_spec = pl.BlockSpec((tr, D), lambda i: (i, 0))
  kernel = functools.partial(
      _res_att_block_kernel, heads=heads, w_len=w_len, eps=eps, scale=scale,
      roll_shift=roll_shift, mlp_chunk=mlp_chunk)
  return pl.pallas_call(
      kernel,
      out_shape=jax.ShapeDtypeStruct((R, D), x2d.dtype),
      grid=(grid,),
      in_specs=[row_spec,
                const_spec(p["ln1_g"]), const_spec(p["ln1_b"]),
                const_spec(p["wqkv"]), const_spec(p["bqkv"]),
                const_spec(p["wout"]), const_spec(p["bout"]),
                const_spec(p["ln2_g"]), const_spec(p["ln2_b"]),
                const_spec(p["wfc"]), const_spec(p["bfc"]),
                const_spec(p["wproj"]), const_spec(p["bproj"])],
      out_specs=row_spec,
      compiler_params=pltpu.CompilerParams(
          dimension_semantics=("parallel",),
          vmem_limit_bytes=_vmem_limit_bytes(D, hid, tr, w_len)),
  )(x2d, p["ln1_g"], p["ln1_b"], p["wqkv"], p["bqkv"], p["wout"], p["bout"],
    p["ln2_g"], p["ln2_b"], p["wfc"], p["bfc"], p["wproj"], p["bproj"])


@functools.partial(jax.jit, static_argnames=("index", "heads", "window_size", "eps"))
def res_att_block(x, params, *, index, heads, window_size, eps=1e-5):
  """ResAttBlock.forward(x, index). x: (L, B, d_model), seq-first like nn.MultiheadAttention."""
  L, B, D = x.shape
  assert D % heads == 0
  # TODO(synk): in a multi-layer model keep the residual stream batch-first
  # (and optionally bf16) between layers so these transposes happen once at
  # the model boundary instead of per layer.
  xb = jnp.transpose(x, (1, 0, 2))                  # (B, L, D) batch-first

  if window_size is None:
    w_len, shifted = L, False
  else:
    assert L % window_size == 0
    w_len = window_size
    shifted = (index % 2 == 1)
  shift = (window_size // 2) if shifted else 0
  num_windows = (B * L) // w_len

  # Shifted windows: the roll is a pure token permutation and LN / MLP /
  # residual are per-token, so rolling the residual-stream input and
  # un-rolling the output is exactly PyTorch's roll-inside-the-attention
  # branch. When a row tile can cover a whole batch element the roll is done
  # inside the kernel (no extra HBM passes); otherwise fall back to jnp.roll.
  roll_shift = 0
  if shifted and (L % 8 == 0) and (L <= 2 * _ROW_BUDGET):
    roll_shift = shift
    tg = L // w_len                                  # one batch element per tile
  else:
    if shifted:
      # TODO(synk): manual-DMA wrap-window path to drop these HBM passes too.
      xb = jnp.roll(xb, shift, axis=1)
    tg = _pick_window_tile(num_windows, w_len)

  out = _fused_res_att_block(xb.reshape(B * L, D), params, heads=heads,
                             w_len=w_len, eps=eps, roll_shift=roll_shift, tg=tg)
  out = out.reshape(B, L, D)
  if shifted and roll_shift == 0:
    out = jnp.roll(out, -shift, axis=1)
  return jnp.transpose(out, (1, 0, 2))


# ----------------------------------------------------------------------------
# Parameters (pre-transposed to (K, N); matmul weights stored in bf16)
# ----------------------------------------------------------------------------

def init_res_att_block_params(key, d_model, std=0.02):
  D = d_model
  ks = jax.random.split(key, 8)

  def w(k, shape):
    return (jax.random.normal(k, shape, jnp.float32) * std).astype(jnp.bfloat16)

  def b(k, n):
    return jax.random.normal(k, (1, n), jnp.float32) * std

  return {
      "ln1_g": jnp.ones((1, D), jnp.float32), "ln1_b": jnp.zeros((1, D), jnp.float32),
      "ln2_g": jnp.ones((1, D), jnp.float32), "ln2_b": jnp.zeros((1, D), jnp.float32),
      "wqkv": w(ks[0], (D, 3 * D)),  "bqkv": b(ks[1], 3 * D),
      "wout": w(ks[2], (D, D)),      "bout": b(ks[3], D),
      "wfc":  w(ks[4], (D, 4 * D)),  "bfc":  b(ks[5], 4 * D),
      "wproj": w(ks[6], (4 * D, D)), "bproj": b(ks[7], D),
  }


# ----------------------------------------------------------------------------
# Pure-JAX reference (mirrors the PyTorch module) for a correctness check
# ----------------------------------------------------------------------------

def res_att_block_reference(x, p, *, index, heads, window_size, eps=1e-5):
  L, B, D = x.shape
  dh = D // heads

  def ln(t, g, b):
    mu = jnp.mean(t, axis=-1, keepdims=True)
    var = jnp.mean((t - mu) ** 2, axis=-1, keepdims=True)
    return (t - mu) * jax.lax.rsqrt(var + eps) * g + b

  wqkv = p["wqkv"].astype(jnp.float32)
  wout = p["wout"].astype(jnp.float32)
  wfc = p["wfc"].astype(jnp.float32)
  wproj = p["wproj"].astype(jnp.float32)

  xb = jnp.transpose(x, (1, 0, 2))                   # (B, L, D)
  y = ln(xb, p["ln1_g"][0], p["ln1_b"][0])
  shifted = (window_size is not None) and (index % 2 == 1)
  if shifted:
    y = jnp.roll(y, window_size // 2, axis=1)
  w_len = L if window_size is None else window_size
  nw = B * L // w_len
  yw = y.reshape(nw, w_len, D)

  qkv = yw @ wqkv + p["bqkv"][0]
  q, k, v = jnp.split(qkv, 3, axis=-1)
  q = q.reshape(nw, w_len, heads, dh).transpose(0, 2, 1, 3)
  k = k.reshape(nw, w_len, heads, dh).transpose(0, 2, 1, 3)
  v = v.reshape(nw, w_len, heads, dh).transpose(0, 2, 1, 3)
  s = jnp.einsum("nhqd,nhkd->nhqk", q, k) / math.sqrt(dh)
  a = jax.nn.softmax(s, axis=-1)
  o = jnp.einsum("nhqk,nhkd->nhqd", a, v).transpose(0, 2, 1, 3).reshape(nw, w_len, D)
  attn = (o @ wout + p["bout"][0]).reshape(B, L, D)
  if shifted:
    attn = jnp.roll(attn, -(window_size // 2), axis=1)
  x1 = xb + attn

  y2 = ln(x1, p["ln2_g"][0], p["ln2_b"][0])
  h = y2 @ wfc + p["bfc"][0]
  h = h * jax.nn.sigmoid(1.702 * h)
  out = x1 + (h @ wproj + p["bproj"][0])
  return jnp.transpose(out, (1, 0, 2))


# ----------------------------------------------------------------------------

if __name__ == "__main__":
  # Small but layout-realistic: d_model multiple of 128, dh = 128, window = 16
  # (shift = 8 keeps the in-kernel roll sublane-aligned).
  L, B, D = 32, 2, 256            # seq len, batch, d_model
  heads, window_size = 2, 16

  key = jax.random.PRNGKey(0)
  kx, kp = jax.random.split(key)
  x = jax.random.normal(kx, (L, B, D), jnp.float32)   # (L, B, d_model) seq-first
  params = init_res_att_block_params(kp, D)

  configs = [
      dict(index=0, window_size=window_size),   # plain windows
      dict(index=1, window_size=window_size),   # shifted windows (in-kernel roll)
      dict(index=0, window_size=None),          # full (per-batch) attention
  ]
  y = x
  for cfg in configs:
    y_k = res_att_block(y, params, index=cfg["index"], heads=heads,
                        window_size=cfg["window_size"])
    y_r = res_att_block_reference(y, params, index=cfg["index"], heads=heads,
                                  window_size=cfg["window_size"])
    jax.block_until_ready(y_k)
    assert y_k.shape == (L, B, D), y_k.shape
    assert bool(jnp.all(jnp.isfinite(y_k)))
    err = float(jnp.max(jnp.abs(y_k - y_r)))
    assert err < 5e-2, f"mismatch vs reference: {err}"
    y = y_k

  print("KERNEL_OK")
</pallas_src>

<mosaic_0001>
module attributes {stable_mosaic.version = 11 : i64} {
  func.func @_res_att_block_kernel(%arg0: i32, %arg1: memref<32x256xf32, #tpu.memory_space<vmem>>, %arg2: memref<1x256xf32, #tpu.memory_space<vmem>>, %arg3: memref<1x256xf32, #tpu.memory_space<vmem>>, %arg4: memref<256x768xbf16, #tpu.memory_space<vmem>>, %arg5: memref<1x768xf32, #tpu.memory_space<vmem>>, %arg6: memref<256x256xbf16, #tpu.memory_space<vmem>>, %arg7: memref<1x256xf32, #tpu.memory_space<vmem>>, %arg8: memref<1x256xf32, #tpu.memory_space<vmem>>, %arg9: memref<1x256xf32, #tpu.memory_space<vmem>>, %arg10: memref<256x1024xbf16, #tpu.memory_space<vmem>>, %arg11: memref<1x1024xf32, #tpu.memory_space<vmem>>, %arg12: memref<1024x256xbf16, #tpu.memory_space<vmem>>, %arg13: memref<1x256xf32, #tpu.memory_space<vmem>>, %arg14: memref<32x256xf32, #tpu.memory_space<vmem>>) attributes {dimension_semantics = [#tpu.dimension_semantics<parallel>], iteration_bounds = array<i64: 2>, scalar_prefetch = 0 : i64, scratch_operands = 0 : i64, tpu.core_type = #tpu.core_type<tc>, window_params = [{transform_indices = @transform_0, window_bounds = array<i64: 32, 256>}, {pipeline_mode = #tpu.pipeline_mode<synchronous>, transform_indices = @transform_1, window_bounds = array<i64: 1, 256>}, {pipeline_mode = #tpu.pipeline_mode<synchronous>, transform_indices = @transform_2, window_bounds = array<i64: 1, 256>}, {pipeline_mode = #tpu.pipeline_mode<synchronous>, transform_indices = @transform_3, window_bounds = array<i64: 256, 768>}, {pipeline_mode = #tpu.pipeline_mode<synchronous>, transform_indices = @transform_4, window_bounds = array<i64: 1, 768>}, {pipeline_mode = #tpu.pipeline_mode<synchronous>, transform_indices = @transform_5, window_bounds = array<i64: 256, 256>}, {pipeline_mode = #tpu.pipeline_mode<synchronous>, transform_indices = @transform_6, window_bounds = array<i64: 1, 256>}, {pipeline_mode = #tpu.pipeline_mode<synchronous>, transform_indices = @transform_7, window_bounds = array<i64: 1, 256>}, {pipeline_mode = #tpu.pipeline_mode<synchronous>, transform_indices = @transform_8, window_bounds = array<i64: 1, 256>}, {pipeline_mode = #tpu.pipeline_mode<synchronous>, transform_indices = @transform_9, window_bounds = array<i64: 256, 1024>}, {pipeline_mode = #tpu.pipeline_mode<synchronous>, transform_indices = @transform_10, window_bounds = array<i64: 1, 1024>}, {pipeline_mode = #tpu.pipeline_mode<synchronous>, transform_indices = @transform_11, window_bounds = array<i64: 1024, 256>}, {pipeline_mode = #tpu.pipeline_mode<synchronous>, transform_indices = @transform_12, window_bounds = array<i64: 1, 256>}, {transform_indices = @transform_13, window_bounds = array<i64: 32, 256>}]} {
    %c0 = arith.constant 0 : index
    %c0_0 = arith.constant 0 : index
    %0 = vector.load %arg1[%c0, %c0_0] : memref<32x256xf32, #tpu.memory_space<vmem>>, vector<32x256xf32>
    %c0_1 = arith.constant 0 : index
    %c0_2 = arith.constant 0 : index
    %1 = vector.load %arg2[%c0_1, %c0_2] : memref<1x256xf32, #tpu.memory_space<vmem>>, vector<1x256xf32>
    %c0_3 = arith.constant 0 : index
    %c0_4 = arith.constant 0 : index
    %2 = vector.load %arg3[%c0_3, %c0_4] : memref<1x256xf32, #tpu.memory_space<vmem>>, vector<1x256xf32>
    %cst = arith.constant dense<0.000000e+00> : vector<32xf32>
    %3 = vector.multi_reduction <add>, %0, %cst [1] : vector<32x256xf32> to vector<32xf32>
    %4 = vector.shape_cast %3 : vector<32xf32> to vector<32x1xf32>
    %cst_5 = arith.constant 2.560000e+02 : f32
    %5 = vector.broadcast %cst_5 : f32 to vector<32x1xf32>
    %6 = arith.divf %4, %5 : vector<32x1xf32>
    %7 = vector.broadcast %6 : vector<32x1xf32> to vector<32x256xf32>
    %8 = arith.subf %0, %7 : vector<32x256xf32>
    %9 = arith.mulf %8, %8 : vector<32x256xf32>
    %cst_6 = arith.constant dense<0.000000e+00> : vector<32xf32>
    %10 = vector.multi_reduction <add>, %9, %cst_6 [1] : vector<32x256xf32> to vector<32xf32>
    %11 = vector.shape_cast %10 : vector<32xf32> to vector<32x1xf32>
    %cst_7 = arith.constant 2.560000e+02 : f32
    %12 = vector.broadcast %cst_7 : f32 to vector<32x1xf32>
    %13 = arith.divf %11, %12 : vector<32x1xf32>
    %14 = vector.broadcast %6 : vector<32x1xf32> to vector<32x256xf32>
    %15 = arith.subf %0, %14 : vector<32x256xf32>
    %cst_8 = arith.constant 9.99999974E-6 : f32
    %16 = vector.broadcast %cst_8 : f32 to vector<32x1xf32>
    %17 = arith.addf %13, %16 : vector<32x1xf32>
    %18 = math.rsqrt %17 : vector<32x1xf32>
    %19 = vector.broadcast %18 : vector<32x1xf32> to vector<32x256xf32>
    %20 = arith.mulf %15, %19 : vector<32x256xf32>
    %21 = vector.broadcast %1 : vector<1x256xf32> to vector<32x256xf32>
    %22 = arith.mulf %20, %21 : vector<32x256xf32>
    %23 = vector.broadcast %2 : vector<1x256xf32> to vector<32x256xf32>
    %24 = arith.addf %22, %23 : vector<32x256xf32>
    %25 = arith.truncf %24 : vector<32x256xf32> to vector<32x256xbf16>
    %c0_9 = arith.constant 0 : index
    %c0_10 = arith.constant 0 : index
    %26 = vector.load %arg4[%c0_9, %c0_10] : memref<256x768xbf16, #tpu.memory_space<vmem>>, vector<256x768xbf16>
    %cst_11 = arith.constant dense<0.000000e+00> : vector<32x768xf32>
    %27 = tpu.matmul %25, %26, %cst_11 {dimension_numbers = #tpu.dot_dimension_numbers<[1], [0], [0], [1], [0, 0, 1, 1], [], []>} : vector<32x256xbf16>, vector<256x768xbf16>, vector<32x768xf32> -> vector<32x768xf32>
    %c0_12 = arith.constant 0 : index
    %c0_13 = arith.constant 0 : index
    %28 = vector.load %arg5[%c0_12, %c0_13] : memref<1x768xf32, #tpu.memory_space<vmem>>, vector<1x768xf32>
    %29 = vector.broadcast %28 : vector<1x768xf32> to vector<32x768xf32>
    %30 = arith.addf %27, %29 : vector<32x768xf32>
    %c0_14 = arith.constant 0 : index
    %c0_15 = arith.constant 0 : index
    %31 = vector.load %arg7[%c0_14, %c0_15] : memref<1x256xf32, #tpu.memory_space<vmem>>, vector<1x256xf32>
    %32 = vector.broadcast %31 : vector<1x256xf32> to vector<32x256xf32>
    %33 = arith.addf %0, %32 : vector<32x256xf32>
    %34 = vector.extract_strided_slice %30 {offsets = [0, 0], sizes = [32, 128], strides = [1, 1]} : vector<32x768xf32> to vector<32x128xf32>
    %35 = vector.shape_cast %34 : vector<32x128xf32> to vector<2x16x128xf32>
    %36 = vector.extract_strided_slice %30 {offsets = [0, 256], sizes = [32, 128], strides = [1, 1]} : vector<32x768xf32> to vector<32x128xf32>
    %37 = vector.shape_cast %36 : vector<32x128xf32> to vector<2x16x128xf32>
    %38 = vector.extract_strided_slice %30 {offsets = [0, 512], sizes = [32, 128], strides = [1, 1]} : vector<32x768xf32> to vector<32x128xf32>
    %39 = vector.shape_cast %38 : vector<32x128xf32> to vector<2x16x128xf32>
    %40 = arith.truncf %35 : vector<2x16x128xf32> to vector<2x16x128xbf16>
    %41 = arith.truncf %37 : vector<2x16x128xf32> to vector<2x16x128xbf16>
    "tpu.trace_start"() <{level = 10 : i32, message = "bqd,bkd->bqk"}> : () -> ()
    %cst_16 = arith.constant dense<0.000000e+00> : vector<2x16x16xf32>
    %42 = tpu.matmul %40, %41, %cst_16 {dimension_numbers = #tpu.dot_dimension_numbers<[2], [2], [1], [1], [0, 0, 0, 1, 1, 1], [0], [0]>} : vector<2x16x128xbf16>, vector<2x16x128xbf16>, vector<2x16x16xf32> -> vector<2x16x16xf32>
    "tpu.trace_stop"() : () -> ()
    %cst_17 = arith.constant 0.0883883461 : f32
    %43 = vector.broadcast %cst_17 : f32 to vector<2x16x16xf32>
    %44 = arith.mulf %42, %43 : vector<2x16x16xf32>
    %cst_18 = arith.constant dense<0xFF800000> : vector<2x16xf32>
    %45 = vector.multi_reduction <maximumf>, %44, %cst_18 [2] : vector<2x16x16xf32> to vector<2x16xf32>
    %46 = vector.shape_cast %45 : vector<2x16xf32> to vector<2x16x1xf32>
    %47 = vector.broadcast %46 : vector<2x16x1xf32> to vector<2x16x16xf32>
    %48 = arith.subf %44, %47 : vector<2x16x16xf32>
    %49 = math.exp %48 : vector<2x16x16xf32>
    %cst_19 = arith.constant dense<0.000000e+00> : vector<2x16xf32>
    %50 = vector.multi_reduction <add>, %49, %cst_19 [2] : vector<2x16x16xf32> to vector<2x16xf32>
    %51 = vector.shape_cast %50 : vector<2x16xf32> to vector<2x16x1xf32>
    %52 = tpu.reciprocal %51 {approx = true} : vector<2x16x1xf32> -> vector<2x16x1xf32>
    %53 = vector.broadcast %52 : vector<2x16x1xf32> to vector<2x16x16xf32>
    %54 = arith.mulf %49, %53 : vector<2x16x16xf32>
    %55 = arith.truncf %54 : vector<2x16x16xf32> to vector<2x16x16xbf16>
    %56 = arith.truncf %39 : vector<2x16x128xf32> to vector<2x16x128xbf16>
    "tpu.trace_start"() <{level = 10 : i32, message = "bqk,bkd->bqd"}> : () -> ()
    %cst_20 = arith.constant dense<0.000000e+00> : vector<2x16x128xf32>
    %57 = tpu.matmul %55, %56, %cst_20 {dimension_numbers = #tpu.dot_dimension_numbers<[2], [1], [1], [2], [0, 0, 0, 1, 1, 2], [0], [0]>} : vector<2x16x16xbf16>, vector<2x16x128xbf16>, vector<2x16x128xf32> -> vector<2x16x128xf32>
    "tpu.trace_stop"() : () -> ()
    %58 = vector.shape_cast %57 : vector<2x16x128xf32> to vector<32x128xf32>
    %59 = arith.truncf %58 : vector<32x128xf32> to vector<32x128xbf16>
    %c0_21 = arith.constant 0 : index
    %c0_22 = arith.constant 0 : index
    %60 = vector.load %arg6[%c0_21, %c0_22] : memref<256x256xbf16, #tpu.memory_space<vmem>>, vector<128x256xbf16>
    %cst_23 = arith.constant dense<0.000000e+00> : vector<32x256xf32>
    %61 = tpu.matmul %59, %60, %cst_23 {dimension_numbers = #tpu.dot_dimension_numbers<[1], [0], [0], [1], [0, 0, 1, 1], [], []>} : vector<32x128xbf16>, vector<128x256xbf16>, vector<32x256xf32> -> vector<32x256xf32>
    %62 = arith.addf %33, %61 : vector<32x256xf32>
    %63 = vector.extract_strided_slice %30 {offsets = [0, 128], sizes = [32, 128], strides = [1, 1]} : vector<32x768xf32> to vector<32x128xf32>
    %64 = vector.shape_cast %63 : vector<32x128xf32> to vector<2x16x128xf32>
    %65 = vector.extract_strided_slice %30 {offsets = [0, 384], sizes = [32, 128], strides = [1, 1]} : vector<32x768xf32> to vector<32x128xf32>
    %66 = vector.shape_cast %65 : vector<32x128xf32> to vector<2x16x128xf32>
    %67 = vector.extract_strided_slice %30 {offsets = [0, 640], sizes = [32, 128], strides = [1, 1]} : vector<32x768xf32> to vector<32x128xf32>
    %68 = vector.shape_cast %67 : vector<32x128xf32> to vector<2x16x128xf32>
    %69 = arith.truncf %64 : vector<2x16x128xf32> to vector<2x16x128xbf16>
    %70 = arith.truncf %66 : vector<2x16x128xf32> to vector<2x16x128xbf16>
    "tpu.trace_start"() <{level = 10 : i32, message = "bqd,bkd->bqk"}> : () -> ()
    %cst_24 = arith.constant dense<0.000000e+00> : vector<2x16x16xf32>
    %71 = tpu.matmul %69, %70, %cst_24 {dimension_numbers = #tpu.dot_dimension_numbers<[2], [2], [1], [1], [0, 0, 0, 1, 1, 1], [0], [0]>} : vector<2x16x128xbf16>, vector<2x16x128xbf16>, vector<2x16x16xf32> -> vector<2x16x16xf32>
    "tpu.trace_stop"() : () -> ()
    %cst_25 = arith.constant 0.0883883461 : f32
    %72 = vector.broadcast %cst_25 : f32 to vector<2x16x16xf32>
    %73 = arith.mulf %71, %72 : vector<2x16x16xf32>
    %cst_26 = arith.constant dense<0xFF800000> : vector<2x16xf32>
    %74 = vector.multi_reduction <maximumf>, %73, %cst_26 [2] : vector<2x16x16xf32> to vector<2x16xf32>
    %75 = vector.shape_cast %74 : vector<2x16xf32> to vector<2x16x1xf32>
    %76 = vector.broadcast %75 : vector<2x16x1xf32> to vector<2x16x16xf32>
    %77 = arith.subf %73, %76 : vector<2x16x16xf32>
    %78 = math.exp %77 : vector<2x16x16xf32>
    %cst_27 = arith.constant dense<0.000000e+00> : vector<2x16xf32>
    %79 = vector.multi_reduction <add>, %78, %cst_27 [2] : vector<2x16x16xf32> to vector<2x16xf32>
    %80 = vector.shape_cast %79 : vector<2x16xf32> to vector<2x16x1xf32>
    %81 = tpu.reciprocal %80 {approx = true} : vector<2x16x1xf32> -> vector<2x16x1xf32>
    %82 = vector.broadcast %81 : vector<2x16x1xf32> to vector<2x16x16xf32>
    %83 = arith.mulf %78, %82 : vector<2x16x16xf32>
    %84 = arith.truncf %83 : vector<2x16x16xf32> to vector<2x16x16xbf16>
    %85 = arith.truncf %68 : vector<2x16x128xf32> to vector<2x16x128xbf16>
    "tpu.trace_start"() <{level = 10 : i32, message = "bqk,bkd->bqd"}> : () -> ()
    %cst_28 = arith.constant dense<0.000000e+00> : vector<2x16x128xf32>
    %86 = tpu.matmul %84, %85, %cst_28 {dimension_numbers = #tpu.dot_dimension_numbers<[2], [1], [1], [2], [0, 0, 0, 1, 1, 2], [0], [0]>} : vector<2x16x16xbf16>, vector<2x16x128xbf16>, vector<2x16x128xf32> -> vector<2x16x128xf32>
    "tpu.trace_stop"() : () -> ()
    %87 = vector.shape_cast %86 : vector<2x16x128xf32> to vector<32x128xf32>
    %88 = arith.truncf %87 : vector<32x128xf32> to vector<32x128xbf16>
    %c128 = arith.constant 128 : index
    %c0_29 = arith.constant 0 : index
    %89 = vector.load %arg6[%c128, %c0_29] : memref<256x256xbf16, #tpu.memory_space<vmem>>, vector<128x256xbf16>
    %cst_30 = arith.constant dense<0.000000e+00> : vector<32x256xf32>
    %90 = tpu.matmul %88, %89, %cst_30 {dimension_numbers = #tpu.dot_dimension_numbers<[1], [0], [0], [1], [0, 0, 1, 1], [], []>} : vector<32x128xbf16>, vector<128x256xbf16>, vector<32x256xf32> -> vector<32x256xf32>
    %91 = arith.addf %62, %90 : vector<32x256xf32>
    %c0_31 = arith.constant 0 : index
    %c0_32 = arith.constant 0 : index
    %92 = vector.load %arg8[%c0_31, %c0_32] : memref<1x256xf32, #tpu.memory_space<vmem>>, vector<1x256xf32>
    %c0_33 = arith.constant 0 : index
    %c0_34 = arith.constant 0 : index
    %93 = vector.load %arg9[%c0_33, %c0_34] : memref<1x256xf32, #tpu.memory_space<vmem>>, vector<1x256xf32>
    %cst_35 = arith.constant dense<0.000000e+00> : vector<32xf32>
    %94 = vector.multi_reduction <add>, %91, %cst_35 [1] : vector<32x256xf32> to vector<32xf32>
    %95 = vector.shape_cast %94 : vector<32xf32> to vector<32x1xf32>
    %cst_36 = arith.constant 2.560000e+02 : f32
    %96 = vector.broadcast %cst_36 : f32 to vector<32x1xf32>
    %97 = arith.divf %95, %96 : vector<32x1xf32>
    %98 = vector.broadcast %97 : vector<32x1xf32> to vector<32x256xf32>
    %99 = arith.subf %91, %98 : vector<32x256xf32>
    %100 = arith.mulf %99, %99 : vector<32x256xf32>
    %cst_37 = arith.constant dense<0.000000e+00> : vector<32xf32>
    %101 = vector.multi_reduction <add>, %100, %cst_37 [1] : vector<32x256xf32> to vector<32xf32>
    %102 = vector.shape_cast %101 : vector<32xf32> to vector<32x1xf32>
    %cst_38 = arith.constant 2.560000e+02 : f32
    %103 = vector.broadcast %cst_38 : f32 to vector<32x1xf32>
    %104 = arith.divf %102, %103 : vector<32x1xf32>
    %105 = vector.broadcast %97 : vector<32x1xf32> to vector<32x256xf32>
    %106 = arith.subf %91, %105 : vector<32x256xf32>
    %cst_39 = arith.constant 9.99999974E-6 : f32
    %107 = vector.broadcast %cst_39 : f32 to vector<32x1xf32>
    %108 = arith.addf %104, %107 : vector<32x1xf32>
    %109 = math.rsqrt %108 : vector<32x1xf32>
    %110 = vector.broadcast %109 : vector<32x1xf32> to vector<32x256xf32>
    %111 = arith.mulf %106, %110 : vector<32x256xf32>
    %112 = vector.broadcast %92 : vector<1x256xf32> to vector<32x256xf32>
    %113 = arith.mulf %111, %112 : vector<32x256xf32>
    %114 = vector.broadcast %93 : vector<1x256xf32> to vector<32x256xf32>
    %115 = arith.addf %113, %114 : vector<32x256xf32>
    %116 = arith.truncf %115 : vector<32x256xf32> to vector<32x256xbf16>
    %c0_40 = arith.constant 0 : index
    %c0_41 = arith.constant 0 : index
    %117 = vector.load %arg13[%c0_40, %c0_41] : memref<1x256xf32, #tpu.memory_space<vmem>>, vector<1x256xf32>
    %118 = vector.broadcast %117 : vector<1x256xf32> to vector<32x256xf32>
    %119 = arith.addf %91, %118 : vector<32x256xf32>
    %c0_42 = arith.constant 0 : index
    %c0_43 = arith.constant 0 : index
    %120 = vector.load %arg10[%c0_42, %c0_43] : memref<256x1024xbf16, #tpu.memory_space<vmem>>, vector<256x512xbf16>
    %cst_44 = arith.constant dense<0.000000e+00> : vector<32x512xf32>
    %121 = tpu.matmul %116, %120, %cst_44 {dimension_numbers = #tpu.dot_dimension_numbers<[1], [0], [0], [1], [0, 0, 1, 1], [], []>} : vector<32x256xbf16>, vector<256x512xbf16>, vector<32x512xf32> -> vector<32x512xf32>
    %c0_45 = arith.constant 0 : index
    %c0_46 = arith.constant 0 : index
    %122 = vector.load %arg11[%c0_45, %c0_46] : memref<1x1024xf32, #tpu.memory_space<vmem>>, vector<1x512xf32>
    %123 = vector.broadcast %122 : vector<1x512xf32> to vector<32x512xf32>
    %124 = arith.addf %121, %123 : vector<32x512xf32>
    %cst_47 = arith.constant 1.702000e+00 : f32
    %125 = vector.broadcast %cst_47 : f32 to vector<32x512xf32>
    %126 = arith.mulf %125, %124 : vector<32x512xf32>
    %127 = arith.negf %126 : vector<32x512xf32>
    %128 = math.exp %127 : vector<32x512xf32>
    %cst_48 = arith.constant 1.000000e+00 : f32
    %129 = vector.broadcast %cst_48 : f32 to vector<32x512xf32>
    %130 = arith.addf %129, %128 : vector<32x512xf32>
    %131 = arith.divf %129, %130 : vector<32x512xf32>
    %132 = arith.mulf %124, %131 : vector<32x512xf32>
    %133 = arith.truncf %132 : vector<32x512xf32> to vector<32x512xbf16>
    %c0_49 = arith.constant 0 : index
    %c0_50 = arith.constant 0 : index
    %134 = vector.load %arg12[%c0_49, %c0_50] : memref<1024x256xbf16, #tpu.memory_space<vmem>>, vector<512x256xbf16>
    %cst_51 = arith.constant dense<0.000000e+00> : vector<32x256xf32>
    %135 = tpu.matmul %133, %134, %cst_51 {dimension_numbers = #tpu.dot_dimension_numbers<[1], [0], [0], [1], [0, 0, 1, 1], [], []>} : vector<32x512xbf16>, vector<512x256xbf16>, vector<32x256xf32> -> vector<32x256xf32>
    %136 = arith.addf %119, %135 : vector<32x256xf32>
    %c0_52 = arith.constant 0 : index
    %c512 = arith.constant 512 : index
    %137 = vector.load %arg10[%c0_52, %c512] : memref<256x1024xbf16, #tpu.memory_space<vmem>>, vector<256x512xbf16>
    %cst_53 = arith.constant dense<0.000000e+00> : vector<32x512xf32>
    %138 = tpu.matmul %116, %137, %cst_53 {dimension_numbers = #tpu.dot_dimension_numbers<[1], [0], [0], [1], [0, 0, 1, 1], [], []>} : vector<32x256xbf16>, vector<256x512xbf16>, vector<32x512xf32> -> vector<32x512xf32>
    %c0_54 = arith.constant 0 : index
    %c512_55 = arith.constant 512 : index
    %139 = vector.load %arg11[%c0_54, %c512_55] : memref<1x1024xf32, #tpu.memory_space<vmem>>, vector<1x512xf32>
    %140 = vector.broadcast %139 : vector<1x512xf32> to vector<32x512xf32>
    %141 = arith.addf %138, %140 : vector<32x512xf32>
    %cst_56 = arith.constant 1.702000e+00 : f32
    %142 = vector.broadcast %cst_56 : f32 to vector<32x512xf32>
    %143 = arith.mulf %142, %141 : vector<32x512xf32>
    %144 = arith.negf %143 : vector<32x512xf32>
    %145 = math.exp %144 : vector<32x512xf32>
    %cst_57 = arith.constant 1.000000e+00 : f32
    %146 = vector.broadcast %cst_57 : f32 to vector<32x512xf32>
    %147 = arith.addf %146, %145 : vector<32x512xf32>
    %148 = arith.divf %146, %147 : vector<32x512xf32>
    %149 = arith.mulf %141, %148 : vector<32x512xf32>
    %150 = arith.truncf %149 : vector<32x512xf32> to vector<32x512xbf16>
    %c512_58 = arith.constant 512 : index
    %c0_59 = arith.constant 0 : index
    %151 = vector.load %arg12[%c512_58, %c0_59] : memref<1024x256xbf16, #tpu.memory_space<vmem>>, vector<512x256xbf16>
    %cst_60 = arith.constant dense<0.000000e+00> : vector<32x256xf32>
    %152 = tpu.matmul %150, %151, %cst_60 {dimension_numbers = #tpu.dot_dimension_numbers<[1], [0], [0], [1], [0, 0, 1, 1], [], []>} : vector<32x512xbf16>, vector<512x256xbf16>, vector<32x256xf32> -> vector<32x256xf32>
    %153 = arith.addf %136, %152 : vector<32x256xf32>
    %c0_61 = arith.constant 0 : index
    %c0_62 = arith.constant 0 : index
    %154 = vector.load %arg14[%c0_61, %c0_62] : memref<32x256xf32, #tpu.memory_space<vmem>>, vector<32x256xf32>
    tpu.vector_store %arg14[%c0_61, %c0_62], %153 {strides = array<i32>} : memref<32x256xf32, #tpu.memory_space<vmem>>, vector<32x256xf32>,
    return
  }
  func.func @transform_0(%arg0: i32) -> (i32, i32) {
    %c0_i32 = arith.constant 0 : i32
    %c0_i32_0 = arith.constant 0 : i32
    return %arg0, %c0_i32 : i32, i32
  }
  func.func @transform_1(%arg0: i32) -> (i32, i32) {
    %c0_i32 = arith.constant 0 : i32
    %c0_i32_0 = arith.constant 0 : i32
    %c0_i32_1 = arith.constant 0 : i32
    return %c0_i32, %c0_i32_0 : i32, i32
  }
  func.func @transform_2(%arg0: i32) -> (i32, i32) {
    %c0_i32 = arith.constant 0 : i32
    %c0_i32_0 = arith.constant 0 : i32
    %c0_i32_1 = arith.constant 0 : i32
    return %c0_i32, %c0_i32_0 : i32, i32
  }
  func.func @transform_3(%arg0: i32) -> (i32, i32) {
    %c0_i32 = arith.constant 0 : i32
    %c0_i32_0 = arith.constant 0 : i32
    %c0_i32_1 = arith.constant 0 : i32
    return %c0_i32, %c0_i32_0 : i32, i32
  }
  func.func @transform_4(%arg0: i32) -> (i32, i32) {
    %c0_i32 = arith.constant 0 : i32
    %c0_i32_0 = arith.constant 0 : i32
    %c0_i32_1 = arith.constant 0 : i32
    return %c0_i32, %c0_i32_0 : i32, i32
  }
  func.func @transform_5(%arg0: i32) -> (i32, i32) {
    %c0_i32 = arith.constant 0 : i32
    %c0_i32_0 = arith.constant 0 : i32
    %c0_i32_1 = arith.constant 0 : i32
    return %c0_i32, %c0_i32_0 : i32, i32
  }
  func.func @transform_6(%arg0: i32) -> (i32, i32) {
    %c0_i32 = arith.constant 0 : i32
    %c0_i32_0 = arith.constant 0 : i32
    %c0_i32_1 = arith.constant 0 : i32
    return %c0_i32, %c0_i32_0 : i32, i32
  }
  func.func @transform_7(%arg0: i32) -> (i32, i32) {
    %c0_i32 = arith.constant 0 : i32
    %c0_i32_0 = arith.constant 0 : i32
    %c0_i32_1 = arith.constant 0 : i32
    return %c0_i32, %c0_i32_0 : i32, i32
  }
  func.func @transform_8(%arg0: i32) -> (i32, i32) {
    %c0_i32 = arith.constant 0 : i32
    %c0_i32_0 = arith.constant 0 : i32
    %c0_i32_1 = arith.constant 0 : i32
    return %c0_i32, %c0_i32_0 : i32, i32
  }
  func.func @transform_9(%arg0: i32) -> (i32, i32) {
    %c0_i32 = arith.constant 0 : i32
    %c0_i32_0 = arith.constant 0 : i32
    %c0_i32_1 = arith.constant 0 : i32
    return %c0_i32, %c0_i32_0 : i32, i32
  }
  func.func @transform_10(%arg0: i32) -> (i32, i32) {
    %c0_i32 = arith.constant 0 : i32
    %c0_i32_0 = arith.constant 0 : i32
    %c0_i32_1 = arith.constant 0 : i32
    return %c0_i32, %c0_i32_0 : i32, i32
  }
  func.func @transform_11(%arg0: i32) -> (i32, i32) {
    %c0_i32 = arith.constant 0 : i32
    %c0_i32_0 = arith.constant 0 : i32
    %c0_i32_1 = arith.constant 0 : i32
    return %c0_i32, %c0_i32_0 : i32, i32
  }
  func.func @transform_12(%arg0: i32) -> (i32, i32) {
    %c0_i32 = arith.constant 0 : i32
    %c0_i32_0 = arith.constant 0 : i32
    %c0_i32_1 = arith.constant 0 : i32
    return %c0_i32, %c0_i32_0 : i32, i32
  }
  func.func @transform_13(%arg0: i32) -> (i32, i32) {
    %c0_i32 = arith.constant 0 : i32
    %c0_i32_0 = arith.constant 0 : i32
    return %arg0, %c0_i32 : i32, i32
  }
}

</mosaic_0001>

<bundles_post_ra>
// kernel: res_att_block.1
= control target key start
LH: loop header
LB: loop body
LE: loop exit
PB: predicated region body
PF: predicated region fallthrough
CT: control target
= control target key end

     0   :  { %s6855_s0 = inlined_call_operand.vmem [shape: f32[64,256], index: 0, kind: input, shape index: {}]   ;;  %s6856_s1 = inlined_call_operand.vmem [shape: f32[1,256], index: 1, kind: input, shape index: {}]   ;;  %s6857_s2 = inlined_call_operand.vmem [shape: f32[1,256], index: 2, kind: input, shape index: {}]   ;;  %s6858_s3 = inlined_call_operand.hbm [shape: bf16[256,768], index: 3, kind: input, shape index: {}]   ;;  %s6859_s4 = inlined_call_operand.vmem [shape: f32[1,768], index: 4, kind: input, shape index: {}]   ;;  %s6860_s5 = inlined_call_operand.vmem [shape: bf16[256,256], index: 5, kind: input, shape index: {}]   ;;  %s6861_s6 = inlined_call_operand.vmem [shape: f32[1,256], index: 6, kind: input, shape index: {}]   ;;  %s6862_s7 = inlined_call_operand.vmem [shape: f32[1,256], index: 7, kind: input, shape index: {}]   ;;  %s6863_s8 = inlined_call_operand.vmem [shape: f32[1,256], index: 8, kind: input, shape index: {}]   ;;  %s6864_s9 = inlined_call_operand.hbm [shape: bf16[256,1024], index: 9, kind: input, shape index: {}]   ;;  %s6865_s10 = inlined_call_operand.vmem [shape: f32[1,1024], index: 10, kind: input, shape index: {}]   ;;  %s6866_s11 = inlined_call_operand.hbm [shape: bf16[1024,256], index: 11, kind: input, shape index: {}]   ;;  %s6867_s12 = inlined_call_operand.vmem [shape: f32[1,256], index: 12, kind: input, shape index: {}]   ;;  %s6868_s13 = inlined_call_operand.vmem [shape: f32[64,256], index: 13, kind: output, shape index: {}]  }
   0x1   :  { %6873 = sst [smem:[#allocation9_spill]] %s6867_s12 }
   0x2   :  { %6874 = sst [smem:[#allocation10_spill]] %s6868_s13 }
   0x3   :  { %18 = vsyncpa [#allocation3], 0 }
   0x4   :  { %19 = vsyncpa [#allocation5], 0  ;;  %s6037_s25 = smov 0  }
   0x5 LB: > { %s5955_s26 = smov [#allocation4]   ;;  %s6869_s28 = sadd.s32 4294967295, %s5953_s25   ;;  %s5953_s25 = sphi %s6037_s25, %s25_s25  }
   0x6   : > { %s380_s27 = sshll.u32 %s5955_s26, 4  ;;  %p4688_p0 = scmp.ge.s32.totalorder %s5953_s25, 1  ;;  %s6051_s27 = int_to_ptr.vmem [resolvable:$true] %s380_s27 }
   0x7   : > { %p334_p1 = scmp.lt.s32.totalorder %s5953_s25, 3  ;;  %p6047_p2 = scmp.eq.s32.totalorder %s6869_s28, 0 }
   0x8   : > { %s5956_s14 = smov [#allocation2]   ;;  %s5957_s17 = smov [#allocation6]  }
   0x9   : > { %s6875_s29 = scalar_select %p6047_p2, 1, 0 }
   0xa   : > { %p6053_p3 = pnand %p4688_p0, %p334_p1  ;;  %s352_s15 = sshll.u32 %s5956_s14, 4  ;;  %s6059_s15 = int_to_ptr.vmem [resolvable:$true] %s352_s15 }
   0xb   : > { %s6067_s18 = sshll.u32 %s5957_s17, 4  ;;  %s5855_s21 = scalar_lea.hbm %s6864_s9, 16384  ;;  %s397_s18 = int_to_ptr.vmem [resolvable:$true] %s6067_s18 }
   0xc   : > { %s6876_s30 = scalar_select %p6053_p3, 1, 0 }
   0xd   : > { %p5251_p4 = pneg %p6053_p3  ;;  %p5856_p6 = scmp.ne.s32.totalorder %s6864_s9, %s5855_s21 }
   0xe   : > { %p5862_p10 = scmp.lt.u32.totalorder %s5855_s21, %s6864_s9 }
   0xf   : > { %p6063_p5 = pnand %p6047_p2, %p5251_p4 }
  0x11   : > { %p6077_p7 = pneg %p6063_p5 }
  0x13   : > { %p5858_p8 = pnand %p6077_p7, %p5856_p6 }
  0x15   : > { %p5859_p9 = pneg %p5858_p8 }
  0x17   : > { %p5864_p11 = pnand %p5862_p10, %p5859_p9 }
  0x19   : > { %5867 = shalt.err (!%p5864_p11)
}
  0x1a   : > { %s5868_s17 = scalar_lea.vmem %s6051_s27, 16384  ;;  %p5876_p1 = scmp.lt.s32.totalorder %s6051_s27, %s6051_s27 }
  0x1b   : > { %p5869_p12 = scmp.ne.s32.totalorder %s6051_s27, %s5868_s17  ;;  %p5877_p4 = scmp.lt.s32.totalorder %s5868_s17, %s5868_s17 }
  0x1d   : > { %p5871_p13 = pnand %p5869_p12, %p6077_p7  ;;  %p5878_p6 = por %p5877_p4, %p5876_p1 }
  0x1f   : > { %p5872_p0 = pneg %p5871_p13 }
  0x21   : > { %p5879_p8 = pnand %p5878_p6, %p5872_p0 }
  0x23   : > { %5882 = shalt.err (!%p5879_p8)
}
  0x24   : > { %s5958_s19 = smov 512   ;;  %s5959_s20 = smov 32  }
  0x25   : > { %5257 = dma.hbm_to_vmem [thread:$0]  (!%p6063_p5), %s6864_s9, 16384, %s6051_s27, [#allocation5], %s5958_s19, %s5958_s19, %s5959_s20  }
  0x26   : > { %s5883_s14 = scalar_lea.hbm %s6858_s3, 12288 }
  0x27   : > { %p5884_p9 = scmp.ne.s32.totalorder %s6858_s3, %s5883_s14  ;;  %p5890_p12 = scmp.lt.u32.totalorder %s5883_s14, %s6858_s3 }
  0x29   : > { %p5886_p10 = pnand %p5884_p9, %p6077_p7 }
  0x2b   : > { %p5887_p11 = pneg %p5886_p10 }
  0x2d   : > { %p5892_p13 = pnand %p5890_p12, %p5887_p11 }
  0x2f   : > { %5895 = shalt.err (!%p5892_p13)
}
  0x30   : > { %s5896_s27 = scalar_lea.vmem %s6059_s15, 12288  ;;  %p5904_p6 = scmp.lt.s32.totalorder %s6059_s15, %s6059_s15 }
  0x31   : > { %p5897_p0 = scmp.ne.s32.totalorder %s6059_s15, %s5896_s27  ;;  %p5905_p8 = scmp.lt.s32.totalorder %s5896_s27, %s5896_s27 }
  0x33   : > { %p5899_p1 = pnand %p5897_p0, %p6077_p7  ;;  %p5906_p9 = por %p5905_p8, %p5904_p6 }
  0x35   : > { %p5900_p4 = pneg %p5899_p1 }
  0x37   : > { %p5907_p10 = pnand %p5906_p9, %p5900_p4 }
  0x39   : > { %5910 = shalt.err (!%p5907_p10)
}
  0x3a   : > { %s5960_s13 = smov 384   ;;  %s5961_s12 = smov 24  }
  0x3b   : > { %5254 = dma.hbm_to_vmem [thread:$0]  (!%p6063_p5), %s6858_s3, 12288, %s6059_s15, [#allocation3], %s5960_s13, %s5960_s13, %s5961_s12  }
  0x3c   : > { %s5911_s22 = scalar_lea.hbm %s6866_s11, 16384 }
  0x3d   : > { %p5912_p11 = scmp.ne.s32.totalorder %s6866_s11, %s5911_s22  ;;  %p5918_p0 = scmp.lt.u32.totalorder %s5911_s22, %s6866_s11 }
  0x3f   : > { %p5914_p12 = pnand %p5912_p11, %p6077_p7 }
  0x41   : > { %p5915_p13 = pneg %p5914_p12 }
  0x43   : > { %p5920_p1 = pnand %p5918_p0, %p5915_p13 }
  0x45   : > { %5923 = shalt.err (!%p5920_p1)
}
  0x46   : > { %s5924_s27 = scalar_lea.vmem %s397_s18, 16384  ;;  %p5932_p9 = scmp.lt.s32.totalorder %s397_s18, %s397_s18 }
  0x47   : > { %p5925_p4 = scmp.ne.s32.totalorder %s397_s18, %s5924_s27  ;;  %p5933_p10 = scmp.lt.s32.totalorder %s5924_s27, %s5924_s27 }
  0x49   : > { %p5927_p6 = pnand %p5925_p4, %p6077_p7  ;;  %p5934_p2 = por %p5933_p10, %p5932_p9 }
  0x4b   : > { %p5928_p8 = pneg %p5927_p6 }
  0x4d   : > { %p5935_p3 = pnand %p5934_p2, %p5928_p8 }
  0x4f   : > { %5938 = shalt.err (!%p5935_p3)
}
  0x50   : > { %s5962_s15 = smov 128   ;;  %s5963_s13 = smov 8  }
  0x51   : > { %5260 = dma.hbm_to_vmem [thread:$0]  (!%p6063_p5), %s6866_s11, 16384, %s397_s18, [#allocation5], %s5962_s15, %s5962_s15, %s5963_s13  }
  0x52   : > { %p6879_p11 = scmp.ne.s32.totalorder %s6876_s30, 0 }
  0x53   : > { %p6880_p12 = scmp.ne.s32.totalorder (!%p6879_p11), %s6875_s29, 0 }
  0x54   : > { %425 = sbr.rel (%p6879_p11) target bundleno = 2699 (0xa8b), region = 72 }
  0x5b   : > { %5944 = dma.done.wait (%p6880_p12), [#allocation3], 12288  }
  0x5c   : > { %5946 = vsyncadd (%p6880_p12), [#allocation3], 4294955008 }
  0x5d   : > { %5948 = dma.done.wait (%p6880_p12), [#allocation5], 32768  }
  0x5e   : > { %5950 = vsyncadd (%p6880_p12), [#allocation5], 4294934528  ;;  %s6881_s16 = sadd.s32 4294967295, %s5953_s25   ;;  %v5287_v12 = vld [vmem:[#allocation2 + $0x4] ss:$24 sps:$4 sm:$0xff]   ;;  %vm5965_vm0 = vmmov 0  }
  0x5f   : > { %s4697_s24 = sshll.u32 %s6881_s16, 2  ;;  %v5289_v13 = vld [vmem:[#allocation2] ss:$24 sps:$4 sm:$0xff]   ;;  %v5290_v14 = vld [vmem:[#allocation2 + $0x14] ss:$24 sps:$4 sm:$0xff]   ;;  %1219 = vmatprep.subr.bf16.mxu1 %v5287_v12  ;;  %vm1488_vm1 = vcmask 130048  }
  0x60   : > { %p480_p2 = scmp.lt.s32.totalorder %s4697_s24, 7  ;;  %v5292_v15 = vld [vmem:[#allocation2 + $0x10] ss:$24 sps:$4 sm:$0xff]   ;;  %v5293_v16 = vld [vmem:[#allocation2 + $0x34] ss:$24 sps:$4 sm:$0xff]   ;;  %1325 = vmatprep.subr.bf16.mxu0 %v5290_v14  ;;  %1220 = vmatpush1.bf16.msra.mxu1 %v5289_v13  ;;  %s6882_s17 = sld [smem:[#allocation9_spill]] }
  0x61   : > { %v5296_v17 = vld [vmem:[#allocation2 + $0x44] ss:$24 sps:$4 sm:$0xff]   ;;  %1326 = vmatpush1.bf16.msra.mxu0 %v5292_v15  ;;  %v5295_v18 = vld [vmem:[#allocation2 + $0x30] ss:$24 sps:$4 sm:$0xff]   ;;  %v5298_v19 = vld [vmem:[#allocation2 + $0x40] ss:$24 sps:$4 sm:$0xff]   ;;  %1221 = vmatprep.subr.bf16.mxu1 %v5293_v16 }
  0x62   : > { %s6885_s24 = smov (!%p480_p2, %s4697_s24), 7  ;;  %1327 = vmatprep.subr.bf16.mxu0 %v5296_v17  ;;  %v5299_v20 = vld [vmem:[#allocation2 + $0x64] ss:$24 sps:$4 sm:$0xff]   ;;  %v5302_v21 = vld [vmem:[#allocation2 + $0x74] ss:$24 sps:$4 sm:$0xff]   ;;  %s6883_s13 = sld [smem:[#allocation10_spill]] }
  0x63   : > { %s5125_s30 = sshll.u32 %s6885_s24, 4  ;;  %v5301_v22 = vld [vmem:[#allocation2 + $0x60] ss:$24 sps:$4 sm:$0xff]   ;;  %v5304_v23 = vld [vmem:[#allocation2 + $0x70] ss:$24 sps:$4 sm:$0xff]  }
  0x64   : > { %s6160_s20 = scalar_lea.vmem %s6855_s0, %s5125_s30  ;;  %1222 = vmatpush1.bf16.msra.mxu1 %v5295_v18  ;;  %v5305_v24 = vld [vmem:[#allocation2 + $0x94] ss:$24 sps:$4 sm:$0xff]   ;;  %v5308_v25 = vld [vmem:[#allocation2 + $0xa4] ss:$24 sps:$4 sm:$0xff]   ;;  %v5307_v26 = vld [vmem:[#allocation2 + $0x90] ss:$24 sps:$4 sm:$0xff]  }
  0x65   : > { %v6163_v0 = vld [vmem:[%s6160_s20] sm:$0xff]  ;;  %v6166_v1 = vld [vmem:[%s6160_s20 + $0x8] sm:$0xff]  ;;  %v6177_v5 = vld [vmem:[%s6160_s20 + $0x10] sm:$0xff]  ;;  %1328 = vmatpush1.bf16.msra.mxu0 %v5298_v19  ;;  %1223 = vmatprep.subr.bf16.mxu1 %v5299_v20 }
  0x66   : > { %v6169_v2 = vld [vmem:[%s6160_s20 + $0x20] sm:$0xff]  ;;  %v504_v3 = vadd.f32 %v6166_v1, %v6163_v0  ;;  %v6174_v4 = vld [vmem:[%s6160_s20 + $0x28] sm:$0xff]  ;;  %v6180_v6 = vld [vmem:[%s6160_s20 + $0x18] sm:$0xff]  ;;  %1329 = vmatprep.subr.bf16.mxu0 %v5302_v21 }
  0x67   : > { %v510_v7 = vadd.f32 %v6174_v4, %v6169_v2  ;;  %v6185_v8 = vld [vmem:[%s6160_s20 + $0x30] sm:$0xff]  ;;  %v6188_v9 = vld [vmem:[%s6160_s20 + $0x38] sm:$0xff]  ;;  %v507_v10 = vadd.f32 %v6180_v6, %v6177_v5 }
  0x68   : > { %505 = vadd.xlane.f32.xlu0 %v504_v3  ;;  %v513_v11 = vadd.f32 %v6188_v9, %v6185_v8  ;;  %1224 = vmatpush1.bf16.msra.mxu1 %v5301_v22  ;;  %v5310_v27 = vld [vmem:[#allocation2 + $0xa0] ss:$24 sps:$4 sm:$0xff]   ;;  %v5311_v28 = vld [vmem:[#allocation2 + $0xc4] ss:$24 sps:$4 sm:$0xff]   ;;  %v5314_v29 = vld [vmem:[#allocation2 + $0xd4] ss:$24 sps:$4 sm:$0xff]   ;;  %s6835_s12 = scalar_lea.vmem %s6883_s13, %s5125_s30 }
  0x69   : > { %511 = vadd.xlane.f32.xlu1 %v510_v7  ;;  %1330 = vmatpush1.bf16.msra.mxu0 %v5304_v23  ;;  %v5313_v30 = vld [vmem:[#allocation2 + $0xc0] ss:$24 sps:$4 sm:$0xff]   ;;  %v5316_v31 = vld [vmem:[#allocation2 + $0xd0] ss:$24 sps:$4 sm:$0xff]   ;;  %v5317_v32 = vld [vmem:[#allocation2 + $0xf4] ss:$24 sps:$4 sm:$0xff]  }
  0x6a   : > { %1225 = vmatprep.subr.bf16.mxu1 %v5305_v24  ;;  %1331 = vmatprep.subr.bf16.mxu0 %v5308_v25  ;;  %v5320_v33 = vld [vmem:[#allocation2 + $0x104] ss:$24 sps:$4 sm:$0xff]   ;;  %v5319_v34 = vld [vmem:[#allocation2 + $0xf0] ss:$24 sps:$4 sm:$0xff]   ;;  %v5322_v35 = vld [vmem:[#allocation2 + $0x100] ss:$24 sps:$4 sm:$0xff]  }
  0x6b   : > { %v5323_v36 = vld [vmem:[#allocation2 + $0x124] ss:$24 sps:$4 sm:$0xff]   ;;  %v5326_v37 = vld [vmem:[#allocation2 + $0x134] ss:$24 sps:$4 sm:$0xff]   ;;  %v5325_v38 = vld [vmem:[#allocation2 + $0x120] ss:$24 sps:$4 sm:$0xff]  }
  0x6c   : > { %508 = vadd.xlane.f32.xlu0 %v507_v10  ;;  %1226 = vmatpush1.bf16.msra.mxu1 %v5307_v26  ;;  %v5328_v39 = vld [vmem:[#allocation2 + $0x130] ss:$24 sps:$4 sm:$0xff]   ;;  %v5329_v40 = vld [vmem:[#allocation2 + $0x154] ss:$24 sps:$4 sm:$0xff]   ;;  %v5332_v41 = vld [vmem:[#allocation2 + $0x164] ss:$24 sps:$4 sm:$0xff]  }
  0x6d   : > { %514 = vadd.xlane.f32.xlu1 %v513_v11  ;;  %1332 = vmatpush1.bf16.msra.mxu0 %v5310_v27  ;;  %v5331_v42 = vld [vmem:[#allocation2 + $0x150] ss:$24 sps:$4 sm:$0xff]   ;;  %v5334_v43 = vld [vmem:[#allocation2 + $0x160] ss:$24 sps:$4 sm:$0xff]   ;;  %v5335_v44 = vld [vmem:[#allocation2 + $0x184] ss:$24 sps:$4 sm:$0xff]  }
  0x6e   : > { %1227 = vmatprep.subr.bf16.mxu1 %v5311_v28  ;;  %1333 = vmatprep.subr.bf16.mxu0 %v5314_v29  ;;  %v5338_v45 = vld [vmem:[#allocation2 + $0x194] ss:$24 sps:$4 sm:$0xff]   ;;  %v5337_v46 = vld [vmem:[#allocation2 + $0x180] ss:$24 sps:$4 sm:$0xff]   ;;  %v5340_v47 = vld [vmem:[#allocation2 + $0x190] ss:$24 sps:$4 sm:$0xff]  }
  0x6f   : > { %v5341_v48 = vld [vmem:[#allocation2 + $0x1b4] ss:$24 sps:$4 sm:$0xff]   ;;  %v5344_v14 = vld [vmem:[#allocation2 + $0x1c4] ss:$24 sps:$4 sm:$0xff]   ;;  %v5346_v15 = vld [vmem:[#allocation2 + $0x1c0] ss:$24 sps:$4 sm:$0xff]  }
  0x70   : > { %1228 = vmatpush1.bf16.msra.mxu1 %v5313_v30  ;;  %v5347_v16 = vld [vmem:[#allocation2 + $0x1e4] ss:$24 sps:$4 sm:$0xff]   ;;  %v5349_v17 = vld [vmem:[#allocation2 + $0x1e0] ss:$24 sps:$4 sm:$0xff]   ;;  %v5350_v18 = vld [vmem:[#allocation2 + $0x1f4] ss:$24 sps:$4 sm:$0xff]  }
  0x71   : > { %1334 = vmatpush1.bf16.msra.mxu0 %v5316_v31  ;;  %1229 = vmatprep.subr.bf16.mxu1 %v5317_v32  ;;  %v5352_v19 = vld [vmem:[#allocation2 + $0x1f0] ss:$24 sps:$4 sm:$0xff]   ;;  %v5353_v20 = vld [vmem:[#allocation2 + $0x214] ss:$24 sps:$4 sm:$0xff]   ;;  %v5356_v22 = vld [vmem:[#allocation2 + $0x224] ss:$24 sps:$4 sm:$0xff]  }
  0x72   : > { %1335 = vmatprep.subr.bf16.mxu0 %v5320_v33  ;;  %v5355_v21 = vld [vmem:[#allocation2 + $0x210] ss:$24 sps:$4 sm:$0xff]   ;;  %v5358_v23 = vld [vmem:[#allocation2 + $0x220] ss:$24 sps:$4 sm:$0xff]   ;;  %v5359_v24 = vld [vmem:[#allocation2 + $0x244] ss:$24 sps:$4 sm:$0xff]  }
  0x73   : > { %v5361_v25 = vld [vmem:[#allocation2 + $0x240] ss:$24 sps:$4 sm:$0xff]   ;;  %v5362_v26 = vld [vmem:[#allocation2 + $0x254] ss:$24 sps:$4 sm:$0xff]   ;;  %v5364_v27 = vld [vmem:[#allocation2 + $0x250] ss:$24 sps:$4 sm:$0xff]  }
  0x74   : > { %1230 = vmatpush1.bf16.msra.mxu1 %v5319_v34  ;;  %v5365_v28 = vld [vmem:[#allocation2 + $0x274] ss:$24 sps:$4 sm:$0xff]   ;;  %v5367_v29 = vld [vmem:[#allocation2 + $0x270] ss:$24 sps:$4 sm:$0xff]   ;;  %v5368_v30 = vld [vmem:[#allocation2 + $0x284] ss:$24 sps:$4 sm:$0xff]  }
  0x75   : > { %1336 = vmatpush1.bf16.msra.mxu0 %v5322_v35  ;;  %1231 = vmatprep.subr.bf16.mxu1 %v5323_v36  ;;  %v5370_v31 = vld [vmem:[#allocation2 + $0x280] ss:$24 sps:$4 sm:$0xff]   ;;  %v5371_v32 = vld [vmem:[#allocation2 + $0x2a4] ss:$24 sps:$4 sm:$0xff]   ;;  %v5374_v33 = vld [vmem:[#allocation2 + $0x2b4] ss:$24 sps:$4 sm:$0xff]  }
  0x76   : > { %1337 = vmatprep.subr.bf16.mxu0 %v5326_v37  ;;  %v5373_v34 = vld [vmem:[#allocation2 + $0x2a0] ss:$24 sps:$4 sm:$0xff]   ;;  %v5376_v35 = vld [vmem:[#allocation2 + $0x2b0] ss:$24 sps:$4 sm:$0xff]   ;;  %v5377_v36 = vld [vmem:[#allocation2 + $0x2d4] ss:$24 sps:$4 sm:$0xff]  }
  0x77   : > { %v5380_v37 = vld [vmem:[#allocation2 + $0x2e4] ss:$24 sps:$4 sm:$0xff]  }
  0x78   : > { %1232 = vmatpush1.bf16.msra.mxu1 %v5325_v38  ;;  %v5379_v38 = vld [vmem:[#allocation2 + $0x2d0] ss:$24 sps:$4 sm:$0xff]  }
  0x79   : > { %1338 = vmatpush1.bf16.msra.mxu0 %v5328_v39  ;;  %1233 = vmatprep.subr.bf16.mxu1 %v5329_v40  ;;  %v5382_v39 = vld [vmem:[#allocation2 + $0x2e0] ss:$24 sps:$4 sm:$0xff]   ;;  %v5385_v40 = vld [vmem:[#allocation2 + $0xc] ss:$24 sps:$4 sm:$0xff]  }
  0x7a   : > { %1339 = vmatprep.subr.bf16.mxu0 %v5332_v41 }
  0x7c   : > { %1234 = vmatpush1.bf16.msra.mxu1 %v5331_v42 }
  0x7d   : > { %1340 = vmatpush1.bf16.msra.mxu0 %v5334_v43  ;;  %1235 = vmatprep.subr.bf16.mxu1 %v5335_v44  ;;  %v570_v44 = vlaneseq }
  0x7e   : > { %1341 = vmatprep.subr.bf16.mxu0 %v5338_v45 }
  0x80   : > { %1236 = vmatpush1.bf16.msra.mxu1 %v5337_v46 }
  0x81   : > { %1342 = vmatpush1.bf16.msra.mxu0 %v5340_v47  ;;  %1237 = vmatprep.subr.bf16.mxu1 %v5341_v48 }
  0x82   : > { %1343 = vmatprep.subr.bf16.mxu0 %v5344_v14 }
  0x85   : > { %1344 = vmatpush1.bf16.msra.mxu0 %v5346_v15 }
  0x86   : > { %1345 = vmatprep.subr.bf16.mxu0 %v5350_v18 }
  0x89   : > { %1346 = vmatpush1.bf16.msra.mxu0 %v5352_v19 }
  0x8a   : > { %1347 = vmatprep.subr.bf16.mxu0 %v5356_v22 }
  0x8d   : > { %1348 = vmatpush1.bf16.msra.mxu0 %v5358_v23 }
  0x8e   : > { %1349 = vmatprep.subr.bf16.mxu0 %v5362_v26 }
  0x91   : > { %1350 = vmatpush1.bf16.msra.mxu0 %v5364_v27 }
  0x92   : > { %1351 = vmatprep.subr.bf16.mxu0 %v5368_v30 }
  0x95   : > { %1352 = vmatpush1.bf16.msra.mxu0 %v5370_v31  ;;  %v5391_v31 = vld [vmem:[#allocation2 + $0x6c] ss:$24 sps:$4 sm:$0xff]  }
  0x96   : > { %1353 = vmatprep.subr.bf16.mxu0 %v5374_v33 }
  0x99   : > { %1354 = vmatpush1.bf16.msra.mxu0 %v5376_v35 }
  0x9a   : > { %1355 = vmatprep.subr.bf16.mxu0 %v5380_v37  ;;  %v5392_v37 = vld [vmem:[#allocation2 + $0x98] ss:$24 sps:$4 sm:$0xff]  }
  0x9d   : > { %1356 = vmatpush1.bf16.msra.mxu0 %v5382_v39  ;;  %v5395_v39 = vld [vmem:[#allocation2 + $0xc8] ss:$24 sps:$4 sm:$0xff]  }
  0xf5   : > { %v506_v49 = vpop.xlane.xlu0 %505 }
  0xf6   : > { %v517_v50 = vmul.f32 0.00390625, %v506_v49  ;;  %v512_v51 = vpop.xlane.xlu1 %511 }
  0xf7   : > { %v519_v52 = vmul.f32 0.00390625, %v512_v51  ;;  %v6234_v51 = vshrl.u32 %v570_v44, 7  ;;  %v5406_v44 = vld [vmem:[#allocation2 + $0x15c] ss:$24 sps:$4 sm:$0xff]  }
  0xf8   : > { %v6195_v53 = vsub.f32 %v6163_v0, %v517_v50  ;;  %v6198_v54 = vsub.f32 %v6166_v1, %v517_v50 }
  0xf9   : > { %v6201_v55 = vsub.f32 %v6169_v2, %v519_v52  ;;  %v6204_v56 = vsub.f32 %v6174_v4, %v519_v52  ;;  %v509_v57 = vpop.xlane.xlu0 %508 }
  0xfa   : > { %v518_v58 = vmul.f32 0.00390625, %v509_v57  ;;  %v515_v59 = vpop.xlane.xlu1 %514  ;;  %v529_v60 = vmul.f32 %v6195_v53, %v6195_v53  ;;  %v530_v61 = vmul.f32 %v6198_v54, %v6198_v54 }
  0xfb   : > { %v520_v62 = vmul.f32 0.00390625, %v515_v59  ;;  %v533_v63 = vmul.f32 %v6201_v55, %v6201_v55  ;;  %v534_v0 = vmul.f32 %v6204_v56, %v6204_v56  ;;  %v6237_v59 = vsub.s32 1, %v6234_v51 }
  0xfc   : > { %v6215_v1 = vsub.f32 %v6177_v5, %v518_v58  ;;  %v6218_v2 = vsub.f32 %v6180_v6, %v518_v58  ;;  %v537_v3 = vadd.f32 %v530_v61, %v529_v60  ;;  %v6240_v60 = vsub.s32 0, %v6234_v51  ;;  %v502_v61 = vld [vmem:[%s6856_s1] sm:$0x3] }
  0xfd   : > { %v6221_v4 = vsub.f32 %v6185_v8, %v520_v62  ;;  %v6224_v7 = vsub.f32 %v6188_v9, %v520_v62  ;;  %v543_v10 = vadd.f32 %v534_v0, %v533_v63  ;;  %v5343_v9 = vld [vmem:[#allocation2 + $0x1b0] ss:$24 sps:$4 sm:$0xff]   ;;  %v577_v63 = vrot.slane %v502_v61, %v6237_v59 }
  0xfe   : > { %538 = vadd.xlane.f32.xlu0 %v537_v3  ;;  %v531_v11 = vmul.f32 %v6215_v1, %v6215_v1  ;;  %v532_v12 = vmul.f32 %v6218_v2, %v6218_v2  ;;  %1238 = vmatpush1.bf16.msra.mxu1 %v5343_v9  ;;  %v573_v0 = vrot.slane %v502_v61, %v6240_v60  ;;  %v503_v3 = vld [vmem:[%s6857_s2] sm:$0x3]  ;;  %v5421_v61 = vld [vmem:[#allocation2 + $0x24c] ss:$24 sps:$4 sm:$0xff]  }
  0xff   : > { %v535_v5 = vmul.f32 %v6221_v4, %v6221_v4  ;;  %v536_v6 = vmul.f32 %v6224_v7, %v6224_v7  ;;  %1239 = vmatprep.subr.bf16.mxu1 %v5347_v16 }
 0x100   : > { %v540_v13 = vadd.f32 %v532_v12, %v531_v11 }
 0x101   : > { %v546_v8 = vadd.f32 %v536_v6, %v535_v5  ;;  %v596_v6 = vrot.slane %v503_v3, %v6237_v59 }
 0x102   : > { %544 = vadd.xlane.f32.xlu0 %v543_v10  ;;  %541 = vadd.xlane.f32.xlu1 %v540_v13 }
 0x103   : > { %1240 = vmatpush1.bf16.msra.mxu1 %v5349_v17 }
 0x104   : > { %1241 = vmatprep.subr.bf16.mxu1 %v5353_v20 }
 0x106   : > { %547 = vadd.xlane.f32.xlu1 %v546_v8  ;;  %v592_v8 = vrot.slane %v503_v3, %v6240_v60  ;;  %v5427_v3 = vld [vmem:[#allocation2 + $0x2ac] ss:$24 sps:$4 sm:$0xff]  }
 0x107   : > { %1242 = vmatpush1.bf16.msra.mxu1 %v5355_v21 }
 0x108   : > { %1243 = vmatprep.subr.bf16.mxu1 %v5359_v24 }
 0x10b   : > { %1244 = vmatpush1.bf16.msra.mxu1 %v5361_v25 }
 0x10c   : > { %1245 = vmatprep.subr.bf16.mxu1 %v5365_v28 }
 0x10f   : > { %1246 = vmatpush1.bf16.msra.mxu1 %v5367_v29 }
 0x110   : > { %1247 = vmatprep.subr.bf16.mxu1 %v5371_v32 }
 0x113   : > { %1248 = vmatpush1.bf16.msra.mxu1 %v5373_v34  ;;  %v5389_v34 = vld [vmem:[#allocation2 + $0x68] ss:$24 sps:$4 sm:$0xff]  }
 0x114   : > { %1249 = vmatprep.subr.bf16.mxu1 %v5377_v36  ;;  %v5394_v36 = vld [vmem:[#allocation2 + $0x9c] ss:$24 sps:$4 sm:$0xff]  }
 0x117   : > { %1250 = vmatpush1.bf16.msra.mxu1 %v5379_v38  ;;  %v5397_v38 = vld [vmem:[#allocation2 + $0xcc] ss:$24 sps:$4 sm:$0xff]  }
 0x118   : > { %1272 = vmatprep.subr.bf16.mxu1 %v5385_v40  ;;  %v5400_v40 = vld [vmem:[#allocation2 + $0xfc] ss:$24 sps:$4 sm:$0xff]  }
 0x18b   : > { %v539_v41 = vpop.xlane.xlu0 %538 }
 0x18c   : > { %v549_v42 = vmul.f32 0.00390625, %v539_v41  ;;  %v5398_v41 = vld [vmem:[#allocation2 + $0xf8] ss:$24 sps:$4 sm:$0xff]  }
 0x18e   : > { %v553_v43 = vadd.f32 1e-05, %v549_v42  ;;  %v5403_v42 = vld [vmem:[#allocation2 + $0x12c] ss:$24 sps:$4 sm:$0xff]  }
 0x18f   : > { %v542_v45 = vpop.xlane.xlu1 %541  ;;  %v545_v46 = vpop.xlane.xlu0 %544 }
 0x190   : > { %5671 = vrsqrt.f32 %v553_v43  ;;  %v550_v47 = vmul.f32 0.00390625, %v542_v45  ;;  %v551_v48 = vmul.f32 0.00390625, %v545_v46  ;;  %v5401_v43 = vld [vmem:[#allocation2 + $0x128] ss:$24 sps:$4 sm:$0xff]   ;;  %v5404_v45 = vld [vmem:[#allocation2 + $0x158] ss:$24 sps:$4 sm:$0xff]  }
 0x191   : > { %v5409_v46 = vld [vmem:[#allocation2 + $0x18c] ss:$24 sps:$4 sm:$0xff]  }
 0x192   : > { %v554_v49 = vadd.f32 1e-05, %v550_v47  ;;  %v555_v50 = vadd.f32 1e-05, %v551_v48  ;;  %v5407_v47 = vld [vmem:[#allocation2 + $0x188] ss:$24 sps:$4 sm:$0xff]  }
 0x193   : > { %v548_v52 = vpop.xlane.xlu1 %547  ;;  %v5412_v48 = vld [vmem:[#allocation2 + $0x1bc] ss:$24 sps:$4 sm:$0xff]  }
 0x194   : > { %5673 = vrsqrt.f32 %v554_v49  ;;  %v552_v57 = vmul.f32 0.00390625, %v548_v52  ;;  %v5410_v49 = vld [vmem:[#allocation2 + $0x1b8] ss:$24 sps:$4 sm:$0xff]   ;;  %v5413_v52 = vld [vmem:[#allocation2 + $0x1e8] ss:$24 sps:$4 sm:$0xff]  }
 0x195   : > { %5675 = vrsqrt.f32 %v555_v50  ;;  %v5415_v50 = vld [vmem:[#allocation2 + $0x1ec] ss:$24 sps:$4 sm:$0xff]  }
 0x196   : > { %v556_v58 = vadd.f32 1e-05, %v552_v57  ;;  %v5418_v57 = vld [vmem:[#allocation2 + $0x21c] ss:$24 sps:$4 sm:$0xff]  }
 0x198   : > { %5677 = vrsqrt.f32 %v556_v58  ;;  %v5416_v58 = vld [vmem:[#allocation2 + $0x218] ss:$24 sps:$4 sm:$0xff]  }
 0x19a   : > { %v5672_v62 = vpop.eup %5671 }
 0x19b   : > { %v562_v10 = vmul.f32 %v5672_v62, %v6198_v54  ;;  %v561_v11 = vmul.f32 %v5672_v62, %v6195_v53  ;;  %v5419_v62 = vld [vmem:[#allocation2 + $0x248] ss:$24 sps:$4 sm:$0xff]  }
 0x19d   : > { %v581_v5 = vmul.f32 %v577_v63, %v562_v10  ;;  %v580_v13 = vmul.f32 %v573_v0, %v561_v11  ;;  %v5425_v10 = vld [vmem:[#allocation2 + $0x2a8] ss:$24 sps:$4 sm:$0xff]   ;;  %v5430_v11 = vld [vmem:[#allocation2 + $0x2dc] ss:$24 sps:$4 sm:$0xff]  }
 0x19e   : > { %v5674_v12 = vpop.eup %5673 }
 0x19f   : > { %v5676_v9 = vpop.eup %5675  ;;  %v564_v14 = vmul.f32 %v5674_v12, %v6218_v2  ;;  %v563_v15 = vmul.f32 %v5674_v12, %v6215_v1  ;;  %v600_v54 = vadd.f32 %v596_v6, %v581_v5  ;;  %v599_v20 = vadd.f32 %v592_v8, %v580_v13  ;;  %v5383_v2 = vld [vmem:[#allocation2 + $0x8] ss:$24 sps:$4 sm:$0xff]   ;;  %v5428_v12 = vld [vmem:[#allocation2 + $0x2d8] ss:$24 sps:$4 sm:$0xff]  }
 0x1a0   : > { %v566_v16 = vmul.f32 %v5676_v9, %v6204_v56  ;;  %v565_v25 = vmul.f32 %v5676_v9, %v6201_v55  ;;  %v5388_v56 = vld [vmem:[#allocation2 + $0x3c] ss:$24 sps:$4 sm:$0xff]   ;;  %v5386_v55 = vld [vmem:[#allocation2 + $0x38] ss:$24 sps:$4 sm:$0xff]   ;;  %v5964_v5 = vmov 0.0  }
 0x1a1   : > { %v583_v17 = vmul.f32 %v577_v63, %v564_v14  ;;  %v582_v18 = vmul.f32 %v573_v0, %v563_v15  ;;  %5167 = vmatprep.subr.bf16.mxu0 %v5964_v5  ;;  %v707_v13 = vld [vmem:[%s6859_s4] sm:$0x3f] }
 0x1a2   : > { %v5678_v19 = vpop.eup %5677  ;;  %v585_v53 = vmul.f32 %v577_v63, %v566_v16  ;;  %v712_v9 = vrot.slane %v707_v13, %v6240_v60 }
 0x1a3   : > { %v602_v21 = vadd.f32 %v596_v6, %v583_v17  ;;  %v601_v22 = vadd.f32 %v592_v8, %v582_v18  ;;  %v568_v23 = vmul.f32 %v5678_v19, %v6224_v7  ;;  %v567_v24 = vmul.f32 %v5678_v19, %v6221_v4 }
 0x1a4   : > { %v604_v29 = vadd.f32 %v596_v6, %v585_v53  ;;  %v584_v7 = vmul.f32 %v573_v0, %v565_v25  ;;  %v716_v17 = vrot.slane %v707_v13, %v6237_v59 }
 0x1a5   : > { %v608_v26 = vpack.c.bf16 %v602_v21, %v600_v54  ;;  %v6260_v27 = vpack.c.bf16 %v601_v22, %v599_v20  ;;  %v587_v1 = vmul.f32 %v577_v63, %v568_v23  ;;  %v586_v28 = vmul.f32 %v573_v0, %v567_v24  ;;  %v5424_v63 = vld [vmem:[#allocation2 + $0x27c] ss:$24 sps:$4 sm:$0xff]   ;;  %v5422_v0 = vld [vmem:[#allocation2 + $0x278] ss:$24 sps:$4 sm:$0xff]  }
 0x1a6   : > { %v603_v33 = vadd.f32 %v592_v8, %v584_v7 }
 0x1a7   : > { %1251 = vmatprep.mubr.bf16.mxu1 %v608_v26  ;;  %1357 = vmatprep.mubr.bf16.mxu0 %v608_v26  ;;  %v606_v30 = vadd.f32 %v596_v6, %v587_v1  ;;  %v605_v32 = vadd.f32 %v592_v8, %v586_v28  ;;  %v727_v6 = vsub.s32 4, %v6234_v51  ;;  %v731_v8 = vsub.s32 5, %v6234_v51 }
 0x1a8   : > { %1252 = vmatmul.mubr.bf16.vlgmr.msra.gmra.mrb[0].mxu1 %v6260_v27  ;;  %1358 = vmatmul.mubr.bf16.vlgmr.msra.gmra.mrb[0].mxu0 %v6260_v27 }
 0x1a9   : > { %1273 = vmatpush1.bf16.msra.mxu1 %v5383_v2  ;;  %v6264_v4 = vpack.c.bf16 %v606_v30, %v604_v29  ;;  %v609_v35 = vpack.c.bf16 %v605_v32, %v603_v33  ;;  %v728_v14 = vrot.slane %v707_v13, %v727_v6  ;;  %v732_v18 = vrot.slane %v707_v13, %v731_v8 }
 0x1aa   : > { %1274 = vmatprep.subr.bf16.mxu1 %v5388_v56 }
 0x1ab   : > { %1261 = vmatprep.mubr.bf16.mxu1 %v6264_v4  ;;  %1367 = vmatprep.mubr.bf16.mxu0 %v6264_v4 }
 0x1ad   : > { %1275 = vmatpush1.bf16.msra.mxu1 %v5386_v55 }
 0x1ae   : > { %1276 = vmatprep.subr.bf16.mxu1 %v5391_v31 }
 0x1b0   : > { %1262 = vmatmul.mubr.bf16.gmra.mrb[4].mxu1 %v609_v35  ;;  %1368 = vmatmul.mubr.bf16.gmra.mrb[4].mxu0 %v609_v35 }
 0x1b1   : > { %1277 = vmatpush1.bf16.msra.mxu1 %v5389_v34  ;;  %1304 = vmatprep.mubr.bf16.mxu1 %v608_v26 }
 0x1b2   : > { %1278 = vmatprep.subr.bf16.mxu1 %v5394_v36  ;;  %5169 = vmatprep.mubr.msk.bf16.mxu0 %vm5965_vm0, %v5964_v5 }
 0x1b5   : > { %1279 = vmatpush1.bf16.msra.mxu1 %v5392_v37 }
 0x1b6   : > { %1280 = vmatprep.subr.bf16.mxu1 %v5397_v38 }
 0x1b9   : > { %1281 = vmatpush1.bf16.msra.mxu1 %v5395_v39 }
 0x1ba   : > { %1282 = vmatprep.subr.bf16.mxu1 %v5400_v40 }
 0x1bd   : > { %1283 = vmatpush1.bf16.msra.mxu1 %v5398_v41 }
 0x1be   : > { %1284 = vmatprep.subr.bf16.mxu1 %v5403_v42 }
 0x1c1   : > { %1285 = vmatpush1.bf16.msra.mxu1 %v5401_v43 }
 0x1c2   : > { %1286 = vmatprep.subr.bf16.mxu1 %v5406_v44 }
 0x1c5   : > { %1287 = vmatpush1.bf16.msra.mxu1 %v5404_v45 }
 0x1c6   : > { %1288 = vmatprep.subr.bf16.mxu1 %v5409_v46 }
 0x1c9   : > { %1289 = vmatpush1.bf16.msra.mxu1 %v5407_v47 }
 0x1ca   : > { %1290 = vmatprep.subr.bf16.mxu1 %v5412_v48 }
 0x1cd   : > { %1291 = vmatpush1.bf16.msra.mxu1 %v5410_v49  ;;  %v6308_v49 = vsub.s32 2, %v6234_v51 }
 0x1ce   : > { %1292 = vmatprep.subr.bf16.mxu1 %v5415_v50  ;;  %v6311_v50 = vsub.s32 3, %v6234_v51 }
 0x1d1   : > { %1293 = vmatpush1.bf16.msra.mxu1 %v5413_v52  ;;  %v720_v52 = vrot.slane %v707_v13, %v6308_v49 }
 0x1d2   : > { %1294 = vmatprep.subr.bf16.mxu1 %v5418_v57 }
 0x1d5   : > { %1295 = vmatpush1.bf16.msra.mxu1 %v5416_v58  ;;  %v724_v58 = vrot.slane %v707_v13, %v6311_v50 }
 0x1d6   : > { %1296 = vmatprep.subr.bf16.mxu1 %v5421_v61 }
 0x1d9   : > { %1297 = vmatpush1.bf16.msra.mxu1 %v5419_v62 }
 0x1da   : > { %1298 = vmatprep.subr.bf16.mxu1 %v5424_v63 }
 0x1dd   : > { %1299 = vmatpush1.bf16.msra.mxu1 %v5422_v0 }
 0x1de   : > { %1300 = vmatprep.subr.bf16.mxu1 %v5427_v3 }
 0x1e1   : > { %1301 = vmatpush1.bf16.msra.mxu1 %v5425_v10 }
 0x1e2   : > { %1302 = vmatprep.subr.bf16.mxu1 %v5430_v11 }
 0x1e5   : > { %1303 = vmatpush1.bf16.msra.mxu1 %v5428_v12 }
 0x1e6   : > { %5143 = vmatprep.subr.bf16.mxu1 %v5964_v5 }
 0x1e8   : > { %1305 = vmatmul.mubr.bf16.vlgmr.msra.gmra.mrb[8].mxu1 %v6260_v27 }
 0x1e9   : > { %1314 = vmatprep.mubr.bf16.mxu1 %v6264_v4 }
 0x1f0   : > { %1315 = vmatmul.mubr.bf16.gmra.mrb[12].mxu1 %v609_v35 }
 0x1f1   : > { %5145 = vmatprep.mubr.msk.bf16.mxu1 %vm5965_vm0, %v5964_v5 }
 0x27b   : > { %v1253_v15 = vpop.f32.mrb[0].mxu1  ;;  %v1359_v16 = vpop.f32.mrb[0].mxu0 }
 0x27c   : > { %v1255_v19 = vpop.f32.mrb[1].mxu1  ;;  %v1361_v54 = vpop.f32.mrb[1].mxu0  ;;  %v1254_v21 = vadd.f32 %v1253_v15, %v712_v9  ;;  %v6283_v22 = vadd.f32 %v1359_v16, %v728_v14 }
 0x27d   : > { %v1257_v20 = vpop.f32.mrb[2].mxu1  ;;  %v1363_v53 = vpop.f32.mrb[2].mxu0  ;;  %v1256_v2 = vadd.f32 %v1255_v19, %v716_v17  ;;  %v6287_v27 = vadd.f32 %v1361_v54, %v732_v18 }
 0x27e   : > { %v1258_v23 = vadd.f32 %v1257_v20, %v712_v9  ;;  %v6285_v24 = vadd.f32 %v1363_v53, %v728_v14  ;;  %v1259_v25 = vpop.f32.mrb[3].mxu1  ;;  %v1365_v26 = vpop.f32.mrb[3].mxu0 }
 0x27f   : > { %v1260_v1 = vadd.f32 %v1259_v25, %v716_v17  ;;  %v6289_v56 = vadd.f32 %v1365_v26, %v732_v18 }
 0x280   : > { %v1398_v28 = vpack.c.bf16 %v1258_v23, %v1254_v21  ;;  %v1535_v29 = vpack.c.bf16 %v6285_v24, %v6283_v22 }
 0x281   : > { %v1784_v30 = vpack.c.bf16 %v1260_v1, %v1256_v2  ;;  %v1920_v7 = vpack.c.bf16 %v6289_v56, %v6287_v27 }
 0x283   : > { %v1263_v4 = vpop.f32.mrb[4].mxu1  ;;  %v1369_v55 = vpop.f32.mrb[4].mxu0 }
 0x284   : > { %v6295_v31 = vadd.f32 %v1369_v55, %v728_v14  ;;  %v1265_v32 = vpop.f32.mrb[5].mxu1  ;;  %v1371_v33 = vpop.f32.mrb[5].mxu0  ;;  %v1264_v37 = vadd.f32 %v1263_v4, %v712_v9 }
 0x285   : > { %v6297_v34 = vadd.f32 %v1371_v33, %v732_v18  ;;  %v1267_v35 = vpop.f32.mrb[6].mxu1  ;;  %v1373_v36 = vpop.f32.mrb[6].mxu0  ;;  %v1266_v42 = vadd.f32 %v1265_v32, %v716_v17 }
 0x286   : > { %v1268_v38 = vadd.f32 %v1267_v35, %v712_v9  ;;  %v6299_v39 = vadd.f32 %v1373_v36, %v728_v14  ;;  %v1269_v40 = vpop.f32.mrb[7].mxu1  ;;  %v1375_v41 = vpop.f32.mrb[7].mxu0 }
 0x287   : > { %v1270_v43 = vadd.f32 %v1269_v40, %v716_v17  ;;  %v6301_v44 = vadd.f32 %v1375_v41, %v732_v18 }
 0x288   : > { %v1399_v45 = vpack.c.bf16 %v1268_v38, %v1264_v37  ;;  %v1536_v46 = vpack.c.bf16 %v6299_v39, %v6295_v31  ;;  %v5436_v31 = vld [vmem:[%s6860_s5 + $0x14] ss:$8 sps:$4 sm:$0xff]  }
 0x289   : > { %v1785_v47 = vpack.c.bf16 %v1270_v43, %v1266_v42  ;;  %v1921_v48 = vpack.c.bf16 %v6301_v44, %v6297_v34  ;;  %v5440_v34 = vld [vmem:[%s6860_s5 + $0x30] ss:$8 sps:$4 sm:$0xff]   ;;  %v5443_v44 = vld [vmem:[%s6860_s5 + $0x40] ss:$8 sps:$4 sm:$0xff]  }
 0x2bb   : > { %v1306_v57 = vpop.f32.mrb[8].mxu1 }
 0x2bc   : > { %v1308_v61 = vpop.f32.mrb[9].mxu1  ;;  %v1307_v63 = vadd.f32 %v1306_v57, %v720_v52 }
 0x2bd   : > { %v1310_v62 = vpop.f32.mrb[10].mxu1  ;;  %v1309_v10 = vadd.f32 %v1308_v61, %v724_v58 }
 0x2be   : > { %v1311_v0 = vadd.f32 %v1310_v62, %v720_v52  ;;  %v1312_v3 = vpop.f32.mrb[11].mxu1 }
 0x2bf   : > { %v1313_v11 = vadd.f32 %v1312_v3, %v724_v58 }
 0x2c0   : > { %v1400_v12 = vpack.c.bf16 %v1311_v0, %v1307_v63 }
 0x2c1   : > { %v1786_v6 = vpack.c.bf16 %v1313_v11, %v1309_v10 }
 0x2c2   : > { %5144 = vmatpush3.bf16.xpose.msra.mxu1 %v1400_v12 }
 0x2c3   : > { %v1316_v8 = vpop.f32.mrb[12].mxu1  ;;  %5168 = vmatpush3.bf16.xpose.msra.mxu0 %v1786_v6  ;;  %5149 = vmatprep.subr.bf16.mxu1 %v5964_v5 }
 0x2c4   : > { %v1318_v51 = vpop.f32.mrb[13].mxu1  ;;  %5173 = vmatprep.subr.bf16.mxu0 %v5964_v5  ;;  %v1317_v14 = vadd.f32 %v1316_v8, %v720_v52 }
 0x2c5   : > { %v1320_v9 = vpop.f32.mrb[14].mxu1  ;;  %v1319_v16 = vadd.f32 %v1318_v51, %v724_v58 }
 0x2c6   : > { %v1321_v13 = vadd.f32 %v1320_v9, %v720_v52  ;;  %v1322_v15 = vpop.f32.mrb[15].mxu1 }
 0x2c7   : > { %v1323_v17 = vadd.f32 %v1322_v15, %v724_v58 }
 0x2c8   : > { %v1401_v18 = vpack.c.bf16 %v1321_v13, %v1317_v14 }
 0x2c9   : > { %v1787_v19 = vpack.c.bf16 %v1323_v17, %v1319_v16  ;;  %5146 = vmatmul.mubr.bf16.vlgmr.msra.gmra.mrb[16].mxu1 %v1398_v28 }
 0x2ca   : > { %5150 = vmatpush3.bf16.xpose.msra.mxu1 %v1401_v18  ;;  %5170 = vmatmul.mubr.bf16.vlgmr.msra.gmra.mrb[8].mxu0 %v1784_v30 }
 0x2cb   : > { %5174 = vmatpush3.bf16.xpose.msra.mxu0 %v1787_v19  ;;  %5151 = vmatprep.mubr.msk.bf16.mxu1 %vm5965_vm0, %v5964_v5 }
 0x2cc   : > { %5155 = vmatprep.subr.bf16.mxu1 %v5964_v5  ;;  %5175 = vmatprep.mubr.msk.bf16.mxu0 %vm5965_vm0, %v5964_v5 }
 0x2cd   : > { %5179 = vmatprep.subr.bf16.mxu0 %v5964_v5 }
 0x2d1   : > { %5152 = vmatmul.mubr.bf16.vlgmr.msra.gmra.mrb[20].mxu1 %v1399_v45 }
 0x2d2   : > { %5156 = vmatpush3.bf16.msra.mxu1 %v1535_v29  ;;  %5176 = vmatmul.mubr.bf16.vlgmr.msra.gmra.mrb[12].mxu0 %v1785_v47 }
 0x2d3   : > { %5180 = vmatpush3.bf16.msra.mxu0 %v1920_v7  ;;  %5157 = vmatprep.mubr.msk.bf16.mxu1 %vm5965_vm0, %v5964_v5 }
 0x2d4   : > { %5161 = vmatprep.subr.bf16.mxu1 %v5964_v5  ;;  %5181 = vmatprep.mubr.msk.bf16.mxu0 %vm5965_vm0, %v5964_v5 }
 0x2d5   : > { %5185 = vmatprep.subr.bf16.mxu0 %v5964_v5 }
 0x39c   : > { %v1436_v54 = vpop.f32.mrb[16].mxu1 }
 0x39d   : > { %v1484_v20 = vmul.f32 0.088388346, %v1436_v54  ;;  %v5147_v53 = vpop.f32.mrb[17].mxu1  ;;  %v1822_v21 = vpop.f32.mrb[8].mxu0 }
 0x39e   : > { %v1439_v22 = vpop.f32.mrb[18].mxu1  ;;  %v5171_v23 = vpop.f32.mrb[9].mxu0  ;;  %v1870_v7 = vmul.f32 0.088388346, %v1822_v21 }
 0x39f   : > { %v1485_v24 = vmul.f32 0.088388346, %v1439_v22  ;;  %v5148_v25 = vpop.f32.mrb[19].mxu1  ;;  %v1825_v26 = vpop.f32.mrb[10].mxu0  ;;  %v1489_v2 = vsel %vm1488_vm1, %v1484_v20, -inf }
 0x3a0   : > { %v5172_v27 = vpop.f32.mrb[11].mxu0  ;;  %1490 = vmax.xlane.f32.xlu0 %v1489_v2  ;;  %v1871_v38 = vmul.f32 0.088388346, %v1825_v26  ;;  %v1874_v42 = vsel %vm1488_vm1, %v1870_v7, -inf }
 0x3a1   : > { %v1492_v1 = vsel %vm1488_vm1, %v1485_v24, -inf }
 0x3a2   : > { %1493 = vmax.xlane.f32.xlu1 %v1492_v1  ;;  %v1877_v45 = vsel %vm1488_vm1, %v1871_v38, -inf }
 0x3a4   : > { %v1477_v56 = vpop.f32.mrb[20].mxu1 }
 0x3a5   : > { %v1486_v28 = vmul.f32 0.088388346, %v1477_v56  ;;  %v5153_v29 = vpop.f32.mrb[21].mxu1  ;;  %v1863_v30 = vpop.f32.mrb[12].mxu0 }
 0x3a6   : > { %v1480_v4 = vpop.f32.mrb[22].mxu1  ;;  %v5177_v55 = vpop.f32.mrb[13].mxu0  ;;  %v1872_v41 = vmul.f32 0.088388346, %v1863_v30 }
 0x3a7   : > { %v1487_v32 = vmul.f32 0.088388346, %v1480_v4  ;;  %v5154_v33 = vpop.f32.mrb[23].mxu1  ;;  %v1866_v35 = vpop.f32.mrb[14].mxu0  ;;  %v1495_v36 = vsel %vm1488_vm1, %v1486_v28, -inf }
 0x3a8   : > { %v5178_v37 = vpop.f32.mrb[15].mxu0  ;;  %1496 = vmax.xlane.f32.xlu0 %v1495_v36  ;;  %v1873_v43 = vmul.f32 0.088388346, %v1866_v35  ;;  %v1880_v47 = vsel %vm1488_vm1, %v1872_v41, -inf }
 0x3a9   : > { %v1498_v40 = vsel %vm1488_vm1, %v1487_v32, -inf }
 0x3aa   : > { %1499 = vmax.xlane.f32.xlu1 %v1498_v40  ;;  %v1883_v52 = vsel %vm1488_vm1, %v1873_v43, -inf }
 0x3ac   : > { %1875 = vmax.xlane.f32.xlu0 %v1874_v42 }
 0x3ae   : > { %1878 = vmax.xlane.f32.xlu1 %v1877_v45 }
 0x3b0   : > { %1881 = vmax.xlane.f32.xlu0 %v1880_v47  ;;  %v5433_v47 = vld [vmem:[%s6860_s5 + $0x4] ss:$8 sps:$4 sm:$0xff]  }
 0x3b2   : > { %1884 = vmax.xlane.f32.xlu1 %v1883_v52 }
 0x42d   : > { %v1491_v57 = vpop.xlane.xlu0 %1490 }
 0x42e   : > { %v1501_v58 = vsub.f32 %v1484_v20, %v1491_v57 }
 0x42f   : > { %v1494_v61 = vpop.xlane.xlu1 %1493 }
 0x430   : > { %v1505_v62 = vmul.f32 1.442695, %v1501_v58  ;;  %v1502_v63 = vsub.f32 %v1485_v24, %v1494_v61 }
 0x432   : > { %5679 = vpow2.f32 %v1505_v62  ;;  %v1507_v0 = vmul.f32 1.442695, %v1502_v63 }
 0x434   : > { %5681 = vpow2.f32 %v1507_v0 }
 0x435   : > { %v1497_v3 = vpop.xlane.xlu0 %1496 }
 0x436   : > { %v1503_v10 = vsub.f32 %v1486_v28, %v1497_v3  ;;  %v5431_v3 = vld [vmem:[%s6860_s5] ss:$8 sps:$4 sm:$0xff]  }
 0x437   : > { %v1500_v11 = vpop.xlane.xlu1 %1499 }
 0x438   : > { %v1509_v12 = vmul.f32 1.442695, %v1503_v10  ;;  %v1504_v6 = vsub.f32 %v1487_v32, %v1500_v11 }
 0x439   : > { %v1876_v8 = vpop.xlane.xlu0 %1875 }
 0x43a   : > { %5683 = vpow2.f32 %v1509_v12  ;;  %v1511_v51 = vmul.f32 1.442695, %v1504_v6  ;;  %v1886_v9 = vsub.f32 %v1870_v7, %v1876_v8  ;;  %v5434_v6 = vld [vmem:[%s6860_s5 + $0x10] ss:$8 sps:$4 sm:$0xff]  }
 0x43b   : > { %v1879_v14 = vpop.xlane.xlu1 %1878 }
 0x43c   : > { %v5680_v13 = vpop.eup %5679  ;;  %5685 = vpow2.f32 %v1511_v51  ;;  %v1890_v15 = vmul.f32 1.442695, %v1886_v9  ;;  %v1887_v16 = vsub.f32 %v1871_v38, %v1879_v14  ;;  %v5439_v51 = vld [vmem:[%s6860_s5 + $0x24] ss:$8 sps:$4 sm:$0xff]  }
 0x43d   : > { %v1882_v17 = vpop.xlane.xlu0 %1881  ;;  %v1513_v18 = vsel %vm1488_vm1, %v5680_v13, 0.0 }
 0x43e   : > { %v5682_v19 = vpop.eup %5681  ;;  %5687 = vpow2.f32 %v1890_v15  ;;  %v1892_v54 = vmul.f32 1.442695, %v1887_v16  ;;  %v1888_v20 = vsub.f32 %v1872_v41, %v1882_v17  ;;  %1514 = vadd.xlane.f32.xlu0 %v1513_v18  ;;  %v5442_v15 = vld [vmem:[%s6860_s5 + $0x34] ss:$8 sps:$4 sm:$0xff]   ;;  %v5446_v18 = vld [vmem:[%s6860_s5 + $0x50] ss:$8 sps:$4 sm:$0xff]  }
 0x43f   : > { %v1885_v53 = vpop.xlane.xlu1 %1884  ;;  %v1516_v21 = vsel %vm1488_vm1, %v5682_v19, 0.0 }
 0x440   : > { %5689 = vpow2.f32 %v1892_v54  ;;  %v1894_v22 = vmul.f32 1.442695, %v1888_v20  ;;  %v1889_v23 = vsub.f32 %v1873_v43, %v1885_v53  ;;  %1517 = vadd.xlane.f32.xlu1 %v1516_v21  ;;  %v5449_v54 = vld [vmem:[%s6860_s5 + $0x60] ss:$8 sps:$4 sm:$0xff]   ;;  %v5454_v20 = vld [vmem:[%s6860_s5 + $0x74] ss:$8 sps:$4 sm:$0xff]  }
 0x441   : > { %v5452_v53 = vld [vmem:[%s6860_s5 + $0x70] ss:$8 sps:$4 sm:$0xff]   ;;  %v5457_v21 = vld [vmem:[%s6860_s5 + $0x84] ss:$8 sps:$4 sm:$0xff]  }
 0x442   : > { %5691 = vpow2.f32 %v1894_v22  ;;  %v1896_v24 = vmul.f32 1.442695, %v1889_v23  ;;  %v5966_v22 = vmov 0  }
 0x444   : > { %v5684_v25 = vpop.eup %5683  ;;  %5693 = vpow2.f32 %v1896_v24 }
 0x445   : > { %v1519_v26 = vsel %vm1488_vm1, %v5684_v25, 0.0 }
 0x446   : > { %v5686_v2 = vpop.eup %5685  ;;  %1520 = vadd.xlane.f32.xlu0 %v1519_v26  ;;  %v5455_v26 = vld [vmem:[%s6860_s5 + $0x80] ss:$8 sps:$4 sm:$0xff]  }
 0x447   : > { %v1522_v27 = vsel %vm1488_vm1, %v5686_v2, 0.0 }
 0x448   : > { %v5688_v1 = vpop.eup %5687  ;;  %1523 = vadd.xlane.f32.xlu1 %v1522_v27 }
 0x449   : > { %v1898_v56 = vsel %vm1488_vm1, %v5688_v1, 0.0 }
 0x44a   : > { %v5690_v28 = vpop.eup %5689  ;;  %1899 = vadd.xlane.f32.xlu0 %v1898_v56  ;;  %v5458_v56 = vld [vmem:[%s6860_s5 + $0x90] ss:$8 sps:$4 sm:$0xff]  }
 0x44b   : > { %v1901_v29 = vsel %vm1488_vm1, %v5690_v28, 0.0 }
 0x44c   : > { %v5692_v30 = vpop.eup %5691  ;;  %1902 = vadd.xlane.f32.xlu1 %v1901_v29 }
 0x44d   : > { %v1904_v7 = vsel %vm1488_vm1, %v5692_v30, 0.0 }
 0x44e   : > { %v5694_v4 = vpop.eup %5693  ;;  %1905 = vadd.xlane.f32.xlu0 %v1904_v7 }
 0x44f   : > { %v1907_v55 = vsel %vm1488_vm1, %v5694_v4, 0.0 }
 0x450   : > { %1908 = vadd.xlane.f32.xlu1 %v1907_v55 }
 0x4cb   : > { %v1515_v32 = vpop.xlane.xlu0 %1514 }
 0x4cc   : > { %5695 = vrcp.f32 %v1515_v32 }
 0x4cd   : > { %v1518_v33 = vpop.xlane.xlu1 %1517 }
 0x4ce   : > { %5697 = vrcp.f32 %v1518_v33  ;;  %v5466_v33 = vld [vmem:[%s6860_s5 + $0xb4] ss:$8 sps:$4 sm:$0xff]  }
 0x4d3   : > { %v1521_v35 = vpop.xlane.xlu0 %1520 }
 0x4d4   : > { %5699 = vrcp.f32 %v1521_v35 }
 0x4d5   : > { %v1524_v36 = vpop.xlane.xlu1 %1523 }
 0x4d6   : > { %v5696_v37 = vpop.eup %5695  ;;  %5701 = vrcp.f32 %v1524_v36 }
 0x4d7   : > { %v1900_v38 = vpop.xlane.xlu0 %1899  ;;  %v1529_v41 = vmul.f32 %v5696_v37, %v5680_v13  ;;  %v5437_v13 = vld [vmem:[%s6860_s5 + $0x20] ss:$8 sps:$4 sm:$0xff]  }
 0x4d8   : > { %v5698_v40 = vpop.eup %5697  ;;  %5703 = vrcp.f32 %v1900_v38  ;;  %v5464_v38 = vld [vmem:[%s6860_s5 + $0xb0] ss:$8 sps:$4 sm:$0xff]  }
 0x4d9   : > { %v1530_v42 = vmul.f32 %v5698_v40, %v5682_v19  ;;  %v1903_v43 = vpop.xlane.xlu1 %1902  ;;  %v5451_v19 = vld [vmem:[%s6860_s5 + $0x64] ss:$8 sps:$4 sm:$0xff]  }
 0x4da   : > { %5705 = vrcp.f32 %v1903_v43  ;;  %v5467_v43 = vld [vmem:[%s6860_s5 + $0xc0] ss:$8 sps:$4 sm:$0xff]  }
 0x4db   : > { %v1533_v45 = vpack.c.bf16 %v1530_v42, %v1529_v41  ;;  %v1906_v52 = vpop.xlane.xlu0 %1905  ;;  %v5469_v42 = vld [vmem:[%s6860_s5 + $0xc4] ss:$8 sps:$4 sm:$0xff]  }
 0x4dd   : > { %5158 = vmatmul.mubr.msk.bf16.vlgmr.msra.gmra.mrb[24].mxu1 %vm1488_vm1, %v1533_v45  ;;  %v1909_v57 = vpop.xlane.xlu1 %1908  ;;  %v5472_v45 = vld [vmem:[%s6860_s5 + $0xd4] ss:$8 sps:$4 sm:$0xff]  }
 0x4de   : > { %v5700_v58 = vpop.eup %5699  ;;  %5162 = vmatpush3.bf16.msra.mxu1 %v1536_v46  ;;  %5707 = vrcp.f32 %v1909_v57  ;;  %5163 = vmatprep.mubr.msk.bf16.mxu1 %vm5965_vm0, %v5964_v5 }
 0x4df   : > { %1723 = vmatprep.subr.bf16.mxu1 %v5433_v47  ;;  %5709 = vrcp.f32 %v1906_v52  ;;  %v1531_v62 = vmul.f32 %v5700_v58, %v5684_v25  ;;  %v5470_v58 = vld [vmem:[%s6860_s5 + $0xd0] ss:$8 sps:$4 sm:$0xff]  }
 0x4e0   : > { %v5702_v61 = vpop.eup %5701 }
 0x4e1   : > { %v1532_v63 = vmul.f32 %v5702_v61, %v5686_v2 }
 0x4e2   : > { %v5704_v0 = vpop.eup %5703 }
 0x4e3   : > { %v1534_v10 = vpack.c.bf16 %v1532_v63, %v1531_v62  ;;  %v1914_v46 = vmul.f32 %v5704_v0, %v5688_v1  ;;  %v5460_v1 = vld [vmem:[%s6860_s5 + $0x94] ss:$8 sps:$4 sm:$0xff]   ;;  %v5475_v63 = vld [vmem:[%s6860_s5 + $0xe4] ss:$8 sps:$4 sm:$0xff]   ;;  %v5473_v0 = vld [vmem:[%s6860_s5 + $0xe0] ss:$8 sps:$4 sm:$0xff]  }
 0x4e4   : > { %v5706_v39 = vpop.eup %5705 }
 0x4e5   : > { %v1915_v11 = vmul.f32 %v5706_v39, %v5690_v28  ;;  %5164 = vmatmul.mubr.msk.bf16.vlgmr.msra.gmra.mrb[28].mxu1 %vm1488_vm1, %v1534_v10  ;;  %v5463_v28 = vld [vmem:[%s6860_s5 + $0xa4] ss:$8 sps:$4 sm:$0xff]   ;;  %v5476_v10 = vld [vmem:[%s6860_s5 + $0xf0] ss:$8 sps:$4 sm:$0xff]  }
 0x4e6   : > { %1724 = vmatpush1.bf16.msra.mxu1 %v5431_v3  ;;  %1755 = vmatprep.mubr.bf16.mxu1 %v5966_v22  ;;  %v5478_v3 = vld [vmem:[%s6860_s5 + $0xf4] ss:$8 sps:$4 sm:$0xff]  }
 0x4e7   : > { %v1918_v12 = vpack.c.bf16 %v1915_v11, %v1914_v46  ;;  %1725 = vmatprep.subr.bf16.mxu1 %v5436_v31  ;;  %v1378_v31 = vld [vmem:[%s6861_s6] sm:$0x3] }
 0x4e8   : > { %v5708_v8 = vpop.eup %5707  ;;  %v1383_v39 = vrot.slane %v1378_v31, %v6240_v60  ;;  %v1387_v46 = vrot.slane %v1378_v31, %v6237_v59  ;;  %v5847_v11 = vld [vmem:[%s6160_s20] sm:$0xff] }
 0x4e9   : > { %5182 = vmatmul.mubr.msk.bf16.vlgmr.msra.gmra.mrb[16].mxu0 %vm1488_vm1, %v1918_v12  ;;  %v5710_v9 = vpop.eup %5709  ;;  %v1917_v14 = vmul.f32 %v5708_v8, %v5694_v4  ;;  %v5461_v4 = vld [vmem:[%s6860_s5 + $0xa0] ss:$8 sps:$4 sm:$0xff]  }
 0x4ea   : > { %5186 = vmatpush3.bf16.msra.mxu0 %v1921_v48  ;;  %5187 = vmatprep.mubr.msk.bf16.mxu0 %vm5965_vm0, %v5964_v5  ;;  %v1916_v16 = vmul.f32 %v5710_v9, %v5692_v30  ;;  %v5445_v5 = vld [vmem:[%s6860_s5 + $0x44] ss:$8 sps:$4 sm:$0xff]   ;;  %v5448_v48 = vld [vmem:[%s6860_s5 + $0x54] ss:$8 sps:$4 sm:$0xff]   ;;  %v1390_v12 = vadd.f32 %v5847_v11, %v1383_v39 }
 0x4eb   : > { %1726 = vmatpush1.bf16.msra.mxu1 %v5434_v6  ;;  %v5848_v6 = vld [vmem:[%s6160_s20 + $0x8] sm:$0xff]  ;;  %v2309_v11 = vld [vmem:[#allocation4 + $0xc0] sm:$0xff] }
 0x4ec   : > { %1727 = vmatprep.subr.bf16.mxu1 %v5439_v51  ;;  %v1919_v17 = vpack.c.bf16 %v1917_v14, %v1916_v16  ;;  %v1391_v8 = vadd.f32 %v5848_v6, %v1387_v46  ;;  %v5849_v51 = vld [vmem:[%s6160_s20 + $0x10] sm:$0xff] }
 0x4ed   : > { %v1392_v9 = vadd.f32 %v5849_v51, %v1383_v39 }
 0x4ef   : > { %1728 = vmatpush1.bf16.msra.mxu1 %v5437_v13  ;;  %v5850_v13 = vld [vmem:[%s6160_s20 + $0x18] sm:$0xff] }
 0x4f0   : > { %1729 = vmatprep.subr.bf16.mxu1 %v5442_v15  ;;  %v1393_v15 = vadd.f32 %v5850_v13, %v1387_v46  ;;  %v2316_v13 = vld [vmem:[#allocation4 + $0x128] sm:$0xff] }
 0x4f1   : > { %5188 = vmatmul.mubr.msk.bf16.vlgmr.msra.gmra.mrb[20].mxu0 %vm1488_vm1, %v1919_v17 }
 0x4f3   : > { %1730 = vmatpush1.bf16.msra.mxu1 %v5440_v34 }
 0x4f4   : > { %1731 = vmatprep.subr.bf16.mxu1 %v5445_v5 }
 0x4f7   : > { %1732 = vmatpush1.bf16.msra.mxu1 %v5443_v44 }
 0x4f8   : > { %1733 = vmatprep.subr.bf16.mxu1 %v5448_v48 }
 0x4fb   : > { %1734 = vmatpush1.bf16.msra.mxu1 %v5446_v18 }
 0x4fc   : > { %1735 = vmatprep.subr.bf16.mxu1 %v5451_v19 }
 0x4ff   : > { %1736 = vmatpush1.bf16.msra.mxu1 %v5449_v54  ;;  %v5851_v54 = vld [vmem:[%s6160_s20 + $0x20] sm:$0xff] }
 0x500   : > { %1737 = vmatprep.subr.bf16.mxu1 %v5454_v20  ;;  %v1394_v20 = vadd.f32 %v5851_v54, %v1383_v39 }
 0x503   : > { %1738 = vmatpush1.bf16.msra.mxu1 %v5452_v53 }
 0x504   : > { %2108 = vmatprep.subr.bf16.mxu1 %v5457_v21  ;;  %v5852_v21 = vld [vmem:[%s6160_s20 + $0x28] sm:$0xff] }
 0x5b0   : > { %v1574_v23 = vpop.f32.mrb[24].mxu1 }
 0x5b1   : > { %v5159_v24 = vpop.f32.mrb[25].mxu1 }
 0x5b2   : > { %v1577_v25 = vpop.f32.mrb[26].mxu1 }
 0x5b3   : > { %v1625_v2 = vpack.c.bf16 %v1577_v25, %v1574_v23  ;;  %v5160_v27 = vpop.f32.mrb[27].mxu1  ;;  %v5853_v23 = vld [vmem:[%s6160_s20 + $0x30] sm:$0xff] }
 0x5b4   : > { %v1396_v24 = vadd.f32 %v5853_v23, %v1383_v39  ;;  %v2310_v39 = vld [vmem:[#allocation4 + $0xc8] sm:$0xff] }
 0x5b5   : > { %1756 = vmatmul.mubr.bf16.vlgmr.msra.gmra.mrb[32].mxu1 %v1625_v2 }
 0x5b6   : > { %2109 = vmatpush1.bf16.msra.mxu1 %v5455_v26  ;;  %1765 = vmatprep.mubr.bf16.mxu1 %v5966_v22  ;;  %v5854_v26 = vld [vmem:[%s6160_s20 + $0x38] sm:$0xff] }
 0x5b7   : > { %2110 = vmatprep.subr.bf16.mxu1 %v5460_v1  ;;  %v1397_v2 = vadd.f32 %v5854_v26, %v1387_v46 }
 0x5b8   : > { %v1618_v29 = vpop.f32.mrb[28].mxu1 }
 0x5b9   : > { %v5165_v30 = vpop.f32.mrb[29].mxu1 }
 0x5ba   : > { %2111 = vmatpush1.bf16.msra.mxu1 %v5458_v56  ;;  %v1621_v7 = vpop.f32.mrb[30].mxu1 }
 0x5bb   : > { %v1626_v55 = vpack.c.bf16 %v1621_v7, %v1618_v29  ;;  %v5166_v32 = vpop.f32.mrb[31].mxu1  ;;  %2112 = vmatprep.subr.bf16.mxu1 %v5463_v28 }
 0x5bc   : > { %v1959_v35 = vpop.f32.mrb[16].mxu0  ;;  %v2298_v32 = vld [vmem:[#allocation4 + $0x8] sm:$0xff] }
 0x5bd   : > { %1766 = vmatmul.mubr.bf16.gmra.mrb[36].mxu1 %v1626_v55  ;;  %v5183_v36 = vpop.f32.mrb[17].mxu0 }
 0x5be   : > { %2113 = vmatpush1.bf16.msra.mxu1 %v5461_v4  ;;  %v1962_v37 = vpop.f32.mrb[18].mxu0  ;;  %2140 = vmatprep.mubr.bf16.mxu1 %v5966_v22 }
 0x5bf   : > { %v2010_v40 = vpack.c.bf16 %v1962_v37, %v1959_v35  ;;  %v5184_v41 = vpop.f32.mrb[19].mxu0  ;;  %2114 = vmatprep.subr.bf16.mxu1 %v5466_v33  ;;  %v2300_v33 = vld [vmem:[#allocation4 + $0x28] sm:$0xff]  ;;  %v2297_v35 = vld [vmem:[#allocation4] sm:$0xff] }
 0x5c0   : > { %v4837_v36 = vcombine.low %v2298_v32, %v2300_v33  ;;  %v4838_v37 = vcombine.high %v2298_v32, %v2300_v33  ;;  %v2304_v41 = vld [vmem:[#allocation4 + $0x68] sm:$0xff] }
 0x5c2   : > { %2115 = vmatpush1.bf16.msra.mxu1 %v5464_v38  ;;  %v2299_v38 = vld [vmem:[#allocation4 + $0x20] sm:$0xff] }
 0x5c3   : > { %2116 = vmatprep.subr.bf16.mxu1 %v5469_v42  ;;  %v4835_v42 = vcombine.low %v2297_v35, %v2299_v38 }
 0x5c4   : > { %v2003_v47 = vpop.f32.mrb[20].mxu0 }
 0x5c5   : > { %v5189_v52 = vpop.f32.mrb[21].mxu0 }
 0x5c6   : > { %2117 = vmatpush1.bf16.msra.mxu1 %v5467_v43  ;;  %v2006_v57 = vpop.f32.mrb[22].mxu0  ;;  %v4836_v43 = vcombine.high %v2297_v35, %v2299_v38  ;;  %v2303_v52 = vld [vmem:[#allocation4 + $0x60] sm:$0xff]  ;;  %v2326_v35 = vld [vmem:[#allocation4 + $0x1c8] sm:$0xff] }
 0x5c7   : > { %v2011_v61 = vpack.c.bf16 %v2006_v57, %v2003_v47  ;;  %v5190_v62 = vpop.f32.mrb[23].mxu0  ;;  %2118 = vmatprep.subr.bf16.mxu1 %v5472_v45  ;;  %v2301_v47 = vld [vmem:[#allocation4 + $0x40] sm:$0xff]  ;;  %v2306_v57 = vld [vmem:[#allocation4 + $0x88] sm:$0xff] }
 0x5c8   : > { %v2305_v62 = vld [vmem:[#allocation4 + $0x80] sm:$0xff]  ;;  %2703 = vmatprep.subr.bf16.mxu0 %v4836_v43 }
 0x5c9   : > { %2704 = vmatpush1.bf16.msra.mxu0 %v4835_v42  ;;  %v2327_v38 = vld [vmem:[#allocation4 + $0x1e0] sm:$0xff] }
 0x5ca   : > { %2119 = vmatpush1.bf16.msra.mxu1 %v5470_v58  ;;  %v4840_v58 = vcombine.high %v2301_v47, %v2303_v52 }
 0x5cb   : > { %2120 = vmatprep.subr.bf16.mxu1 %v5475_v63  ;;  %v2307_v63 = vld [vmem:[#allocation4 + $0xa0] sm:$0xff] }
 0x5cc   : > { %2705 = vmatprep.subr.bf16.mxu0 %v4840_v58  ;;  %v4844_v31 = vcombine.high %v2305_v62, %v2307_v63 }
 0x5ce   : > { %2121 = vmatpush1.bf16.msra.mxu1 %v5473_v0 }
 0x5cf   : > { %2122 = vmatprep.subr.bf16.mxu1 %v5478_v3  ;;  %v4839_v3 = vcombine.low %v2301_v47, %v2303_v52  ;;  %v2332_v47 = vld [vmem:[#allocation4 + $0x228] sm:$0xff]  ;;  %v2329_v52 = vld [vmem:[#allocation4 + $0x200] sm:$0xff] }
 0x5d1   : > { %2706 = vmatpush1.bf16.msra.mxu0 %v4839_v3  ;;  %v2336_v3 = vld [vmem:[#allocation4 + $0x268] sm:$0xff] }
 0x5d2   : > { %2123 = vmatpush1.bf16.msra.mxu1 %v5476_v10  ;;  %2707 = vmatprep.subr.bf16.mxu0 %v4844_v31  ;;  %v2335_v31 = vld [vmem:[#allocation4 + $0x260] sm:$0xff] }
 0x5d3   : > { %2756 = vmatprep.subr.bf16.mxu1 %v4838_v37  ;;  %v2325_v37 = vld [vmem:[#allocation4 + $0x1c0] sm:$0xff] }
 0x5d4   : > { %v4864_v43 = vcombine.high %v2325_v37, %v2327_v38 }
 0x5d5   : > { %2141 = vmatmul.mubr.bf16.vlgmr.msra.gmra.mrb[32].mxu1 %v2010_v40  ;;  %v2302_v40 = vld [vmem:[#allocation4 + $0x48] sm:$0xff] }
 0x5d6   : > { %2150 = vmatprep.mubr.bf16.mxu1 %v5966_v22  ;;  %v1395_v22 = vadd.f32 %v5852_v21, %v1387_v46  ;;  %v4842_v45 = vcombine.high %v2302_v40, %v2304_v41  ;;  %2757 = vmatpush1.bf16.msra.mxu1 %v4837_v36  ;;  %v4841_v0 = vcombine.low %v2302_v40, %v2304_v41  ;;  %v2312_v46 = vld [vmem:[#allocation4 + $0xe8] sm:$0xff]  ;;  %v2317_v21 = vld [vmem:[#allocation4 + $0x140] sm:$0xff] }
 0x5d7   : > { %v4850_v51 = vcombine.high %v2310_v39, %v2312_v46  ;;  %v2328_v36 = vld [vmem:[#allocation4 + $0x1e8] sm:$0xff] }
 0x5d8   : > { %2758 = vmatprep.subr.bf16.mxu1 %v4842_v45  ;;  %v4866_v42 = vcombine.high %v2326_v35, %v2328_v36  ;;  %v2330_v45 = vld [vmem:[#allocation4 + $0x208] sm:$0xff]  ;;  %v4865_v58 = vcombine.low %v2326_v35, %v2328_v36 }
 0x5da   : > { %2759 = vmatpush1.bf16.msra.mxu1 %v4841_v0  ;;  %v2334_v0 = vld [vmem:[#allocation4 + $0x248] sm:$0xff] }
 0x5dd   : > { %2151 = vmatmul.mubr.bf16.gmra.mrb[36].mxu1 %v2011_v61  ;;  %v2308_v61 = vld [vmem:[#allocation4 + $0xa8] sm:$0xff] }
 0x5de   : > { %v4846_v10 = vcombine.high %v2306_v57, %v2308_v61  ;;  %v4845_v6 = vcombine.low %v2306_v57, %v2308_v61  ;;  %v2331_v57 = vld [vmem:[#allocation4 + $0x220] sm:$0xff]  ;;  %v4863_v61 = vcombine.low %v2325_v37, %v2327_v38  ;;  %v2338_v37 = vld [vmem:[#allocation4 + $0x288] sm:$0xff] }
 0x5df   : > { %v2340_v38 = vld [vmem:[#allocation4 + $0x2a8] sm:$0xff] }
 0x5e0   : > { %2760 = vmatprep.subr.bf16.mxu1 %v4846_v10  ;;  %v2333_v10 = vld [vmem:[#allocation4 + $0x240] sm:$0xff] }
 0x5e1   : > { %2761 = vmatpush1.bf16.msra.mxu1 %v4845_v6  ;;  %v4873_v6 = vcombine.low %v2334_v0, %v2336_v3 }
 0x5e2   : > { %2762 = vmatprep.subr.bf16.mxu1 %v4850_v51 }
 0x6a8   : > { %v2142_v14 = vpop.f32.mrb[32].mxu1 }
 0x6a9   : > { %v6464_v16 = vadd.f32 %v2142_v14, %v1390_v12  ;;  %v2144_v17 = vpop.f32.mrb[33].mxu1  ;;  %v2311_v12 = vld [vmem:[#allocation4 + $0xe0] sm:$0xff]  ;;  %v2314_v14 = vld [vmem:[#allocation4 + $0x108] sm:$0xff] }
 0x6aa   : > { %v6466_v34 = vadd.f32 %v2144_v17, %v1391_v8  ;;  %v2146_v5 = vpop.f32.mrb[34].mxu1  ;;  %v4843_v8 = vcombine.low %v2305_v62, %v2307_v63  ;;  %v2315_v17 = vld [vmem:[#allocation4 + $0x120] sm:$0xff]  ;;  %v4853_v23 = vcombine.low %v2314_v14, %v2316_v13  ;;  %v4870_v62 = vcombine.high %v2330_v45, %v2332_v47 }
 0x6ab   : > { %v6468_v44 = vadd.f32 %v2146_v5, %v1392_v9  ;;  %v2148_v48 = vpop.f32.mrb[35].mxu1  ;;  %v4848_v9 = vcombine.high %v2309_v11, %v2311_v12  ;;  %v4849_v5 = vcombine.low %v2310_v39, %v2312_v46  ;;  %v4868_v63 = vcombine.high %v2329_v52, %v2331_v57 }
 0x6ac   : > { %v6470_v18 = vadd.f32 %v2148_v48, %v1393_v15  ;;  %v2171_v19 = vadd.f32 %v6466_v34, %v6464_v16  ;;  %v2313_v15 = vld [vmem:[#allocation4 + $0x100] sm:$0xff]  ;;  %2708 = vmatpush1.bf16.msra.mxu0 %v4843_v8  ;;  %v4847_v48 = vcombine.low %v2309_v11, %v2311_v12  ;;  %v4869_v39 = vcombine.low %v2330_v45, %v2332_v47 }
 0x6ad   : > { %2709 = vmatprep.subr.bf16.mxu0 %v4848_v9  ;;  %v4852_v54 = vcombine.high %v2313_v15, %v2315_v17  ;;  %2763 = vmatpush1.bf16.msra.mxu1 %v4849_v5  ;;  %v4867_v46 = vcombine.low %v2329_v52, %v2331_v57  ;;  %v4874_v11 = vcombine.high %v2334_v0, %v2336_v3  ;;  %v2342_v52 = vld [vmem:[#allocation4 + $0x2c8] sm:$0xff] }
 0x6ae   : > { %2172 = vadd.xlane.f32.xlu0 %v2171_v19  ;;  %v2174_v53 = vadd.f32 %v6470_v18, %v6468_v44  ;;  %v4854_v19 = vcombine.high %v2314_v14, %v2316_v13  ;;  %v4872_v12 = vcombine.high %v2333_v10, %v2335_v31  ;;  %v4871_v8 = vcombine.low %v2333_v10, %v2335_v31  ;;  %v2344_v57 = vld [vmem:[#allocation4 + $0x2e8] sm:$0xff] }
 0x6af   : > { %v2346_v10 = vld [vmem:[#allocation4 + $0x308] sm:$0xff] }
 0x6b0   : > { %2175 = vadd.xlane.f32.xlu1 %v2174_v53  ;;  %v2152_v25 = vpop.f32.mrb[36].mxu1  ;;  %v2320_v53 = vld [vmem:[#allocation4 + $0x168] sm:$0xff]  ;;  %2710 = vmatpush1.bf16.msra.mxu0 %v4847_v48 }
 0x6b1   : > { %v6480_v27 = vadd.f32 %v2152_v25, %v1394_v20  ;;  %v2154_v1 = vpop.f32.mrb[37].mxu1  ;;  %v2318_v20 = vld [vmem:[#allocation4 + $0x148] sm:$0xff]  ;;  %2764 = vmatprep.subr.bf16.mxu1 %v4854_v19  ;;  %2711 = vmatprep.subr.bf16.mxu0 %v4852_v54 }
 0x6b2   : > { %v6482_v56 = vadd.f32 %v2154_v1, %v1395_v22  ;;  %v2156_v28 = vpop.f32.mrb[38].mxu1  ;;  %v2319_v22 = vld [vmem:[#allocation4 + $0x160] sm:$0xff]  ;;  %v4858_v25 = vcombine.high %v2318_v20, %v2320_v53  ;;  %v2324_v1 = vld [vmem:[#allocation4 + $0x1a8] sm:$0xff]  ;;  %2765 = vmatpush1.bf16.msra.mxu1 %v4853_v23 }
 0x6b3   : > { %v6484_v29 = vadd.f32 %v2156_v28, %v1396_v24  ;;  %v2158_v30 = vpop.f32.mrb[39].mxu1  ;;  %v4851_v24 = vcombine.low %v2313_v15, %v2315_v17  ;;  %v4856_v26 = vcombine.high %v2317_v21, %v2319_v22  ;;  %v2321_v28 = vld [vmem:[#allocation4 + $0x180] sm:$0xff]  ;;  %v2348_v31 = vld [vmem:[#allocation4 + $0x328] sm:$0xff] }
 0x6b4   : > { %v6486_v7 = vadd.f32 %v2158_v30, %v1397_v2  ;;  %v2177_v4 = vadd.f32 %v6482_v56, %v6480_v27  ;;  %v2322_v2 = vld [vmem:[#allocation4 + $0x188] sm:$0xff]  ;;  %v2323_v30 = vld [vmem:[#allocation4 + $0x1a0] sm:$0xff]  ;;  %2766 = vmatprep.subr.bf16.mxu1 %v4858_v25 }
 0x6b5   : > { %2712 = vmatpush1.bf16.msra.mxu0 %v4851_v24  ;;  %v4862_v32 = vcombine.high %v2322_v2, %v2324_v1  ;;  %v4860_v33 = vcombine.high %v2321_v28, %v2323_v30  ;;  %v4861_v40 = vcombine.low %v2322_v2, %v2324_v1  ;;  %v4859_v41 = vcombine.low %v2321_v28, %v2323_v30 }
 0x6b6   : > { %2178 = vadd.xlane.f32.xlu0 %v2177_v4  ;;  %v2180_v55 = vadd.f32 %v6486_v7, %v6484_v29  ;;  %v4857_v4 = vcombine.low %v2318_v20, %v2320_v53  ;;  %2713 = vmatprep.subr.bf16.mxu0 %v4856_v26 }
 0x6b8   : > { %2181 = vadd.xlane.f32.xlu1 %v2180_v55  ;;  %v4855_v55 = vcombine.low %v2317_v21, %v2319_v22  ;;  %2767 = vmatpush1.bf16.msra.mxu1 %v4857_v4 }
 0x6b9   : > { %2768 = vmatprep.subr.bf16.mxu1 %v4862_v32 }
 0x6ba   : > { %2714 = vmatpush1.bf16.msra.mxu0 %v4855_v55 }
 0x6bb   : > { %2715 = vmatprep.subr.bf16.mxu0 %v4860_v33 }
 0x6bc   : > { %2769 = vmatpush1.bf16.msra.mxu1 %v4861_v40  ;;  %v4878_v40 = vcombine.high %v2338_v37, %v2340_v38 }
 0x6bd   : > { %2770 = vmatprep.subr.bf16.mxu1 %v4866_v42  ;;  %v2339_v42 = vld [vmem:[#allocation4 + $0x2a0] sm:$0xff] }
 0x6be   : > { %2716 = vmatpush1.bf16.msra.mxu0 %v4859_v41  ;;  %v2337_v41 = vld [vmem:[#allocation4 + $0x280] sm:$0xff] }
 0x6bf   : > { %2717 = vmatprep.subr.bf16.mxu0 %v4864_v43  ;;  %v4877_v43 = vcombine.low %v2338_v37, %v2340_v38  ;;  %v4876_v45 = vcombine.high %v2337_v41, %v2339_v42  ;;  %v4875_v47 = vcombine.low %v2337_v41, %v2339_v42  ;;  %v2359_v37 = vld [vmem:[#allocation4 + $0x3e0] sm:$0xff]  ;;  %v3443_v42 = vld [vmem:[#allocation4 + $0x10] sm:$0xff] }
 0x6c0   : > { %2771 = vmatpush1.bf16.msra.mxu1 %v4865_v58  ;;  %v4882_v58 = vcombine.high %v2342_v52, %v2344_v57 }
 0x6c1   : > { %2772 = vmatprep.subr.bf16.mxu1 %v4870_v62  ;;  %v2343_v62 = vld [vmem:[#allocation4 + $0x2e0] sm:$0xff] }
 0x6c2   : > { %2718 = vmatpush1.bf16.msra.mxu0 %v4863_v61  ;;  %v2341_v61 = vld [vmem:[#allocation4 + $0x2c0] sm:$0xff] }
 0x6c3   : > { %2719 = vmatprep.subr.bf16.mxu0 %v4868_v63  ;;  %v4881_v63 = vcombine.low %v2342_v52, %v2344_v57  ;;  %v4880_v0 = vcombine.high %v2341_v61, %v2343_v62  ;;  %v4879_v3 = vcombine.low %v2341_v61, %v2343_v62 }
 0x6c4   : > { %2773 = vmatpush1.bf16.msra.mxu1 %v4869_v39  ;;  %v4886_v39 = vcombine.high %v2346_v10, %v2348_v31 }
 0x6c5   : > { %2774 = vmatprep.subr.bf16.mxu1 %v4874_v11  ;;  %v2347_v11 = vld [vmem:[#allocation4 + $0x320] sm:$0xff] }
 0x6c6   : > { %2720 = vmatpush1.bf16.msra.mxu0 %v4867_v46  ;;  %v2345_v46 = vld [vmem:[#allocation4 + $0x300] sm:$0xff] }
 0x6c7   : > { %2721 = vmatprep.subr.bf16.mxu0 %v4872_v12  ;;  %v4885_v12 = vcombine.low %v2346_v10, %v2348_v31 }
 0x6c8   : > { %2775 = vmatpush1.bf16.msra.mxu1 %v4873_v6  ;;  %v4884_v6 = vcombine.high %v2345_v46, %v2347_v11 }
 0x6c9   : > { %2776 = vmatprep.subr.bf16.mxu1 %v4878_v40 }
 0x6ca   : > { %2722 = vmatpush1.bf16.msra.mxu0 %v4871_v8  ;;  %v4883_v8 = vcombine.low %v2345_v46, %v2347_v11  ;;  %v2169_v46 = vld [vmem:[%s6862_s7] sm:$0x3] }
 0x6cb   : > { %2723 = vmatprep.subr.bf16.mxu0 %v4876_v45 }
 0x6cc   : > { %2777 = vmatpush1.bf16.msra.mxu1 %v4877_v43  ;;  %v3445_v43 = vld [vmem:[#allocation4 + $0x30] sm:$0xff] }
 0x6cd   : > { %2778 = vmatprep.subr.bf16.mxu1 %v4882_v58  ;;  %v4980_v45 = vcombine.high %v3443_v42, %v3445_v43 }
 0x6ce   : > { %2724 = vmatpush1.bf16.msra.mxu0 %v4875_v47  ;;  %v4979_v47 = vcombine.low %v3443_v42, %v3445_v43  ;;  %v3451_v42 = vld [vmem:[#allocation4 + $0x90] sm:$0xff] }
 0x6cf   : > { %2725 = vmatprep.subr.bf16.mxu0 %v4880_v0  ;;  %v3453_v43 = vld [vmem:[#allocation4 + $0xb0] sm:$0xff] }
 0x6d0   : > { %2779 = vmatpush1.bf16.msra.mxu1 %v4881_v63 }
 0x6d1   : > { %2780 = vmatprep.subr.bf16.mxu1 %v4886_v39 }
 0x6d2   : > { %2726 = vmatpush1.bf16.msra.mxu0 %v4879_v3 }
 0x6d3   : > { %2727 = vmatprep.subr.bf16.mxu0 %v4884_v6  ;;  %v2243_v6 = vrot.slane %v2169_v46, %v6237_v59 }
 0x6d4   : > { %2781 = vmatpush1.bf16.msra.mxu1 %v4885_v12  ;;  %v2170_v12 = vld [vmem:[%s6863_s8] sm:$0x3] }
 0x6d6   : > { %2728 = vmatpush1.bf16.msra.mxu0 %v4883_v8  ;;  %v2239_v8 = vrot.slane %v2169_v46, %v6240_v60  ;;  %v5479_v46 = vld [vmem:[#allocation6] ss:$8 sps:$4 sm:$0xff]  }
 0x73b   : > { %v2173_v51 = vpop.xlane.xlu0 %2172 }
 0x73c   : > { %v2183_v9 = vmul.f32 0.00390625, %v2173_v51  ;;  %v2350_v51 = vld [vmem:[#allocation4 + $0x348] sm:$0xff] }
 0x73d   : > { %v2176_v14 = vpop.xlane.xlu1 %2175 }
 0x73e   : > { %v6493_v13 = vsub.f32 %v6464_v16, %v2183_v9  ;;  %v6496_v15 = vsub.f32 %v6466_v34, %v2183_v9  ;;  %v2184_v17 = vmul.f32 0.00390625, %v2176_v14  ;;  %v2352_v9 = vld [vmem:[#allocation4 + $0x368] sm:$0xff] }
 0x73f   : > { %v4890_v14 = vcombine.high %v2350_v51, %v2352_v9 }
 0x740   : > { %v6499_v5 = vsub.f32 %v6468_v44, %v2184_v17  ;;  %v6502_v48 = vsub.f32 %v6470_v18, %v2184_v17  ;;  %v2195_v19 = vmul.f32 %v6493_v13, %v6493_v13  ;;  %v2196_v54 = vmul.f32 %v6496_v15, %v6496_v15  ;;  %v2349_v17 = vld [vmem:[#allocation4 + $0x340] sm:$0xff] }
 0x741   : > { %2782 = vmatprep.subr.bf16.mxu1 %v4890_v14 }
 0x742   : > { %v2203_v20 = vadd.f32 %v2196_v54, %v2195_v19  ;;  %v2197_v53 = vmul.f32 %v6499_v5, %v6499_v5  ;;  %v2198_v21 = vmul.f32 %v6502_v48, %v6502_v48  ;;  %v2351_v19 = vld [vmem:[#allocation4 + $0x360] sm:$0xff]  ;;  %v4889_v54 = vcombine.low %v2350_v51, %v2352_v9 }
 0x743   : > { %v2179_v22 = vpop.xlane.xlu0 %2178 }
 0x744   : > { %v2185_v23 = vmul.f32 0.00390625, %v2179_v22  ;;  %2204 = vadd.xlane.f32.xlu0 %v2203_v20  ;;  %v2206_v24 = vadd.f32 %v2198_v21, %v2197_v53  ;;  %v4888_v20 = vcombine.high %v2349_v17, %v2351_v19  ;;  %v4887_v53 = vcombine.low %v2349_v17, %v2351_v19  ;;  %2783 = vmatpush1.bf16.msra.mxu1 %v4889_v54  ;;  %v2354_v21 = vld [vmem:[#allocation4 + $0x388] sm:$0xff] }
 0x745   : > { %v2182_v25 = vpop.xlane.xlu1 %2181  ;;  %v2356_v22 = vld [vmem:[#allocation4 + $0x3a8] sm:$0xff]  ;;  %v2262_v19 = vrot.slane %v2170_v12, %v6237_v59  ;;  %v2258_v54 = vrot.slane %v2170_v12, %v6240_v60 }
 0x746   : > { %v6513_v26 = vsub.f32 %v6480_v27, %v2185_v23  ;;  %v6516_v2 = vsub.f32 %v6482_v56, %v2185_v23  ;;  %v2186_v1 = vmul.f32 0.00390625, %v2182_v25  ;;  %2207 = vadd.xlane.f32.xlu1 %v2206_v24  ;;  %2729 = vmatprep.subr.bf16.mxu0 %v4888_v20  ;;  %v4894_v23 = vcombine.high %v2354_v21, %v2356_v22  ;;  %v2353_v24 = vld [vmem:[#allocation4 + $0x380] sm:$0xff] }
 0x747   : > { %2730 = vmatpush1.bf16.msra.mxu0 %v4887_v53  ;;  %v2355_v25 = vld [vmem:[#allocation4 + $0x3a0] sm:$0xff] }
 0x748   : > { %v6519_v28 = vsub.f32 %v6484_v29, %v2186_v1  ;;  %v6522_v30 = vsub.f32 %v6486_v7, %v2186_v1  ;;  %v2199_v4 = vmul.f32 %v6513_v26, %v6513_v26  ;;  %v2200_v55 = vmul.f32 %v6516_v2, %v6516_v2  ;;  %2784 = vmatprep.subr.bf16.mxu1 %v4894_v23 }
 0x749   : > { %v4893_v1 = vcombine.low %v2354_v21, %v2356_v22 }
 0x74a   : > { %v2209_v32 = vadd.f32 %v2200_v55, %v2199_v4  ;;  %v2201_v33 = vmul.f32 %v6519_v28, %v6519_v28  ;;  %v2202_v35 = vmul.f32 %v6522_v30, %v6522_v30  ;;  %v4892_v4 = vcombine.high %v2353_v24, %v2355_v25 }
 0x74b   : > { %v4891_v55 = vcombine.low %v2353_v24, %v2355_v25  ;;  %2785 = vmatpush1.bf16.msra.mxu1 %v4893_v1 }
 0x74c   : > { %2210 = vadd.xlane.f32.xlu0 %v2209_v32  ;;  %v2212_v36 = vadd.f32 %v2202_v35, %v2201_v33  ;;  %2731 = vmatprep.subr.bf16.mxu0 %v4892_v4  ;;  %v2358_v32 = vld [vmem:[#allocation4 + $0x3c8] sm:$0xff] }
 0x74d   : > { %v2360_v33 = vld [vmem:[#allocation4 + $0x3e8] sm:$0xff]  ;;  %2732 = vmatpush1.bf16.msra.mxu0 %v4891_v55 }
 0x74e   : > { %2213 = vadd.xlane.f32.xlu1 %v2212_v36  ;;  %v4898_v35 = vcombine.high %v2358_v32, %v2360_v33  ;;  %v2357_v36 = vld [vmem:[#allocation4 + $0x3c0] sm:$0xff]  ;;  %v4897_v38 = vcombine.low %v2358_v32, %v2360_v33  ;;  %v3449_v32 = vld [vmem:[#allocation4 + $0x70] sm:$0xff] }
 0x74f   : > { %v4896_v40 = vcombine.high %v2357_v36, %v2359_v37  ;;  %v4895_v41 = vcombine.low %v2357_v36, %v2359_v37 }
 0x750   : > { %2786 = vmatprep.subr.bf16.mxu1 %v4898_v35 }
 0x751   : > { %2733 = vmatprep.subr.bf16.mxu0 %v4896_v40  ;;  %2787 = vmatpush1.bf16.msra.mxu1 %v4897_v38 }
 0x752   : > { %2734 = vmatpush1.bf16.msra.mxu0 %v4895_v41  ;;  %3849 = vmatprep.subr.bf16.mxu1 %v4980_v45 }
 0x7d1   : > { %v2205_v52 = vpop.xlane.xlu0 %2204 }
 0x7d2   : > { %v2215_v57 = vmul.f32 0.00390625, %v2205_v52 }
 0x7d3   : > { %v2208_v58 = vpop.xlane.xlu1 %2207 }
 0x7d4   : > { %v2219_v61 = vadd.f32 1e-05, %v2215_v57  ;;  %v2216_v62 = vmul.f32 0.00390625, %v2208_v58 }
 0x7d6   : > { %5711 = vrsqrt.f32 %v2219_v61  ;;  %v2220_v63 = vadd.f32 1e-05, %v2216_v62  ;;  %v3455_v62 = vld [vmem:[#allocation4 + $0xd0] sm:$0xff] }
 0x7d8   : > { %5713 = vrsqrt.f32 %v2220_v63  ;;  %v3457_v63 = vld [vmem:[#allocation4 + $0xf0] sm:$0xff] }
 0x7d9   : > { %v2211_v0 = vpop.xlane.xlu0 %2210  ;;  %v4991_v12 = vcombine.low %v3455_v62, %v3457_v63 }
 0x7da   : > { %v2217_v3 = vmul.f32 0.00390625, %v2211_v0 }
 0x7db   : > { %v2214_v10 = vpop.xlane.xlu1 %2213 }
 0x7dc   : > { %v2221_v31 = vadd.f32 1e-05, %v2217_v3  ;;  %v2218_v39 = vmul.f32 0.00390625, %v2214_v10  ;;  %v4987_v3 = vcombine.low %v3451_v42, %v3453_v43 }
 0x7de   : > { %5715 = vrsqrt.f32 %v2221_v31  ;;  %v2222_v11 = vadd.f32 1e-05, %v2218_v39  ;;  %v4992_v31 = vcombine.high %v3455_v62, %v3457_v63  ;;  %v3461_v39 = vld [vmem:[#allocation4 + $0x130] sm:$0xff] }
 0x7e0   : > { %v5712_v51 = vpop.eup %5711  ;;  %5717 = vrsqrt.f32 %v2222_v11  ;;  %v5481_v11 = vld [vmem:[#allocation6 + $0x4] ss:$8 sps:$4 sm:$0xff]  }
 0x7e1   : > { %v2227_v9 = vmul.f32 %v5712_v51, %v6493_v13  ;;  %v2228_v14 = vmul.f32 %v5712_v51, %v6496_v15  ;;  %v3447_v13 = vld [vmem:[#allocation4 + $0x50] sm:$0xff]  ;;  %3329 = vmatprep.subr.bf16.mxu0 %v5481_v11 }
 0x7e2   : > { %v5714_v17 = vpop.eup %5713  ;;  %v4984_v37 = vcombine.high %v3447_v13, %v3449_v32  ;;  %v3463_v51 = vld [vmem:[#allocation4 + $0x150] sm:$0xff] }
 0x7e3   : > { %v2229_v20 = vmul.f32 %v5714_v17, %v6499_v5  ;;  %v2230_v53 = vmul.f32 %v5714_v17, %v6502_v48  ;;  %v2247_v21 = vmul.f32 %v2243_v6, %v2228_v14  ;;  %v2246_v22 = vmul.f32 %v2239_v8, %v2227_v9  ;;  %v3465_v9 = vld [vmem:[#allocation4 + $0x170] sm:$0xff]  ;;  %v5487_v17 = vld [vmem:[#allocation6 + $0x24] ss:$8 sps:$4 sm:$0xff]  }
 0x7e4   : > { %v5482_v14 = vld [vmem:[#allocation6 + $0x10] ss:$8 sps:$4 sm:$0xff]  }
 0x7e5   : > { %v2249_v23 = vmul.f32 %v2243_v6, %v2230_v53  ;;  %v2248_v24 = vmul.f32 %v2239_v8, %v2229_v20  ;;  %v2266_v25 = vadd.f32 %v2262_v19, %v2247_v21  ;;  %v2265_v4 = vadd.f32 %v2258_v54, %v2246_v22  ;;  %v3467_v20 = vld [vmem:[#allocation4 + $0x190] sm:$0xff]  ;;  %v5485_v21 = vld [vmem:[#allocation6 + $0x20] ss:$8 sps:$4 sm:$0xff]  }
 0x7e6   : > { %v3469_v53 = vld [vmem:[#allocation4 + $0x1b0] sm:$0xff] }
 0x7e7   : > { %v2268_v1 = vadd.f32 %v2262_v19, %v2249_v23  ;;  %v2267_v55 = vadd.f32 %v2258_v54, %v2248_v24  ;;  %v5490_v22 = vld [vmem:[#allocation6 + $0x34] ss:$8 sps:$4 sm:$0xff]   ;;  %v4999_v23 = vcombine.low %v3463_v51, %v3465_v9  ;;  %v5004_v24 = vcombine.high %v3467_v20, %v3469_v53 }
 0x7e8   : > { %v5716_v15 = vpop.eup %5715  ;;  %v3497_v11 = vld [vmem:[#allocation4 + $0x370] sm:$0xff] }
 0x7e9   : > { %v2231_v33 = vmul.f32 %v5716_v15, %v6513_v26  ;;  %v2232_v35 = vmul.f32 %v5716_v15, %v6516_v2  ;;  %v6548_v36 = vpack.c.bf16 %v2268_v1, %v2266_v25  ;;  %v6550_v5 = vpack.c.bf16 %v2267_v55, %v2265_v4  ;;  %v3471_v25 = vld [vmem:[#allocation4 + $0x1d0] sm:$0xff]  ;;  %v5493_v55 = vld [vmem:[#allocation6 + $0x44] ss:$8 sps:$4 sm:$0xff]  }
 0x7ea   : > { %v5718_v48 = vpop.eup %5717  ;;  %v4983_v2 = vcombine.low %v3447_v13, %v3449_v32  ;;  %v3473_v1 = vld [vmem:[#allocation4 + $0x1f0] sm:$0xff]  ;;  %v5003_v13 = vcombine.low %v3467_v20, %v3469_v53  ;;  %v3444_v53 = vld [vmem:[#allocation4 + $0x18] sm:$0xff] }
 0x7eb   : > { %v2233_v38 = vmul.f32 %v5718_v48, %v6519_v28  ;;  %v2234_v40 = vmul.f32 %v5718_v48, %v6522_v30  ;;  %2735 = vmatprep.mubr.bf16.mxu0 %v6548_v36  ;;  %2788 = vmatprep.mubr.bf16.mxu1 %v6548_v36  ;;  %v2251_v41 = vmul.f32 %v2243_v6, %v2232_v35  ;;  %v5488_v4 = vld [vmem:[#allocation6 + $0x30] ss:$8 sps:$4 sm:$0xff]   ;;  %v5491_v35 = vld [vmem:[#allocation6 + $0x40] ss:$8 sps:$4 sm:$0xff]   ;;  %v5496_v48 = vld [vmem:[#allocation6 + $0x54] ss:$8 sps:$4 sm:$0xff]  }
 0x7ec   : > { %2736 = vmatmul.mubr.bf16.vlgmr.msra.gmra.mrb[24].mxu0 %v6550_v5  ;;  %2789 = vmatmul.mubr.bf16.vlgmr.msra.gmra.mrb[40].mxu1 %v6550_v5  ;;  %v2250_v26 = vmul.f32 %v2239_v8, %v2231_v33  ;;  %v4988_v28 = vcombine.high %v3451_v42, %v3453_v43  ;;  %v5008_v32 = vcombine.high %v3471_v25, %v3473_v1  ;;  %v3475_v15 = vld [vmem:[#allocation4 + $0x210] sm:$0xff]  ;;  %v5499_v43 = vld [vmem:[#allocation6 + $0x64] ss:$8 sps:$4 sm:$0xff]  }
 0x7ed   : > { %3850 = vmatpush1.bf16.msra.mxu1 %v4979_v47  ;;  %v2253_v45 = vmul.f32 %v2243_v6, %v2234_v40  ;;  %v2252_v52 = vmul.f32 %v2239_v8, %v2233_v38  ;;  %v2270_v57 = vadd.f32 %v2262_v19, %v2251_v41  ;;  %v3459_v47 = vld [vmem:[#allocation4 + $0x110] sm:$0xff]  ;;  %3330 = vmatpush1.bf16.msra.mxu0 %v5479_v46 }
 0x7ee   : > { %3851 = vmatprep.subr.bf16.mxu1 %v4984_v37  ;;  %v2269_v58 = vadd.f32 %v2258_v54, %v2250_v26  ;;  %v5484_v6 = vld [vmem:[#allocation6 + $0x14] ss:$8 sps:$4 sm:$0xff]   ;;  %v4996_v8 = vcombine.high %v3459_v47, %v3461_v39  ;;  %v5007_v37 = vcombine.low %v3471_v25, %v3473_v1  ;;  %v5494_v42 = vld [vmem:[#allocation6 + $0x50] ss:$8 sps:$4 sm:$0xff]  }
 0x7ef   : > { %v2272_v30 = vadd.f32 %v2262_v19, %v2253_v45  ;;  %v2271_v61 = vadd.f32 %v2258_v54, %v2252_v52  ;;  %3331 = vmatprep.subr.bf16.mxu0 %v5484_v6  ;;  %v4995_v19 = vcombine.low %v3459_v47, %v3461_v39  ;;  %v5000_v54 = vcombine.high %v3463_v51, %v3465_v9  ;;  %v3477_v33 = vld [vmem:[#allocation4 + $0x230] sm:$0xff]  ;;  %v3450_v25 = vld [vmem:[#allocation4 + $0x78] sm:$0xff] }
 0x7f0   : > { %v5012_v38 = vcombine.high %v3475_v15, %v3477_v33  ;;  %v3479_v40 = vld [vmem:[#allocation4 + $0x250] sm:$0xff]  ;;  %v5011_v26 = vcombine.low %v3475_v15, %v3477_v33  ;;  %v3456_v33 = vld [vmem:[#allocation4 + $0xd8] sm:$0xff] }
 0x7f1   : > { %3852 = vmatpush1.bf16.msra.mxu1 %v4983_v2  ;;  %v6558_v0 = vpack.c.bf16 %v2272_v30, %v2270_v57  ;;  %v6560_v10 = vpack.c.bf16 %v2271_v61, %v2269_v58  ;;  %3332 = vmatpush1.bf16.msra.mxu0 %v5482_v14  ;;  %v3481_v41 = vld [vmem:[#allocation4 + $0x270] sm:$0xff] }
 0x7f2   : > { %3853 = vmatprep.subr.bf16.mxu1 %v4988_v28  ;;  %3333 = vmatprep.subr.bf16.mxu0 %v5487_v17  ;;  %v5016_v2 = vcombine.high %v3479_v40, %v3481_v41  ;;  %v3483_v45 = vld [vmem:[#allocation4 + $0x290] sm:$0xff]  ;;  %v5497_v28 = vld [vmem:[#allocation6 + $0x60] ss:$8 sps:$4 sm:$0xff]   ;;  %v5015_v57 = vcombine.low %v3479_v40, %v3481_v41  ;;  %v3462_v40 = vld [vmem:[#allocation4 + $0x138] sm:$0xff] }
 0x7f3   : > { %2745 = vmatprep.mubr.bf16.mxu0 %v6558_v0  ;;  %2798 = vmatprep.mubr.bf16.mxu1 %v6558_v0  ;;  %v3485_v52 = vld [vmem:[#allocation4 + $0x2b0] sm:$0xff] }
 0x7f4   : > { %2746 = vmatmul.mubr.bf16.gmra.mrb[28].mxu0 %v6560_v10  ;;  %2799 = vmatmul.mubr.bf16.gmra.mrb[44].mxu1 %v6560_v10  ;;  %v5020_v30 = vcombine.high %v3483_v45, %v3485_v52  ;;  %v3487_v58 = vld [vmem:[#allocation4 + $0x2d0] sm:$0xff]  ;;  %v5019_v62 = vcombine.low %v3483_v45, %v3485_v52  ;;  %v3468_v52 = vld [vmem:[#allocation4 + $0x198] sm:$0xff] }
 0x7f5   : > { %3854 = vmatpush1.bf16.msra.mxu1 %v4987_v3  ;;  %3881 = vmatprep.mubr.bf16.mxu1 %v6548_v36  ;;  %v3489_v61 = vld [vmem:[#allocation4 + $0x2f0] sm:$0xff] }
 0x7f6   : > { %3855 = vmatprep.subr.bf16.mxu1 %v4992_v31  ;;  %3334 = vmatpush1.bf16.msra.mxu0 %v5485_v21  ;;  %v5024_v63 = vcombine.high %v3487_v58, %v3489_v61  ;;  %v3491_v3 = vld [vmem:[#allocation4 + $0x310] sm:$0xff]  ;;  %v5023_v47 = vcombine.low %v3487_v58, %v3489_v61  ;;  %v3446_v21 = vld [vmem:[#allocation4 + $0x38] sm:$0xff] }
 0x7f7   : > { %3335 = vmatprep.subr.bf16.mxu0 %v5490_v22  ;;  %v3493_v31 = vld [vmem:[#allocation4 + $0x330] sm:$0xff]  ;;  %v4981_v1 = vcombine.low %v3444_v53, %v3446_v21  ;;  %v3472_v58 = vld [vmem:[#allocation4 + $0x1d8] sm:$0xff] }
 0x7f8   : > { %v5028_v39 = vcombine.high %v3491_v3, %v3493_v31  ;;  %v3495_v46 = vld [vmem:[#allocation4 + $0x350] sm:$0xff]  ;;  %v3474_v61 = vld [vmem:[#allocation4 + $0x1f8] sm:$0xff] }
 0x7f9   : > { %3856 = vmatpush1.bf16.msra.mxu1 %v4991_v12  ;;  %v5027_v12 = vcombine.low %v3491_v3, %v3493_v31  ;;  %v5032_v6 = vcombine.high %v3495_v46, %v3497_v11  ;;  %v3501_v51 = vld [vmem:[#allocation4 + $0x3b0] sm:$0xff]  ;;  %v5031_v9 = vcombine.low %v3495_v46, %v3497_v11  ;;  %v3476_v3 = vld [vmem:[#allocation4 + $0x218] sm:$0xff] }
 0x7fa   : > { %3857 = vmatprep.subr.bf16.mxu1 %v4996_v8  ;;  %3336 = vmatpush1.bf16.msra.mxu0 %v5488_v4  ;;  %v3499_v8 = vld [vmem:[#allocation4 + $0x390] sm:$0xff]  ;;  %v3478_v31 = vld [vmem:[#allocation4 + $0x238] sm:$0xff] }
 0x7fb   : > { %3337 = vmatprep.subr.bf16.mxu0 %v5493_v55  ;;  %v5036_v14 = vcombine.high %v3499_v8, %v3501_v51  ;;  %v3503_v17 = vld [vmem:[#allocation4 + $0x3d0] sm:$0xff]  ;;  %v3452_v55 = vld [vmem:[#allocation4 + $0x98] sm:$0xff]  ;;  %v5014_v46 = vcombine.high %v3476_v3, %v3478_v31 }
 0x7fc   : > { %v3480_v11 = vld [vmem:[#allocation4 + $0x258] sm:$0xff] }
 0x7fd   : > { %3858 = vmatpush1.bf16.msra.mxu1 %v4995_v19  ;;  %v3505_v19 = vld [vmem:[#allocation4 + $0x3f0] sm:$0xff] }
 0x7fe   : > { %3859 = vmatprep.subr.bf16.mxu1 %v5000_v54  ;;  %3338 = vmatpush1.bf16.msra.mxu0 %v5491_v35  ;;  %v5035_v54 = vcombine.low %v3499_v8, %v3501_v51  ;;  %v5040_v20 = vcombine.high %v3503_v17, %v3505_v19  ;;  %v5039_v22 = vcombine.low %v3503_v17, %v3505_v19  ;;  %v3458_v35 = vld [vmem:[#allocation4 + $0xf8] sm:$0xff]  ;;  %v5503_v8 = vld [vmem:[#allocation6 + $0x80] ss:$8 sps:$4 sm:$0xff]  }
 0x7ff   : > { %3339 = vmatprep.subr.bf16.mxu0 %v5496_v48  ;;  %v4993_v41 = vcombine.low %v3456_v33, %v3458_v35  ;;  %v5013_v51 = vcombine.low %v3476_v3, %v3478_v31  ;;  %v3486_v17 = vld [vmem:[#allocation4 + $0x2b8] sm:$0xff]  ;;  %v5529_v31 = vld [vmem:[#allocation6 + $0x104] ss:$8 sps:$4 sm:$0xff]  }
 0x800   : > { %v5524_v3 = vld [vmem:[#allocation6 + $0xf0] ss:$8 sps:$4 sm:$0xff]  }
 0x801   : > { %3860 = vmatpush1.bf16.msra.mxu1 %v4999_v23  ;;  %v4982_v23 = vcombine.high %v3444_v53, %v3446_v21  ;;  %v3490_v53 = vld [vmem:[#allocation4 + $0x2f8] sm:$0xff] }
 0x802   : > { %3861 = vmatprep.subr.bf16.mxu1 %v5004_v24  ;;  %3340 = vmatpush1.bf16.msra.mxu0 %v5494_v42  ;;  %v3448_v24 = vld [vmem:[#allocation4 + $0x58] sm:$0xff] }
 0x803   : > { %3341 = vmatprep.subr.bf16.mxu0 %v5499_v43  ;;  %v4986_v4 = vcombine.high %v3448_v24, %v3450_v25  ;;  %v3464_v43 = vld [vmem:[#allocation4 + $0x158] sm:$0xff] }
 0x805   : > { %3862 = vmatpush1.bf16.msra.mxu1 %v5003_v13  ;;  %v3454_v13 = vld [vmem:[#allocation4 + $0xb8] sm:$0xff] }
 0x806   : > { %3863 = vmatprep.subr.bf16.mxu1 %v5008_v32  ;;  %3342 = vmatpush1.bf16.msra.mxu0 %v5497_v28  ;;  %v4985_v32 = vcombine.low %v3448_v24, %v3450_v25  ;;  %v4990_v15 = vcombine.high %v3452_v55, %v3454_v13  ;;  %v4989_v48 = vcombine.low %v3452_v55, %v3454_v13  ;;  %v3470_v28 = vld [vmem:[#allocation4 + $0x1b8] sm:$0xff] }
 0x807   : > { %v3494_v24 = vld [vmem:[#allocation4 + $0x338] sm:$0xff] }
 0x808   : > { %v3498_v55 = vld [vmem:[#allocation4 + $0x378] sm:$0xff] }
 0x809   : > { %3864 = vmatpush1.bf16.msra.mxu1 %v5007_v37  ;;  %v4994_v37 = vcombine.high %v3456_v33, %v3458_v35  ;;  %v5508_v13 = vld [vmem:[#allocation6 + $0x94] ss:$8 sps:$4 sm:$0xff]  }
 0x80a   : > { %3865 = vmatprep.subr.bf16.mxu1 %v5012_v38  ;;  %v3460_v38 = vld [vmem:[#allocation4 + $0x118] sm:$0xff] }
 0x80b   : > { %v4998_v42 = vcombine.high %v3460_v38, %v3462_v40  ;;  %v3500_v35 = vld [vmem:[#allocation4 + $0x398] sm:$0xff] }
 0x80d   : > { %3866 = vmatpush1.bf16.msra.mxu1 %v5011_v26  ;;  %v3466_v26 = vld [vmem:[#allocation4 + $0x178] sm:$0xff] }
 0x80e   : > { %3867 = vmatprep.subr.bf16.mxu1 %v5016_v2  ;;  %v4997_v2 = vcombine.low %v3460_v38, %v3462_v40  ;;  %v5002_v45 = vcombine.high %v3464_v43, %v3466_v26  ;;  %v5509_v40 = vld [vmem:[#allocation6 + $0xa0] ss:$8 sps:$4 sm:$0xff]  }
 0x811   : > { %3868 = vmatpush1.bf16.msra.mxu1 %v5015_v57  ;;  %v5001_v57 = vcombine.low %v3464_v43, %v3466_v26  ;;  %v3506_v43 = vld [vmem:[#allocation4 + $0x3f8] sm:$0xff] }
 0x812   : > { %3869 = vmatprep.subr.bf16.mxu1 %v5020_v30  ;;  %v5006_v30 = vcombine.high %v3468_v52, %v3470_v28  ;;  %v5514_v26 = vld [vmem:[#allocation6 + $0xb4] ss:$8 sps:$4 sm:$0xff]  }
 0x815   : > { %3870 = vmatpush1.bf16.msra.mxu1 %v5019_v62  ;;  %v5005_v62 = vcombine.low %v3468_v52, %v3470_v28  ;;  %v5517_v28 = vld [vmem:[#allocation6 + $0xc4] ss:$8 sps:$4 sm:$0xff]  }
 0x816   : > { %3871 = vmatprep.subr.bf16.mxu1 %v5024_v63  ;;  %v5502_v63 = vld [vmem:[#allocation6 + $0x74] ss:$8 sps:$4 sm:$0xff]  }
 0x817   : > { %3343 = vmatprep.subr.bf16.mxu0 %v5502_v63  ;;  %v5526_v63 = vld [vmem:[#allocation6 + $0xf4] ss:$8 sps:$4 sm:$0xff]  }
 0x819   : > { %3872 = vmatpush1.bf16.msra.mxu1 %v5023_v47  ;;  %v5500_v47 = vld [vmem:[#allocation6 + $0x70] ss:$8 sps:$4 sm:$0xff]  }
 0x81a   : > { %3873 = vmatprep.subr.bf16.mxu1 %v5028_v39  ;;  %v5009_v39 = vcombine.low %v3472_v58, %v3474_v61  ;;  %3344 = vmatpush1.bf16.msra.mxu0 %v5500_v47  ;;  %v2361_v47 = vld [vmem:[%s6865_s10] sm:$0xf] }
 0x81d   : > { %3874 = vmatpush1.bf16.msra.mxu1 %v5027_v12  ;;  %v3482_v12 = vld [vmem:[#allocation4 + $0x278] sm:$0xff] }
 0x81e   : > { %3875 = vmatprep.subr.bf16.mxu1 %v5032_v6  ;;  %v5505_v6 = vld [vmem:[#allocation6 + $0x84] ss:$8 sps:$4 sm:$0xff]   ;;  %v5017_v19 = vcombine.low %v3480_v11, %v3482_v12 }
 0x81f   : > { %3345 = vmatprep.subr.bf16.mxu0 %v5505_v6 }
 0x820   : > { %3346 = vmatpush1.bf16.msra.mxu0 %v5503_v8 }
 0x821   : > { %3876 = vmatpush1.bf16.msra.mxu1 %v5031_v9  ;;  %v5018_v9 = vcombine.high %v3480_v11, %v3482_v12  ;;  %3347 = vmatprep.subr.bf16.mxu0 %v5508_v13 }
 0x822   : > { %3877 = vmatprep.subr.bf16.mxu1 %v5036_v14  ;;  %v3484_v14 = vld [vmem:[#allocation4 + $0x298] sm:$0xff] }
 0x823   : > { %v5021_v21 = vcombine.low %v3484_v14, %v3486_v17 }
 0x825   : > { %3878 = vmatpush1.bf16.msra.mxu1 %v5035_v54  ;;  %v5022_v54 = vcombine.high %v3484_v14, %v3486_v17 }
 0x826   : > { %3879 = vmatprep.subr.bf16.mxu1 %v5040_v20  ;;  %v3488_v20 = vld [vmem:[#allocation4 + $0x2d8] sm:$0xff] }
 0x827   : > { %v5025_v25 = vcombine.low %v3488_v20, %v3490_v53 }
 0x829   : > { %3880 = vmatpush1.bf16.msra.mxu1 %v5039_v22  ;;  %v5026_v22 = vcombine.high %v3488_v20, %v3490_v53 }
 0x82a   : > { %3902 = vmatprep.subr.bf16.mxu1 %v4982_v23  ;;  %v3492_v23 = vld [vmem:[#allocation4 + $0x318] sm:$0xff] }
 0x82c   : > { %3882 = vmatmul.mubr.bf16.vlgmr.msra.gmra.mrb[48].mxu1 %v6550_v5 }
 0x82d   : > { %3891 = vmatprep.mubr.bf16.mxu1 %v6558_v0  ;;  %3903 = vmatpush1.bf16.msra.mxu1 %v4981_v1  ;;  %v5030_v1 = vcombine.high %v3492_v23, %v3494_v24 }
 0x82e   : > { %3904 = vmatprep.subr.bf16.mxu1 %v4986_v4  ;;  %v3496_v4 = vld [vmem:[#allocation4 + $0x358] sm:$0xff] }
 0x82f   : > { %v5034_v33 = vcombine.high %v3496_v4, %v3498_v55  ;;  %v5033_v38 = vcombine.low %v3496_v4, %v3498_v55 }
 0x831   : > { %3905 = vmatpush1.bf16.msra.mxu1 %v4985_v32  ;;  %v5506_v32 = vld [vmem:[#allocation6 + $0x90] ss:$8 sps:$4 sm:$0xff]  }
 0x832   : > { %3906 = vmatprep.subr.bf16.mxu1 %v4990_v15  ;;  %v5029_v15 = vcombine.low %v3492_v23, %v3494_v24  ;;  %3348 = vmatpush1.bf16.msra.mxu0 %v5506_v32 }
 0x834   : > { %3892 = vmatmul.mubr.bf16.gmra.mrb[52].mxu1 %v6560_v10 }
 0x835   : > { %3907 = vmatpush1.bf16.msra.mxu1 %v4989_v48  ;;  %3934 = vmatprep.mubr.bf16.mxu1 %v6548_v36  ;;  %v5010_v36 = vcombine.high %v3472_v58, %v3474_v61  ;;  %v3502_v48 = vld [vmem:[#allocation4 + $0x3b8] sm:$0xff] }
 0x836   : > { %3908 = vmatprep.subr.bf16.mxu1 %v4994_v37  ;;  %v5511_v37 = vld [vmem:[#allocation6 + $0xa4] ss:$8 sps:$4 sm:$0xff]   ;;  %v5520_v58 = vld [vmem:[#allocation6 + $0xd4] ss:$8 sps:$4 sm:$0xff]   ;;  %v5518_v61 = vld [vmem:[#allocation6 + $0xd0] ss:$8 sps:$4 sm:$0xff]  }
 0x837   : > { %3349 = vmatprep.subr.bf16.mxu0 %v5511_v37 }
 0x838   : > { %3350 = vmatpush1.bf16.msra.mxu0 %v5509_v40 }
 0x839   : > { %3909 = vmatpush1.bf16.msra.mxu1 %v4993_v41  ;;  %v5038_v41 = vcombine.high %v3500_v35, %v3502_v48  ;;  %3351 = vmatprep.subr.bf16.mxu0 %v5514_v26 }
 0x83a   : > { %3910 = vmatprep.subr.bf16.mxu1 %v4998_v42  ;;  %v3504_v42 = vld [vmem:[#allocation4 + $0x3d8] sm:$0xff] }
 0x83b   : > { %v5042_v52 = vcombine.high %v3504_v42, %v3506_v43 }
 0x83d   : > { %3911 = vmatpush1.bf16.msra.mxu1 %v4997_v2  ;;  %v5037_v2 = vcombine.low %v3500_v35, %v3502_v48 }
 0x83e   : > { %3912 = vmatprep.subr.bf16.mxu1 %v5002_v45  ;;  %v5512_v45 = vld [vmem:[#allocation6 + $0xb0] ss:$8 sps:$4 sm:$0xff]  }
 0x83f   : > { %3352 = vmatpush1.bf16.msra.mxu0 %v5512_v45 }
 0x840   : > { %3353 = vmatprep.subr.bf16.mxu0 %v5517_v28 }
 0x841   : > { %3913 = vmatpush1.bf16.msra.mxu1 %v5001_v57  ;;  %v5041_v57 = vcombine.low %v3504_v42, %v3506_v43 }
 0x842   : > { %3914 = vmatprep.subr.bf16.mxu1 %v5006_v30  ;;  %v5515_v30 = vld [vmem:[#allocation6 + $0xc0] ss:$8 sps:$4 sm:$0xff]  }
 0x843   : > { %3354 = vmatpush1.bf16.msra.mxu0 %v5515_v30 }
 0x844   : > { %3355 = vmatprep.subr.bf16.mxu0 %v5520_v58 }
 0x845   : > { %3915 = vmatpush1.bf16.msra.mxu1 %v5005_v62  ;;  %v5523_v62 = vld [vmem:[#allocation6 + $0xe4] ss:$8 sps:$4 sm:$0xff]  }
 0x846   : > { %3916 = vmatprep.subr.bf16.mxu1 %v5010_v36  ;;  %v5521_v36 = vld [vmem:[#allocation6 + $0xe0] ss:$8 sps:$4 sm:$0xff]  }
 0x847   : > { %3356 = vmatpush1.bf16.msra.mxu0 %v5518_v61 }
 0x848   : > { %3357 = vmatprep.subr.bf16.mxu0 %v5523_v62 }
 0x849   : > { %3917 = vmatpush1.bf16.msra.mxu1 %v5009_v39  ;;  %v6579_v39 = vrot.slane %v2361_v47, %v6308_v49 }
 0x84a   : > { %3918 = vmatprep.subr.bf16.mxu1 %v5014_v46  ;;  %v6585_v46 = vrot.slane %v2361_v47, %v6311_v50 }
 0x84b   : > { %3358 = vmatpush1.bf16.msra.mxu0 %v5521_v36 }
 0x84c   : > { %3359 = vmatprep.subr.bf16.mxu0 %v5526_v63 }
 0x84d   : > { %3919 = vmatpush1.bf16.msra.mxu1 %v5013_v51 }
 0x84e   : > { %3920 = vmatprep.subr.bf16.mxu1 %v5018_v9 }
 0x84f   : > { %3360 = vmatpush1.bf16.msra.mxu0 %v5524_v3 }
 0x850   : > { %3382 = vmatprep.subr.bf16.mxu0 %v5529_v31 }
 0x851   : > { %3921 = vmatpush1.bf16.msra.mxu1 %v5017_v19 }
 0x852   : > { %3922 = vmatprep.subr.bf16.mxu1 %v5022_v54 }
 0x855   : > { %3923 = vmatpush1.bf16.msra.mxu1 %v5021_v21 }
 0x856   : > { %3924 = vmatprep.subr.bf16.mxu1 %v5026_v22 }
 0x859   : > { %3925 = vmatpush1.bf16.msra.mxu1 %v5025_v25 }
 0x85a   : > { %3926 = vmatprep.subr.bf16.mxu1 %v5030_v1 }
 0x85d   : > { %3927 = vmatpush1.bf16.msra.mxu1 %v5029_v15 }
 0x85e   : > { %3928 = vmatprep.subr.bf16.mxu1 %v5034_v33 }
 0x861   : > { %3929 = vmatpush1.bf16.msra.mxu1 %v5033_v38 }
 0x862   : > { %3930 = vmatprep.subr.bf16.mxu1 %v5038_v41 }
 0x865   : > { %3931 = vmatpush1.bf16.msra.mxu1 %v5037_v2 }
 0x866   : > { %3932 = vmatprep.subr.bf16.mxu1 %v5042_v52 }
 0x869   : > { %3933 = vmatpush1.bf16.msra.mxu1 %v5041_v57 }
 0x86c   : > { %3935 = vmatmul.mubr.bf16.vlgmr.msra.gmra.mrb[56].mxu1 %v6550_v5  ;;  %v2366_v5 = vrot.slane %v2361_v47, %v6240_v60 }
 0x86d   : > { %3944 = vmatprep.mubr.bf16.mxu1 %v6558_v0  ;;  %v6582_v0 = vrot.slane %v2361_v47, %v6237_v59 }
 0x874   : > { %3945 = vmatmul.mubr.bf16.gmra.mrb[60].mxu1 %v6560_v10 }
 0x8bf   : > { %v2737_v11 = vpop.f32.mrb[24].mxu0  ;;  %v2790_v12 = vpop.f32.mrb[40].mxu1 }
 0x8c0   : > { %v6587_v10 = vadd.f32 %v2737_v11, %v2366_v5  ;;  %v6590_v6 = vadd.f32 %v2790_v12, %v6579_v39  ;;  %v2739_v8 = vpop.f32.mrb[25].mxu0  ;;  %v2792_v51 = vpop.f32.mrb[41].mxu1 }
 0x8c1   : > { %v6593_v9 = vadd.f32 %v2739_v8, %v6582_v0  ;;  %v6596_v14 = vadd.f32 %v2792_v51, %v6585_v46  ;;  %v2741_v17 = vpop.f32.mrb[26].mxu0  ;;  %v2794_v19 = vpop.f32.mrb[42].mxu1 }
 0x8c2   : > { %v4899_v54 = vmul.f32 -1.702, %v6587_v10  ;;  %v4901_v20 = vmul.f32 -1.702, %v6590_v6  ;;  %v6600_v53 = vadd.f32 %v2741_v17, %v2366_v5  ;;  %v6603_v21 = vadd.f32 %v2794_v19, %v6579_v39  ;;  %v2743_v22 = vpop.f32.mrb[27].mxu0  ;;  %v2796_v23 = vpop.f32.mrb[43].mxu1 }
 0x8c3   : > { %v4900_v24 = vmul.f32 -1.702, %v6593_v9  ;;  %v4902_v25 = vmul.f32 -1.702, %v6596_v14  ;;  %v6608_v1 = vadd.f32 %v2743_v22, %v6582_v0  ;;  %v6611_v4 = vadd.f32 %v2796_v23, %v6585_v46 }
 0x8c4   : > { %v2841_v55 = vmul.f32 1.442695, %v4899_v54  ;;  %v2845_v13 = vmul.f32 1.442695, %v4901_v20  ;;  %v4903_v32 = vmul.f32 -1.702, %v6600_v53 }
 0x8c5   : > { %v2843_v15 = vmul.f32 1.442695, %v4900_v24  ;;  %v2847_v33 = vmul.f32 1.442695, %v4902_v25  ;;  %v4905_v35 = vmul.f32 -1.702, %v6603_v21 }
 0x8c6   : > { %5719 = vpow2.f32 %v2841_v55  ;;  %v2849_v48 = vmul.f32 1.442695, %v4903_v32  ;;  %v4904_v37 = vmul.f32 -1.702, %v6608_v1  ;;  %v4906_v38 = vmul.f32 -1.702, %v6611_v4 }
 0x8c7   : > { %5721 = vpow2.f32 %v2845_v13  ;;  %v2853_v40 = vmul.f32 1.442695, %v4905_v35  ;;  %v2747_v41 = vpop.f32.mrb[28].mxu0  ;;  %v2800_v42 = vpop.f32.mrb[44].mxu1 }
 0x8c8   : > { %5723 = vpow2.f32 %v2843_v15  ;;  %v2851_v43 = vmul.f32 1.442695, %v4904_v37  ;;  %v6617_v26 = vadd.f32 %v2747_v41, %v2366_v5  ;;  %v2749_v2 = vpop.f32.mrb[29].mxu0  ;;  %v2802_v45 = vpop.f32.mrb[45].mxu1  ;;  %v2855_v52 = vmul.f32 1.442695, %v4906_v38 }
 0x8c9   : > { %5725 = vpow2.f32 %v2847_v33  ;;  %v6620_v28 = vadd.f32 %v2800_v42, %v6579_v39  ;;  %v6623_v57 = vadd.f32 %v2749_v2, %v6582_v0  ;;  %v2751_v30 = vpop.f32.mrb[30].mxu0  ;;  %v2804_v58 = vpop.f32.mrb[46].mxu1  ;;  %v6632_v17 = vadd.f32 %v2802_v45, %v6585_v46 }
 0x8ca   : > { %5727 = vpow2.f32 %v2849_v48  ;;  %v4907_v61 = vmul.f32 -1.702, %v6617_v26  ;;  %v6626_v62 = vadd.f32 %v2751_v30, %v2366_v5  ;;  %v2753_v36 = vpop.f32.mrb[31].mxu0  ;;  %v2806_v63 = vpop.f32.mrb[47].mxu1  ;;  %v6636_v32 = vadd.f32 %v2804_v58, %v6579_v39 }
 0x8cb   : > { %5729 = vpow2.f32 %v2853_v40  ;;  %v4909_v3 = vmul.f32 -1.702, %v6620_v28  ;;  %v4908_v31 = vmul.f32 -1.702, %v6623_v57  ;;  %v4910_v25 = vmul.f32 -1.702, %v6632_v17 }
 0x8cc   : > { %5731 = vpow2.f32 %v2851_v43  ;;  %v2857_v47 = vmul.f32 1.442695, %v4907_v61  ;;  %v4911_v11 = vmul.f32 -1.702, %v6626_v62  ;;  %v6639_v35 = vadd.f32 %v2753_v36, %v6582_v0 }
 0x8cd   : > { %5733 = vpow2.f32 %v2855_v52  ;;  %v2861_v12 = vmul.f32 1.442695, %v4909_v3  ;;  %v2859_v8 = vmul.f32 1.442695, %v4908_v31  ;;  %v6642_v38 = vadd.f32 %v2806_v63, %v6585_v46 }
 0x8ce   : > { %5735 = vpow2.f32 %v2857_v47  ;;  %v2865_v51 = vmul.f32 1.442695, %v4911_v11  ;;  %v2863_v42 = vmul.f32 1.442695, %v4910_v25  ;;  %v4913_v2 = vmul.f32 -1.702, %v6636_v32 }
 0x8cf   : > { %5737 = vpow2.f32 %v2861_v12  ;;  %v4912_v0 = vmul.f32 -1.702, %v6639_v35  ;;  %v4914_v30 = vmul.f32 -1.702, %v6642_v38 }
 0x8d0   : > { %v5720_v5 = vpop.eup %5719  ;;  %5739 = vpow2.f32 %v2859_v8  ;;  %v2869_v61 = vmul.f32 1.442695, %v4913_v2 }
 0x8d1   : > { %v5722_v19 = vpop.eup %5721  ;;  %v2873_v54 = vadd.f32 1.0, %v5720_v5  ;;  %5741 = vpow2.f32 %v2865_v51  ;;  %v2867_v3 = vmul.f32 1.442695, %v4912_v0  ;;  %v2871_v47 = vmul.f32 1.442695, %v4914_v30 }
 0x8d2   : > { %v5724_v20 = vpop.eup %5723  ;;  %v2875_v22 = vadd.f32 1.0, %v5722_v19 }
 0x8d3   : > { %v5726_v23 = vpop.eup %5725  ;;  %5743 = vrcp.f32 %v2873_v54  ;;  %v2874_v24 = vadd.f32 1.0, %v5724_v20 }
 0x8d4   : > { %v5728_v55 = vpop.eup %5727  ;;  %5745 = vrcp.f32 %v2875_v22  ;;  %v2876_v13 = vadd.f32 1.0, %v5726_v23 }
 0x8d5   : > { %v5730_v15 = vpop.eup %5729  ;;  %5747 = vrcp.f32 %v2874_v24  ;;  %v2877_v33 = vadd.f32 1.0, %v5728_v55 }
 0x8d6   : > { %v5732_v48 = vpop.eup %5731  ;;  %5749 = vrcp.f32 %v2876_v13  ;;  %v2879_v37 = vadd.f32 1.0, %v5730_v15 }
 0x8d7   : > { %v5734_v40 = vpop.eup %5733  ;;  %5751 = vrcp.f32 %v2877_v33  ;;  %v2878_v41 = vadd.f32 1.0, %v5732_v48 }
 0x8d8   : > { %v5736_v43 = vpop.eup %5735  ;;  %5753 = vrcp.f32 %v2879_v37  ;;  %v2880_v39 = vadd.f32 1.0, %v5734_v40  ;;  %v5532_v40 = vld [vmem:[#allocation6 + $0x114] ss:$8 sps:$4 sm:$0xff]  }
 0x8d9   : > { %5755 = vrcp.f32 %v2878_v41  ;;  %v2881_v45 = vadd.f32 1.0, %v5736_v43  ;;  %v5738_v52 = vpop.eup %5737  ;;  %v5530_v43 = vld [vmem:[#allocation6 + $0x110] ss:$8 sps:$4 sm:$0xff]  }
 0x8da   : > { %5757 = vrcp.f32 %v2880_v39  ;;  %v5740_v58 = vpop.eup %5739 }
 0x8db   : > { %5759 = vpow2.f32 %v2863_v42  ;;  %v5742_v46 = vpop.eup %5741  ;;  %v2882_v37 = vadd.f32 1.0, %v5740_v58 }
 0x8dc   : > { %5761 = vrcp.f32 %v2881_v45  ;;  %v2885_v63 = vadd.f32 1.0, %v5742_v46  ;;  %v5535_v45 = vld [vmem:[#allocation6 + $0x124] ss:$8 sps:$4 sm:$0xff]   ;;  %v5533_v46 = vld [vmem:[#allocation6 + $0x120] ss:$8 sps:$4 sm:$0xff]  }
 0x8dd   : > { %v5744_v36 = vpop.eup %5743 }
 0x8de   : > { %v5746_v31 = vpop.eup %5745  ;;  %5763 = vrcp.f32 %v2885_v63  ;;  %v2921_v5 = vmul.f32 %v5744_v36, %v6587_v10 }
 0x8df   : > { %v5748_v11 = vpop.eup %5747  ;;  %5765 = vpow2.f32 %v2869_v61  ;;  %v6650_v20 = vmul.f32 %v5746_v31, %v6590_v6  ;;  %v2883_v6 = vadd.f32 1.0, %v5738_v52  ;;  %v5541_v61 = vld [vmem:[#allocation6 + $0x144] ss:$8 sps:$4 sm:$0xff]   ;;  %v5539_v31 = vld [vmem:[#allocation6 + $0x140] ss:$8 sps:$4 sm:$0xff]  }
 0x8e0   : > { %v5750_v12 = vpop.eup %5749  ;;  %5767 = vpow2.f32 %v2867_v3  ;;  %v2922_v24 = vmul.f32 %v5748_v11, %v6593_v9  ;;  %v5544_v11 = vld [vmem:[#allocation6 + $0x154] ss:$8 sps:$4 sm:$0xff]  }
 0x8e1   : > { %v5752_v8 = vpop.eup %5751  ;;  %5769 = vpow2.f32 %v2871_v47  ;;  %v6658_v15 = vmul.f32 %v5750_v12, %v6596_v14 }
 0x8e2   : > { %v5754_v51 = vpop.eup %5753  ;;  %v2925_v19 = vmul.f32 %v5752_v8, %v6600_v53  ;;  %5771 = vrcp.f32 %v2883_v6 }
 0x8e3   : > { %v5756_v54 = vpop.eup %5755  ;;  %v6653_v22 = vmul.f32 %v5754_v51, %v6603_v21  ;;  %v5527_v21 = vld [vmem:[#allocation6 + $0x100] ss:$8 sps:$4 sm:$0xff]   ;;  %5773 = vrcp.f32 %v2882_v37 }
 0x8e4   : > { %v5758_v23 = vpop.eup %5757  ;;  %v2937_v25 = vpack.c.bf16 %v2925_v19, %v2921_v5  ;;  %v2926_v55 = vmul.f32 %v5756_v54, %v6608_v1 }
 0x8e5   : > { %v5760_v13 = vpop.eup %5759  ;;  %v2939_v10 = vpack.c.bf16 %v6653_v22, %v6650_v20  ;;  %v6663_v53 = vmul.f32 %v5758_v23, %v6611_v4  ;;  %v6680_v23 = vld [vmem:[%s6865_s10 + $0x4] sm:$0xf]  ;;  %v5584_v20 = vld [vmem:[#allocation6 + $0x230] ss:$8 sps:$4 sm:$0xff]  }
 0x8e6   : > { %v2938_v33 = vpack.c.bf16 %v2926_v55, %v2922_v24  ;;  %v5762_v48 = vpop.eup %5761  ;;  %v2884_v1 = vadd.f32 1.0, %v5760_v13  ;;  %v5542_v55 = vld [vmem:[#allocation6 + $0x150] ss:$8 sps:$4 sm:$0xff]   ;;  %v5589_v22 = vld [vmem:[#allocation6 + $0x244] ss:$8 sps:$4 sm:$0xff]  }
 0x8e7   : > { %v2940_v9 = vpack.c.bf16 %v6663_v53, %v6658_v15  ;;  %v2929_v42 = vmul.f32 %v5762_v48, %v6617_v26  ;;  %v5538_v26 = vld [vmem:[#allocation6 + $0x134] ss:$8 sps:$4 sm:$0xff]  }
 0x8e8   : > { %3361 = vmatprep.mubr.bf16.mxu0 %v2938_v33  ;;  %v5764_v41 = vpop.eup %5763  ;;  %5775 = vrcp.f32 %v2884_v1  ;;  %v5550_v33 = vld [vmem:[#allocation6 + $0x174] ss:$8 sps:$4 sm:$0xff]  }
 0x8e9   : > { %3362 = vmatmul.mubr.bf16.vlgmr.msra.gmra.mrb[32].mxu0 %v2937_v25  ;;  %v5766_v14 = vpop.eup %5765  ;;  %v2933_v4 = vmul.f32 %v5764_v41, %v6626_v62  ;;  %v5536_v62 = vld [vmem:[#allocation6 + $0x130] ss:$8 sps:$4 sm:$0xff]  }
 0x8ea   : > { %3383 = vmatpush1.bf16.msra.mxu0 %v5527_v21  ;;  %v5768_v39 = vpop.eup %5767  ;;  %v2887_v2 = vadd.f32 1.0, %v5766_v14 }
 0x8eb   : > { %3384 = vmatprep.subr.bf16.mxu0 %v5532_v40  ;;  %v5770_v0 = vpop.eup %5769  ;;  %v2886_v52 = vadd.f32 1.0, %v5768_v39  ;;  %v2941_v30 = vpack.c.bf16 %v2933_v4, %v2929_v42 }
 0x8ec   : > { %5777 = vrcp.f32 %v2887_v2  ;;  %v2888_v58 = vadd.f32 1.0, %v5770_v0  ;;  %v5772_v36 = vpop.eup %5771 }
 0x8ed   : > { %5779 = vrcp.f32 %v2886_v52  ;;  %v5774_v63 = vpop.eup %5773  ;;  %v6670_v8 = vmul.f32 %v5772_v36, %v6620_v28  ;;  %v5551_v52 = vld [vmem:[#allocation6 + $0x180] ss:$8 sps:$4 sm:$0xff]  }
 0x8ee   : > { %3385 = vmatpush1.bf16.msra.mxu0 %v5530_v43  ;;  %5781 = vrcp.f32 %v2888_v58  ;;  %v2930_v19 = vmul.f32 %v5774_v63, %v6623_v57  ;;  %v5547_v57 = vld [vmem:[#allocation6 + $0x164] ss:$8 sps:$4 sm:$0xff]  }
 0x8ef   : > { %3386 = vmatprep.subr.bf16.mxu0 %v5535_v45  ;;  %v5553_v43 = vld [vmem:[#allocation6 + $0x184] ss:$8 sps:$4 sm:$0xff]  }
 0x8f2   : > { %3387 = vmatpush1.bf16.msra.mxu0 %v5533_v46  ;;  %v5776_v3 = vpop.eup %5775 }
 0x8f3   : > { %3388 = vmatprep.subr.bf16.mxu0 %v5538_v26  ;;  %v6683_v24 = vmul.f32 %v5776_v3, %v6632_v17  ;;  %v3516_v17 = vrot.slane %v6680_v23, %v6237_v59  ;;  %v5556_v26 = vld [vmem:[#allocation6 + $0x194] ss:$8 sps:$4 sm:$0xff]  }
 0x8f6   : > { %3389 = vmatpush1.bf16.msra.mxu0 %v5536_v62  ;;  %v5778_v47 = vpop.eup %5777 }
 0x8f7   : > { %3390 = vmatprep.subr.bf16.mxu0 %v5541_v61  ;;  %v5780_v12 = vpop.eup %5779  ;;  %v6673_v51 = vmul.f32 %v5778_v47, %v6636_v32  ;;  %v5554_v47 = vld [vmem:[#allocation6 + $0x190] ss:$8 sps:$4 sm:$0xff]  }
 0x8f8   : > { %v5782_v5 = vpop.eup %5781  ;;  %v2934_v54 = vmul.f32 %v5780_v12, %v6639_v35  ;;  %v3512_v35 = vrot.slane %v6680_v23, %v6240_v60 }
 0x8f9   : > { %v6686_v25 = vmul.f32 %v5782_v5, %v6642_v38  ;;  %v2943_v28 = vpack.c.bf16 %v6673_v51, %v6670_v8  ;;  %v5545_v38 = vld [vmem:[#allocation6 + $0x160] ss:$8 sps:$4 sm:$0xff]   ;;  %v3524_v8 = vrot.slane %v6680_v23, %v6311_v50 }
 0x8fa   : > { %3391 = vmatpush1.bf16.msra.mxu0 %v5539_v31  ;;  %v2942_v32 = vpack.c.bf16 %v2934_v54, %v2930_v19  ;;  %v5559_v19 = vld [vmem:[#allocation6 + $0x1a4] ss:$8 sps:$4 sm:$0xff]   ;;  %v5593_v51 = vld [vmem:[#allocation6 + $0x260] ss:$8 sps:$4 sm:$0xff]  }
 0x8fb   : > { %3392 = vmatprep.subr.bf16.mxu0 %v5544_v11  ;;  %v2944_v13 = vpack.c.bf16 %v6686_v25, %v6683_v24  ;;  %v5592_v24 = vld [vmem:[#allocation6 + $0x254] ss:$8 sps:$4 sm:$0xff]   ;;  %v5590_v25 = vld [vmem:[#allocation6 + $0x250] ss:$8 sps:$4 sm:$0xff]  }
 0x8fc   : > { %3371 = vmatprep.mubr.bf16.mxu0 %v2942_v32 }
 0x8fd   : > { %3372 = vmatmul.mubr.bf16.gmra.mrb[36].mxu0 %v2941_v30 }
 0x8fe   : > { %3414 = vmatprep.mubr.bf16.mxu0 %v2940_v9  ;;  %3393 = vmatpush1.bf16.msra.mxu0 %v5542_v55  ;;  %v5548_v9 = vld [vmem:[#allocation6 + $0x170] ss:$8 sps:$4 sm:$0xff]  }
 0x8ff   : > { %v3883_v15 = vpop.f32.mrb[48].mxu1  ;;  %3394 = vmatprep.subr.bf16.mxu0 %v5547_v57 }
 0x900   : > { %v6696_v53 = vadd.f32 %v3883_v15, %v3512_v35  ;;  %v3885_v6 = vpop.f32.mrb[49].mxu1  ;;  %v5562_v15 = vld [vmem:[#allocation6 + $0x1b4] ss:$8 sps:$4 sm:$0xff]  }
 0x901   : > { %v6698_v21 = vadd.f32 %v3885_v6, %v3516_v17  ;;  %v3887_v48 = vpop.f32.mrb[50].mxu1 }
 0x902   : > { %v5043_v37 = vmul.f32 -1.702, %v6696_v53  ;;  %v6701_v40 = vadd.f32 %v3887_v48, %v3512_v35  ;;  %v3889_v1 = vpop.f32.mrb[51].mxu1  ;;  %3395 = vmatpush1.bf16.msra.mxu0 %v5545_v38 }
 0x903   : > { %v5044_v41 = vmul.f32 -1.702, %v6698_v21  ;;  %v6704_v14 = vadd.f32 %v3889_v1, %v3516_v17  ;;  %3396 = vmatprep.subr.bf16.mxu0 %v5550_v33 }
 0x904   : > { %v3987_v42 = vmul.f32 1.442695, %v5043_v37  ;;  %v5047_v4 = vmul.f32 -1.702, %v6701_v40 }
 0x905   : > { %v3989_v39 = vmul.f32 1.442695, %v5044_v41  ;;  %v5048_v2 = vmul.f32 -1.702, %v6704_v14  ;;  %v5560_v41 = vld [vmem:[#allocation6 + $0x1b0] ss:$8 sps:$4 sm:$0xff]  }
 0x906   : > { %5783 = vpow2.f32 %v3987_v42  ;;  %v3995_v45 = vmul.f32 1.442695, %v5047_v4  ;;  %3397 = vmatpush1.bf16.msra.mxu0 %v5548_v9  ;;  %v5565_v42 = vld [vmem:[#allocation6 + $0x1c4] ss:$8 sps:$4 sm:$0xff]   ;;  %v5563_v4 = vld [vmem:[#allocation6 + $0x1c0] ss:$8 sps:$4 sm:$0xff]  }
 0x907   : > { %5785 = vpow2.f32 %v3989_v39  ;;  %v3997_v0 = vmul.f32 1.442695, %v5048_v2  ;;  %v3893_v30 = vpop.f32.mrb[52].mxu1  ;;  %3398 = vmatprep.subr.bf16.mxu0 %v5553_v43  ;;  %v5568_v39 = vld [vmem:[#allocation6 + $0x1d4] ss:$8 sps:$4 sm:$0xff]  }
 0x908   : > { %5787 = vpow2.f32 %v3995_v45  ;;  %v6708_v58 = vadd.f32 %v3893_v30, %v3512_v35  ;;  %v3895_v46 = vpop.f32.mrb[53].mxu1 }
 0x909   : > { %5789 = vpow2.f32 %v3997_v0  ;;  %v6710_v62 = vadd.f32 %v3895_v46, %v3516_v17  ;;  %v3897_v61 = vpop.f32.mrb[54].mxu1 }
 0x90a   : > { %v5051_v36 = vmul.f32 -1.702, %v6708_v58  ;;  %v6713_v63 = vadd.f32 %v3897_v61, %v3512_v35  ;;  %v3899_v3 = vpop.f32.mrb[55].mxu1  ;;  %3399 = vmatpush1.bf16.msra.mxu0 %v5551_v52  ;;  %v5557_v35 = vld [vmem:[#allocation6 + $0x1a0] ss:$8 sps:$4 sm:$0xff]  }
 0x90b   : > { %v5052_v31 = vmul.f32 -1.702, %v6710_v62  ;;  %v6716_v11 = vadd.f32 %v3899_v3, %v3516_v17  ;;  %3400 = vmatprep.subr.bf16.mxu0 %v5556_v26  ;;  %v5566_v26 = vld [vmem:[#allocation6 + $0x1d0] ss:$8 sps:$4 sm:$0xff]  }
 0x90c   : > { %v4003_v12 = vmul.f32 1.442695, %v5051_v36  ;;  %v5055_v5 = vmul.f32 -1.702, %v6713_v63  ;;  %v5571_v36 = vld [vmem:[#allocation6 + $0x1e4] ss:$8 sps:$4 sm:$0xff]  }
 0x90d   : > { %v4005_v54 = vmul.f32 1.442695, %v5052_v31  ;;  %v5056_v32 = vmul.f32 -1.702, %v6716_v11 }
 0x90e   : > { %5791 = vpow2.f32 %v4003_v12  ;;  %v4011_v55 = vmul.f32 1.442695, %v5055_v5  ;;  %3401 = vmatpush1.bf16.msra.mxu0 %v5554_v47  ;;  %v5569_v12 = vld [vmem:[#allocation6 + $0x1e0] ss:$8 sps:$4 sm:$0xff]  }
 0x90f   : > { %5793 = vpow2.f32 %v4005_v54  ;;  %v4013_v57 = vmul.f32 1.442695, %v5056_v32  ;;  %3402 = vmatprep.subr.bf16.mxu0 %v5559_v19  ;;  %v5574_v32 = vld [vmem:[#allocation6 + $0x1f4] ss:$8 sps:$4 sm:$0xff]  }
 0x910   : > { %v5784_v38 = vpop.eup %5783  ;;  %5795 = vpow2.f32 %v4011_v55 }
 0x911   : > { %v5786_v17 = vpop.eup %5785  ;;  %v4019_v6 = vadd.f32 1.0, %v5784_v38  ;;  %5797 = vpow2.f32 %v4013_v57  ;;  %v5572_v38 = vld [vmem:[#allocation6 + $0x1f0] ss:$8 sps:$4 sm:$0xff]  }
 0x912   : > { %v5788_v33 = vpop.eup %5787  ;;  %v4020_v48 = vadd.f32 1.0, %v5786_v17  ;;  %3403 = vmatpush1.bf16.msra.mxu0 %v5557_v35  ;;  %v5577_v17 = vld [vmem:[#allocation6 + $0x204] ss:$8 sps:$4 sm:$0xff]  }
 0x913   : > { %v5790_v37 = vpop.eup %5789  ;;  %5799 = vrcp.f32 %v4019_v6  ;;  %v4023_v1 = vadd.f32 1.0, %v5788_v33  ;;  %3404 = vmatprep.subr.bf16.mxu0 %v5562_v15 }
 0x914   : > { %5801 = vrcp.f32 %v4020_v48  ;;  %v4024_v9 = vadd.f32 1.0, %v5790_v37 }
 0x915   : > { %5803 = vrcp.f32 %v4023_v1 }
 0x916   : > { %5805 = vrcp.f32 %v4024_v9  ;;  %3405 = vmatpush1.bf16.msra.mxu0 %v5560_v41 }
 0x917   : > { %3406 = vmatprep.subr.bf16.mxu0 %v5565_v42  ;;  %v5586_v42 = vld [vmem:[#allocation6 + $0x234] ss:$8 sps:$4 sm:$0xff]  }
 0x918   : > { %v5792_v43 = vpop.eup %5791 }
 0x919   : > { %v5794_v2 = vpop.eup %5793  ;;  %v4027_v45 = vadd.f32 1.0, %v5792_v43 }
 0x91a   : > { %v5796_v0 = vpop.eup %5795  ;;  %v4028_v52 = vadd.f32 1.0, %v5794_v2  ;;  %3407 = vmatpush1.bf16.msra.mxu0 %v5563_v4  ;;  %v3520_v4 = vrot.slane %v6680_v23, %v6308_v49  ;;  %v5598_v2 = vld [vmem:[#allocation6 + $0x274] ss:$8 sps:$4 sm:$0xff]   ;;  %v5596_v23 = vld [vmem:[#allocation6 + $0x270] ss:$8 sps:$4 sm:$0xff]  }
 0x91b   : > { %v5798_v30 = vpop.eup %5797  ;;  %5807 = vrcp.f32 %v4027_v45  ;;  %v4031_v46 = vadd.f32 1.0, %v5796_v0  ;;  %3408 = vmatprep.subr.bf16.mxu0 %v5568_v39 }
 0x91c   : > { %5809 = vrcp.f32 %v4028_v52  ;;  %v4032_v61 = vadd.f32 1.0, %v5798_v30 }
 0x91d   : > { %v5800_v3 = vpop.eup %5799  ;;  %5811 = vrcp.f32 %v4031_v46 }
 0x91e   : > { %v5802_v31 = vpop.eup %5801  ;;  %5813 = vrcp.f32 %v4032_v61  ;;  %3409 = vmatpush1.bf16.msra.mxu0 %v5566_v26  ;;  %v6721_v19 = vmul.f32 %v5800_v3, %v6696_v53 }
 0x91f   : > { %v5804_v47 = vpop.eup %5803  ;;  %3410 = vmatprep.subr.bf16.mxu0 %v5571_v36  ;;  %v4068_v55 = vmul.f32 %v5802_v31, %v6698_v21  ;;  %v5601_v36 = vld [vmem:[#allocation6 + $0x284] ss:$8 sps:$4 sm:$0xff]  }
 0x920   : > { %v5806_v5 = vpop.eup %5805  ;;  %v6724_v54 = vmul.f32 %v5804_v47, %v6701_v40  ;;  %v5575_v40 = vld [vmem:[#allocation6 + $0x200] ss:$8 sps:$4 sm:$0xff]  }
 0x921   : > { %v4072_v57 = vmul.f32 %v5806_v5, %v6704_v14  ;;  %v5580_v14 = vld [vmem:[#allocation6 + $0x214] ss:$8 sps:$4 sm:$0xff]   ;;  %v5599_v5 = vld [vmem:[#allocation6 + $0x280] ss:$8 sps:$4 sm:$0xff]  }
 0x922   : > { %v4083_v35 = vpack.c.bf16 %v6724_v54, %v6721_v19  ;;  %3411 = vmatpush1.bf16.msra.mxu0 %v5569_v12  ;;  %v5632_v19 = vld [vmem:[#allocation6 + $0x330] ss:$8 sps:$4 sm:$0xff]   ;;  %v5637_v54 = vld [vmem:[#allocation6 + $0x344] ss:$8 sps:$4 sm:$0xff]  }
 0x923   : > { %v4084_v15 = vpack.c.bf16 %v4072_v57, %v4068_v55  ;;  %3412 = vmatprep.subr.bf16.mxu0 %v5574_v32 }
 0x925   : > { %v5808_v6 = vpop.eup %5807 }
 0x926   : > { %v5810_v53 = vpop.eup %5809  ;;  %3413 = vmatpush1.bf16.msra.mxu0 %v5572_v38  ;;  %v6731_v37 = vmul.f32 %v5808_v6, %v6708_v58  ;;  %v5578_v58 = vld [vmem:[#allocation6 + $0x210] ss:$8 sps:$4 sm:$0xff]   ;;  %v5604_v38 = vld [vmem:[#allocation6 + $0x294] ss:$8 sps:$4 sm:$0xff]  }
 0x927   : > { %v5812_v33 = vpop.eup %5811  ;;  %4475 = vmatprep.subr.bf16.mxu0 %v5577_v17  ;;  %v6737_v1 = vmul.f32 %v5810_v53, %v6710_v62 }
 0x928   : > { %v5814_v48 = vpop.eup %5813  ;;  %v6734_v21 = vmul.f32 %v5812_v33, %v6713_v63  ;;  %v5583_v63 = vld [vmem:[#allocation6 + $0x224] ss:$8 sps:$4 sm:$0xff]  }
 0x929   : > { %v6740_v41 = vmul.f32 %v5814_v48, %v6716_v11  ;;  %3415 = vmatmul.mubr.bf16.vlgmr.msra.gmra.mrb[32].mxu0 %v2939_v10  ;;  %v5581_v11 = vld [vmem:[#allocation6 + $0x220] ss:$8 sps:$4 sm:$0xff]  }
 0x92a   : > { %v4087_v9 = vpack.c.bf16 %v6734_v21, %v6731_v37  ;;  %3424 = vmatprep.mubr.bf16.mxu0 %v2944_v13  ;;  %4476 = vmatpush1.bf16.msra.mxu0 %v5575_v40  ;;  %v5587_v10 = vld [vmem:[#allocation6 + $0x240] ss:$8 sps:$4 sm:$0xff]   ;;  %v5595_v13 = vld [vmem:[#allocation6 + $0x264] ss:$8 sps:$4 sm:$0xff]   ;;  %v5644_v37 = vld [vmem:[#allocation6 + $0x370] ss:$8 sps:$4 sm:$0xff]  }
 0x92b   : > { %v4088_v62 = vpack.c.bf16 %v6740_v41, %v6737_v1  ;;  %4477 = vmatprep.subr.bf16.mxu0 %v5580_v14  ;;  %v5602_v14 = vld [vmem:[#allocation6 + $0x290] ss:$8 sps:$4 sm:$0xff]   ;;  %v5640_v1 = vld [vmem:[#allocation6 + $0x354] ss:$8 sps:$4 sm:$0xff]   ;;  %v5649_v21 = vld [vmem:[#allocation6 + $0x384] ss:$8 sps:$4 sm:$0xff]  }
 0x92c   : > { %v5638_v41 = vld [vmem:[#allocation6 + $0x350] ss:$8 sps:$4 sm:$0xff]  }
 0x92e   : > { %4478 = vmatpush1.bf16.msra.mxu0 %v5578_v58 }
 0x92f   : > { %4479 = vmatprep.subr.bf16.mxu0 %v5583_v63 }
 0x931   : > { %3425 = vmatmul.mubr.bf16.gmra.mrb[36].mxu0 %v2943_v28 }
 0x932   : > { %4480 = vmatpush1.bf16.msra.mxu0 %v5581_v11  ;;  %4507 = vmatprep.mubr.bf16.mxu0 %v4084_v15  ;;  %v5607_v11 = vld [vmem:[#allocation6 + $0x2a4] ss:$8 sps:$4 sm:$0xff]  }
 0x933   : > { %4481 = vmatprep.subr.bf16.mxu0 %v5586_v42 }
 0x936   : > { %4482 = vmatpush1.bf16.msra.mxu0 %v5584_v20 }
 0x937   : > { %4483 = vmatprep.subr.bf16.mxu0 %v5589_v22 }
 0x93a   : > { %4484 = vmatpush1.bf16.msra.mxu0 %v5587_v10 }
 0x93b   : > { %4485 = vmatprep.subr.bf16.mxu0 %v5592_v24  ;;  %v5605_v24 = vld [vmem:[#allocation6 + $0x2a0] ss:$8 sps:$4 sm:$0xff]  }
 0x93e   : > { %4486 = vmatpush1.bf16.msra.mxu0 %v5590_v25 }
 0x93f   : > { %v3936_v28 = vpop.f32.mrb[56].mxu1  ;;  %4487 = vmatprep.subr.bf16.mxu0 %v5595_v13  ;;  %v5610_v13 = vld [vmem:[#allocation6 + $0x2b4] ss:$8 sps:$4 sm:$0xff]  }
 0x940   : > { %v6759_v43 = vadd.f32 %v3936_v28, %v3520_v4  ;;  %v3938_v39 = vpop.f32.mrb[57].mxu1 }
 0x941   : > { %v6761_v45 = vadd.f32 %v3938_v39, %v3524_v8  ;;  %v3940_v0 = vpop.f32.mrb[58].mxu1 }
 0x942   : > { %v5045_v52 = vmul.f32 -1.702, %v6759_v43  ;;  %v6764_v30 = vadd.f32 %v3940_v0, %v3520_v4  ;;  %v3942_v46 = vpop.f32.mrb[59].mxu1  ;;  %4488 = vmatpush1.bf16.msra.mxu0 %v5593_v51  ;;  %v5608_v0 = vld [vmem:[#allocation6 + $0x2b0] ss:$8 sps:$4 sm:$0xff]  }
 0x943   : > { %v5046_v49 = vmul.f32 -1.702, %v6761_v45  ;;  %v6767_v50 = vadd.f32 %v3942_v46, %v3524_v8  ;;  %4489 = vmatprep.subr.bf16.mxu0 %v5598_v2  ;;  %v5613_v46 = vld [vmem:[#allocation6 + $0x2c4] ss:$8 sps:$4 sm:$0xff]  }
 0x944   : > { %v3991_v26 = vmul.f32 1.442695, %v5045_v52  ;;  %v5049_v61 = vmul.f32 -1.702, %v6764_v30 }
 0x945   : > { %v3993_v3 = vmul.f32 1.442695, %v5046_v49  ;;  %v5050_v31 = vmul.f32 -1.702, %v6767_v50  ;;  %v5611_v49 = vld [vmem:[#allocation6 + $0x2c0] ss:$8 sps:$4 sm:$0xff]  }
 0x946   : > { %5815 = vpow2.f32 %v3991_v26  ;;  %v3999_v47 = vmul.f32 1.442695, %v5049_v61  ;;  %4490 = vmatpush1.bf16.msra.mxu0 %v5596_v23  ;;  %v5616_v26 = vld [vmem:[#allocation6 + $0x2d4] ss:$8 sps:$4 sm:$0xff]  }
 0x947   : > { %5817 = vpow2.f32 %v3993_v3  ;;  %v4001_v12 = vmul.f32 1.442695, %v5050_v31  ;;  %v3946_v32 = vpop.f32.mrb[60].mxu1  ;;  %4491 = vmatprep.subr.bf16.mxu0 %v5601_v36 }
 0x948   : > { %5819 = vpow2.f32 %v3999_v47  ;;  %v6771_v55 = vadd.f32 %v3946_v32, %v3520_v4  ;;  %v3948_v57 = vpop.f32.mrb[61].mxu1 }
 0x949   : > { %5821 = vpow2.f32 %v4001_v12  ;;  %v6773_v15 = vadd.f32 %v3948_v57, %v3524_v8  ;;  %v3950_v17 = vpop.f32.mrb[62].mxu1  ;;  %v5619_v57 = vld [vmem:[#allocation6 + $0x2e4] ss:$8 sps:$4 sm:$0xff]  }
 0x94a   : > { %v5053_v6 = vmul.f32 -1.702, %v6771_v55  ;;  %v6776_v53 = vadd.f32 %v3950_v17, %v3520_v4  ;;  %v3952_v33 = vpop.f32.mrb[63].mxu1  ;;  %4492 = vmatpush1.bf16.msra.mxu0 %v5599_v5  ;;  %v5614_v5 = vld [vmem:[#allocation6 + $0x2d0] ss:$8 sps:$4 sm:$0xff]  }
 0x94b   : > { %v5054_v40 = vmul.f32 -1.702, %v6773_v15  ;;  %v6779_v48 = vadd.f32 %v3952_v33, %v3524_v8  ;;  %4493 = vmatprep.subr.bf16.mxu0 %v5604_v38  ;;  %v5617_v33 = vld [vmem:[#allocation6 + $0x2e0] ss:$8 sps:$4 sm:$0xff]  }
 0x94c   : > { %v4007_v58 = vmul.f32 1.442695, %v5053_v6  ;;  %v5057_v63 = vmul.f32 -1.702, %v6776_v53 }
 0x94d   : > { %v4009_v42 = vmul.f32 1.442695, %v5054_v40  ;;  %v5058_v20 = vmul.f32 -1.702, %v6779_v48 }
 0x94e   : > { %5823 = vpow2.f32 %v4007_v58  ;;  %v4015_v22 = vmul.f32 1.442695, %v5057_v63  ;;  %4494 = vmatpush1.bf16.msra.mxu0 %v5602_v14  ;;  %v5622_v63 = vld [vmem:[#allocation6 + $0x2f4] ss:$8 sps:$4 sm:$0xff]  }
 0x94f   : > { %5825 = vpow2.f32 %v4009_v42  ;;  %v4017_v10 = vmul.f32 1.442695, %v5058_v20  ;;  %4495 = vmatprep.subr.bf16.mxu0 %v5607_v11 }
 0x950   : > { %v5816_v25 = vpop.eup %5815  ;;  %5827 = vpow2.f32 %v4015_v22  ;;  %v5620_v22 = vld [vmem:[#allocation6 + $0x2f0] ss:$8 sps:$4 sm:$0xff]  }
 0x951   : > { %v5818_v4 = vpop.eup %5817  ;;  %v4021_v8 = vadd.f32 1.0, %v5816_v25  ;;  %5829 = vpow2.f32 %v4017_v10 }
 0x952   : > { %v5820_v51 = vpop.eup %5819  ;;  %v4022_v28 = vadd.f32 1.0, %v5818_v4  ;;  %4496 = vmatpush1.bf16.msra.mxu0 %v5605_v24  ;;  %v5625_v24 = vld [vmem:[#allocation6 + $0x304] ss:$8 sps:$4 sm:$0xff]  }
 0x953   : > { %v5822_v39 = vpop.eup %5821  ;;  %5831 = vrcp.f32 %v4021_v8  ;;  %v4025_v2 = vadd.f32 1.0, %v5820_v51  ;;  %4497 = vmatprep.subr.bf16.mxu0 %v5610_v13 }
 0x954   : > { %5833 = vrcp.f32 %v4022_v28  ;;  %v4026_v52 = vadd.f32 1.0, %v5822_v39 }
 0x955   : > { %5835 = vrcp.f32 %v4025_v2  ;;  %v5634_v2 = vld [vmem:[#allocation6 + $0x334] ss:$8 sps:$4 sm:$0xff]  }
 0x956   : > { %5837 = vrcp.f32 %v4026_v52  ;;  %4498 = vmatpush1.bf16.msra.mxu0 %v5608_v0  ;;  %v5641_v0 = vld [vmem:[#allocation6 + $0x360] ss:$8 sps:$4 sm:$0xff]   ;;  %v5646_v52 = vld [vmem:[#allocation6 + $0x374] ss:$8 sps:$4 sm:$0xff]  }
 0x957   : > { %4499 = vmatprep.subr.bf16.mxu0 %v5613_v46  ;;  %v5652_v46 = vld [vmem:[#allocation6 + $0x394] ss:$8 sps:$4 sm:$0xff]  }
 0x958   : > { %v5824_v23 = vpop.eup %5823 }
 0x959   : > { %v5826_v61 = vpop.eup %5825  ;;  %v4029_v36 = vadd.f32 1.0, %v5824_v23  ;;  %v5655_v23 = vld [vmem:[#allocation6 + $0x3a4] ss:$8 sps:$4 sm:$0xff]  }
 0x95a   : > { %v5828_v3 = vpop.eup %5827  ;;  %v4030_v31 = vadd.f32 1.0, %v5826_v61  ;;  %4500 = vmatpush1.bf16.msra.mxu0 %v5611_v49  ;;  %v5650_v49 = vld [vmem:[#allocation6 + $0x390] ss:$8 sps:$4 sm:$0xff]   ;;  %v5658_v61 = vld [vmem:[#allocation6 + $0x3b4] ss:$8 sps:$4 sm:$0xff]  }
 0x95b   : > { %v5830_v47 = vpop.eup %5829  ;;  %5839 = vrcp.f32 %v4029_v36  ;;  %v4033_v12 = vadd.f32 1.0, %v5828_v3  ;;  %4501 = vmatprep.subr.bf16.mxu0 %v5616_v26  ;;  %v5653_v26 = vld [vmem:[#allocation6 + $0x3a0] ss:$8 sps:$4 sm:$0xff]   ;;  %v5656_v36 = vld [vmem:[#allocation6 + $0x3b0] ss:$8 sps:$4 sm:$0xff]  }
 0x95c   : > { %5841 = vrcp.f32 %v4030_v31  ;;  %v4034_v32 = vadd.f32 1.0, %v5830_v47  ;;  %v5661_v3 = vld [vmem:[#allocation6 + $0x3c4] ss:$8 sps:$4 sm:$0xff]   ;;  %v5659_v31 = vld [vmem:[#allocation6 + $0x3c0] ss:$8 sps:$4 sm:$0xff]  }
 0x95d   : > { %v5832_v38 = vpop.eup %5831  ;;  %5843 = vrcp.f32 %v4033_v12  ;;  %v5664_v47 = vld [vmem:[#allocation6 + $0x3d4] ss:$8 sps:$4 sm:$0xff]   ;;  %v5662_v12 = vld [vmem:[#allocation6 + $0x3d0] ss:$8 sps:$4 sm:$0xff]  }
 0x95e   : > { %v5834_v17 = vpop.eup %5833  ;;  %5845 = vrcp.f32 %v4034_v32  ;;  %4502 = vmatpush1.bf16.msra.mxu0 %v5614_v5  ;;  %v6784_v14 = vmul.f32 %v5832_v38, %v6759_v43  ;;  %v5667_v5 = vld [vmem:[#allocation6 + $0x3e4] ss:$8 sps:$4 sm:$0xff]   ;;  %v5665_v32 = vld [vmem:[#allocation6 + $0x3e0] ss:$8 sps:$4 sm:$0xff]   ;;  %v5668_v38 = vld [vmem:[#allocation6 + $0x3f0] ss:$8 sps:$4 sm:$0xff]  }
 0x95f   : > { %v5836_v6 = vpop.eup %5835  ;;  %4503 = vmatprep.subr.bf16.mxu0 %v5619_v57  ;;  %v4070_v11 = vmul.f32 %v5834_v17, %v6761_v45  ;;  %v5670_v57 = vld [vmem:[#allocation6 + $0x3f4] ss:$8 sps:$4 sm:$0xff]   ;;  %v2277_v17 = vld [vmem:[%s6882_s17] sm:$0x3] }
 0x960   : > { %v5838_v40 = vpop.eup %5837  ;;  %v6787_v58 = vmul.f32 %v5836_v6, %v6764_v30  ;;  %v5623_v30 = vld [vmem:[#allocation6 + $0x300] ss:$8 sps:$4 sm:$0xff]   ;;  %v2282_v6 = vrot.slane %v2277_v17, %v6240_v60 }
 0x961   : > { %v4074_v42 = vmul.f32 %v5838_v40, %v6767_v50  ;;  %v5628_v50 = vld [vmem:[#allocation6 + $0x314] ss:$8 sps:$4 sm:$0xff]  }
 0x962   : > { %v4085_v20 = vpack.c.bf16 %v6787_v58, %v6784_v14  ;;  %4504 = vmatpush1.bf16.msra.mxu0 %v5617_v33  ;;  %v2286_v33 = vrot.slane %v2277_v17, %v6237_v59  ;;  %v2289_v40 = vadd.f32 %v6464_v16, %v2282_v6  ;;  %v2291_v60 = vadd.f32 %v6468_v44, %v2282_v6 }
 0x963   : > { %v4086_v10 = vpack.c.bf16 %v4074_v42, %v4070_v11  ;;  %4505 = vmatprep.subr.bf16.mxu0 %v5622_v63 }
 0x964   : > { %v2290_v58 = vadd.f32 %v6466_v34, %v2286_v33  ;;  %v2292_v16 = vadd.f32 %v6470_v18, %v2286_v33  ;;  %v2293_v34 = vadd.f32 %v6480_v27, %v2282_v6  ;;  %v2294_v44 = vadd.f32 %v6482_v56, %v2286_v33 }
 0x965   : > { %v5840_v25 = vpop.eup %5839  ;;  %v2295_v18 = vadd.f32 %v6484_v29, %v2282_v6 }
 0x966   : > { %v5842_v43 = vpop.eup %5841  ;;  %4506 = vmatpush1.bf16.msra.mxu0 %v5620_v22  ;;  %v6794_v8 = vmul.f32 %v5840_v25, %v6771_v55  ;;  %v5626_v55 = vld [vmem:[#allocation6 + $0x310] ss:$8 sps:$4 sm:$0xff]  }
 0x967   : > { %v5844_v13 = vpop.eup %5843  ;;  %4528 = vmatprep.subr.bf16.mxu0 %v5625_v24  ;;  %v6800_v51 = vmul.f32 %v5842_v43, %v6773_v15 }
 0x968   : > { %v5846_v4 = vpop.eup %5845  ;;  %v6797_v45 = vmul.f32 %v5844_v13, %v6776_v53  ;;  %v5631_v53 = vld [vmem:[#allocation6 + $0x324] ss:$8 sps:$4 sm:$0xff]  }
 0x969   : > { %v6803_v28 = vmul.f32 %v5846_v4, %v6779_v48  ;;  %4508 = vmatmul.mubr.bf16.vlgmr.msra.gmra.mrb[32].mxu0 %v4083_v35  ;;  %v5629_v48 = vld [vmem:[#allocation6 + $0x320] ss:$8 sps:$4 sm:$0xff]   ;;  %v2296_v4 = vadd.f32 %v6486_v7, %v2286_v33 }
 0x96a   : > { %v4089_v39 = vpack.c.bf16 %v6797_v45, %v6794_v8  ;;  %4517 = vmatprep.mubr.bf16.mxu0 %v4088_v62  ;;  %4529 = vmatpush1.bf16.msra.mxu0 %v5623_v30  ;;  %v5635_v35 = vld [vmem:[#allocation6 + $0x340] ss:$8 sps:$4 sm:$0xff]   ;;  %v5643_v62 = vld [vmem:[#allocation6 + $0x364] ss:$8 sps:$4 sm:$0xff]  }
 0x96b   : > { %v4090_v15 = vpack.c.bf16 %v6803_v28, %v6800_v51  ;;  %4530 = vmatprep.subr.bf16.mxu0 %v5628_v50 }
 0x96e   : > { %4531 = vmatpush1.bf16.msra.mxu0 %v5626_v55 }
 0x96f   : > { %4532 = vmatprep.subr.bf16.mxu0 %v5631_v53 }
 0x971   : > { %4518 = vmatmul.mubr.bf16.gmra.mrb[36].mxu0 %v4087_v9  ;;  %v5647_v9 = vld [vmem:[#allocation6 + $0x380] ss:$8 sps:$4 sm:$0xff]  }
 0x972   : > { %4533 = vmatpush1.bf16.msra.mxu0 %v5629_v48  ;;  %4560 = vmatprep.mubr.bf16.mxu0 %v4086_v10 }
 0x973   : > { %4534 = vmatprep.subr.bf16.mxu0 %v5634_v2 }
 0x976   : > { %4535 = vmatpush1.bf16.msra.mxu0 %v5632_v19 }
 0x977   : > { %4536 = vmatprep.subr.bf16.mxu0 %v5637_v54 }
 0x97a   : > { %4537 = vmatpush1.bf16.msra.mxu0 %v5635_v35 }
 0x97b   : > { %4538 = vmatprep.subr.bf16.mxu0 %v5640_v1 }
 0x97e   : > { %4539 = vmatpush1.bf16.msra.mxu0 %v5638_v41 }
 0x97f   : > { %4540 = vmatprep.subr.bf16.mxu0 %v5643_v62 }
 0x982   : > { %4541 = vmatpush1.bf16.msra.mxu0 %v5641_v0 }
 0x983   : > { %4542 = vmatprep.subr.bf16.mxu0 %v5646_v52 }
 0x986   : > { %4543 = vmatpush1.bf16.msra.mxu0 %v5644_v37 }
 0x987   : > { %4544 = vmatprep.subr.bf16.mxu0 %v5649_v21 }
 0x98a   : > { %4545 = vmatpush1.bf16.msra.mxu0 %v5647_v9 }
 0x98b   : > { %4546 = vmatprep.subr.bf16.mxu0 %v5652_v46 }
 0x98e   : > { %4547 = vmatpush1.bf16.msra.mxu0 %v5650_v49 }
 0x98f   : > { %4548 = vmatprep.subr.bf16.mxu0 %v5655_v23 }
 0x992   : > { %4549 = vmatpush1.bf16.msra.mxu0 %v5653_v26 }
 0x993   : > { %4550 = vmatprep.subr.bf16.mxu0 %v5658_v61 }
 0x996   : > { %4551 = vmatpush1.bf16.msra.mxu0 %v5656_v36 }
 0x997   : > { %4552 = vmatprep.subr.bf16.mxu0 %v5661_v3 }
 0x99a   : > { %4553 = vmatpush1.bf16.msra.mxu0 %v5659_v31 }
 0x99b   : > { %4554 = vmatprep.subr.bf16.mxu0 %v5664_v47 }
 0x99e   : > { %4555 = vmatpush1.bf16.msra.mxu0 %v5662_v12 }
 0x99f   : > { %4556 = vmatprep.subr.bf16.mxu0 %v5667_v5 }
 0x9a2   : > { %4557 = vmatpush1.bf16.msra.mxu0 %v5665_v32 }
 0x9a3   : > { %4558 = vmatprep.subr.bf16.mxu0 %v5670_v57 }
 0x9a6   : > { %4559 = vmatpush1.bf16.msra.mxu0 %v5668_v38 }
 0x9a9   : > { %4561 = vmatmul.mubr.bf16.vlgmr.msra.gmra.mrb[32].mxu0 %v4085_v20 }
 0x9aa   : > { %4570 = vmatprep.mubr.bf16.mxu0 %v4090_v15 }
 0x9b1   : > { %4571 = vmatmul.mubr.bf16.gmra.mrb[36].mxu0 %v4089_v39 }
 0xa7c   : > { %v4562_v14 = vpop.f32.mrb[32].mxu0 }
 0xa7d   : > { %v5199_v63 = vadd.f32 %v4562_v14, %v2289_v40  ;;  %v4564_v11 = vpop.f32.mrb[33].mxu0 }
 0xa7e   : > { %v5200_v59 = vadd.f32 %v4564_v11, %v2290_v58  ;;  %v4566_v42 = vpop.f32.mrb[34].mxu0 }
 0xa7f   : > { %4589 = vst [vmem:[%s6835_s12] sm:$0xff] %v5199_v63  ;;  %v5201_v20 = vadd.f32 %v4566_v42, %v2291_v60  ;;  %v4568_v22 = vpop.f32.mrb[35].mxu0 }
 0xa80   : > { %4590 = vst [vmem:[%s6835_s12 + $0x8] sm:$0xff] %v5200_v59  ;;  %v5202_v10 = vadd.f32 %v4568_v22, %v2292_v16 }
 0xa81   : > { %4591 = vst [vmem:[%s6835_s12 + $0x10] sm:$0xff] %v5201_v20 }
 0xa82   : > { %4592 = vst [vmem:[%s6835_s12 + $0x18] sm:$0xff] %v5202_v10 }
 0xa84   : > { %v4572_v24 = vpop.f32.mrb[36].mxu0 }
 0xa85   : > { %v5203_v25 = vadd.f32 %v4572_v24, %v2293_v34  ;;  %v4574_v43 = vpop.f32.mrb[37].mxu0 }
 0xa86   : > { %v5204_v13 = vadd.f32 %v4574_v43, %v2294_v44  ;;  %v4576_v30 = vpop.f32.mrb[38].mxu0 }
 0xa87   : > { %4593 = vst [vmem:[%s6835_s12 + $0x20] sm:$0xff] %v5203_v25  ;;  %v5205_v8 = vadd.f32 %v4576_v30, %v2295_v18  ;;  %v4578_v45 = vpop.f32.mrb[39].mxu0 }
 0xa88   : > { %4594 = vst [vmem:[%s6835_s12 + $0x28] sm:$0xff] %v5204_v13  ;;  %v5206_v50 = vadd.f32 %v4578_v45, %v2296_v4 }
 0xa89   : > { %4595 = vst [vmem:[%s6835_s12 + $0x30] sm:$0xff] %v5205_v8 }
 0xa8a   : > { %4596 = vst [vmem:[%s6835_s12 + $0x38] sm:$0xff] %v5206_v50 }
 0xa8b PF: > { %s25_s25 = sadd.s32 1, %s5953_s25  }
 0xa8c   : > { %p22_p3 = scmp.ge.s32.totalorder %s25_s25, 4  }
 0xa8e   :  { %24 = sbr.rel (!%p22_p3) target bundleno = 5 (0x5), region = 115 }
 0xa95   :  { %4621 = vsyncpa [#allocation3], 1 }
 0xa96   :  { %4623 = vsyncpa [#allocation3 + $0x1], 1 }
 0xa97   :  { %4624 = vsyncpa [#allocation5], 1 }

</bundles_post_ra>
